<compile_context>
chip_gen: v6e
topology: v6e:2x2x1
jax: 0.10.0
libtpu: 0.0.40
codegen_flags: <defaults>
</compile_context>

<pallas_src>
import functools
import math

import jax
import jax.numpy as jnp
from jax import lax
from jax.experimental import pallas as pl
from jax.experimental.pallas import tpu as pltpu


def _elu(y):
    # ELU(alpha=1); clamp exp argument so the unselected branch can't overflow.
    return jnp.where(y > 0.0, y, jnp.exp(jnp.minimum(y, 0.0)) - 1.0)


def _round_up(x, m):
    return ((x + m - 1) // m) * m


def _cparams(dims, est_bytes):
    # Scoped-VMEM request sized from the actual buffer footprint (2x margin),
    # floored at the v6e/v7x default and capped at v7x physical VMEM.
    vmem = int(min(max(2 * est_bytes, 32 * 1024 * 1024), 64 * 1024 * 1024))
    return pltpu.CompilerParams(dimension_semantics=dims, vmem_limit_bytes=vmem)


# -----------------------------------------------------------------------------
# Phase 1: feature encoder (full_block x2) + gc1 support, row-tiled, parallel.
# -----------------------------------------------------------------------------
def encoder_kernel(x_ref, we1_ref, sc1_ref, sh1_ref, we2_ref, sc2_ref, sh2_ref,
                   wg1_ref, featx_ref, sup1_ref):
    x = x_ref[...]
    feat = _elu(jnp.dot(x, we1_ref[...], preferred_element_type=jnp.float32)
                * sc1_ref[...] + sh1_ref[...])
    feat_x = _elu(jnp.dot(feat, we2_ref[...], preferred_element_type=jnp.float32)
                  * sc2_ref[...] + sh2_ref[...])
    featx_ref[...] = feat_x
    # gc1 support = feat_x @ W1 ; emitted in bf16 for the adj-streaming phase.
    sup1_ref[...] = jnp.dot(feat_x, wg1_ref[...],
                            preferred_element_type=jnp.float32).astype(jnp.bfloat16)


# -----------------------------------------------------------------------------
# Phase 2: hidden1 = relu(adj @ sup1); sup23 = hidden1 @ [W2 | W3].
# Grid (rows, K) with f32 VMEM accumulator; adj/sup1 streamed in bf16.
# -----------------------------------------------------------------------------
def gc1_kernel(adj_ref, sup1_ref, wg23_ref, sup23_ref, acc_ref):
    k = pl.program_id(1)

    @pl.when(k == 0)
    def _():
        acc_ref[...] = jnp.zeros_like(acc_ref)

    acc_ref[...] += jnp.dot(adj_ref[...], sup1_ref[...],
                            preferred_element_type=jnp.float32)

    @pl.when(k == pl.num_programs(1) - 1)
    def _():
        hidden1 = jnp.maximum(acc_ref[...], 0.0)   # gc1 act; extra F.relu() is a no-op
        sup23_ref[...] = jnp.dot(hidden1.astype(jnp.bfloat16), wg23_ref[...],
                                 preferred_element_type=jnp.float32
                                 ).astype(jnp.bfloat16)


# -----------------------------------------------------------------------------
# Phase 3: [mu | logvar] = adj @ sup23, then z / decoder / DEC head, packed
# into one lane-dense output slab.
# -----------------------------------------------------------------------------
def gc23_head_kernel(adj_ref, sup23_ref, featx_ref, wd_ref, scd_ref, shd_ref,
                     clu_ref, cnorm_ref, out_ref, acc_ref, *, gh2, alpha, pad):
    k = pl.program_id(1)

    @pl.when(k == 0)
    def _():
        acc_ref[...] = jnp.zeros_like(acc_ref)

    acc_ref[...] += jnp.dot(adj_ref[...], sup23_ref[...],
                            preferred_element_type=jnp.float32)

    @pl.when(k == pl.num_programs(1) - 1)
    def _():
        h23 = acc_ref[...]
        mu = h23[:, :gh2]              # gc2 output (act = identity)
        logvar = h23[:, gh2:]          # gc3 output (act = identity)

        # eval-mode reparameterize: gnn_z = mu ; z built once in registers.
        z = jnp.concatenate([featx_ref[...], mu], axis=1)       # (tile, latent)

        # decoder_L0: full_block(latent, input_dim) — single z @ Wd matmul.
        de = _elu(jnp.dot(z, wd_ref[...], preferred_element_type=jnp.float32)
                  * scd_ref[...] + shd_ref[...])

        # DEC soft assignment q_ik = (1 + ||z_i - c_k||^2 / alpha)^-1, row-normalized.
        zc = lax.dot_general(z, clu_ref[...], (((1,), (1,)), ((), ())),
                             preferred_element_type=jnp.float32)  # (tile, K)
        znorm = jnp.sum(z * z, axis=1, keepdims=True)
        d2 = jnp.maximum(znorm - 2.0 * zc + cnorm_ref[...], 0.0)  # guard cancellation
        qv = pl.reciprocal(1.0 + d2 * (1.0 / alpha), approx=True)  # EUP slot
        exponent = (alpha + 1.0) / 2.0
        if exponent != 1.0:                                        # static
            qv = qv ** exponent
        q = qv / jnp.sum(qv, axis=1, keepdims=True)                # exact: rows sum to 1

        payload = jnp.concatenate([z, logvar, de, q], axis=1)
        if pad > 0:                                                # static
            payload = jnp.concatenate(
                [payload, jnp.zeros((payload.shape[0], pad), jnp.float32)], axis=1)
        out_ref[...] = payload


# -----------------------------------------------------------------------------
# Wrapper
# -----------------------------------------------------------------------------
def sedr_forward(params, x, adj, *, alpha=1.0, tile=256):
    """Returns (z, mu, logvar, de_feat, q, feat_x, gnn_z) — eval-mode forward."""
    n, input_dim = x.shape
    fh1 = params["enc1"]["w"].shape[1]
    fh2 = params["enc2"]["w"].shape[1]
    gh1 = params["gc1_w"].shape[1]
    gh2 = params["gc2_w"].shape[1]
    latent = fh2 + gh2
    kc = params["cluster"].shape[0]

    # Tile sizing: lane/sublane-legal, pad nodes to a tile multiple.  Zero-padded
    # rows/cols of adj keep results for real rows exact.
    if tile >= n:
        tile = _round_up(n, 8)
    else:
        tile = _round_up(tile, 128)
    n_pad = _round_up(n, tile)
    if n_pad != n:
        x = jnp.pad(x, ((0, n_pad - n), (0, 0)))
        adj = jnp.pad(adj, ((0, n_pad - n), (0, n_pad - n)))
    gridr = n_pad // tile

    # One-time wrapper-side casts / reshapes.
    adj_b = adj.astype(jnp.bfloat16)     # normalized entries <= 1: bf16-safe stream
    wg23 = jnp.concatenate([params["gc2_w"], params["gc3_w"]],
                           axis=1).astype(jnp.bfloat16)            # (gh1, 2*gh2)
    we1, sc1, sh1 = params["enc1"]["w"], params["enc1"]["scale"], params["enc1"]["shift"]
    we2, sc2, sh2 = params["enc2"]["w"], params["enc2"]["scale"], params["enc2"]["shift"]
    wg1 = params["gc1_w"]
    wd, scd, shd = params["dec"]["w"], params["dec"]["scale"], params["dec"]["shift"]
    clu = params["cluster"]
    cnorm = jnp.sum(clu * clu, axis=1)[None, :]                    # (1, K)

    # ---- Phase 1: encoder + gc1 support (row-tiled, parallel) ---------------
    est1 = (2 * tile * (input_dim * 4 + fh2 * 4 + gh1 * 2)
            + 4 * (we1.size + we2.size + wg1.size) + 4096)
    feat_x_p, sup1_b = pl.pallas_call(
        encoder_kernel,
        out_shape=(jax.ShapeDtypeStruct((n_pad, fh2), jnp.float32),
                   jax.ShapeDtypeStruct((n_pad, gh1), jnp.bfloat16)),
        grid=(gridr,),
        in_specs=[
            pl.BlockSpec((tile, input_dim), lambda i: (i, 0)),
            pl.BlockSpec(we1.shape, lambda i: (0, 0)),
            pl.BlockSpec((1, fh1), lambda i: (0, 0)),
            pl.BlockSpec((1, fh1), lambda i: (0, 0)),
            pl.BlockSpec(we2.shape, lambda i: (0, 0)),
            pl.BlockSpec((1, fh2), lambda i: (0, 0)),
            pl.BlockSpec((1, fh2), lambda i: (0, 0)),
            pl.BlockSpec(wg1.shape, lambda i: (0, 0)),
        ],
        out_specs=(pl.BlockSpec((tile, fh2), lambda i: (i, 0)),
                   pl.BlockSpec((tile, gh1), lambda i: (i, 0))),
        compiler_params=_cparams(("parallel",), est1),
    )(x, we1, sc1, sh1, we2, sc2, sh2, wg1)

    # ---- Phase 2: hidden1 = relu(adj @ sup1); sup23 = hidden1 @ [W2|W3] -----
    est2 = (2 * (tile * tile * 2 + tile * gh1 * 2 + tile * 2 * gh2 * 2)
            + wg23.size * 2 + tile * gh1 * 4 + 4096)
    sup23_b = pl.pallas_call(
        gc1_kernel,
        out_shape=jax.ShapeDtypeStruct((n_pad, 2 * gh2), jnp.bfloat16),
        grid=(gridr, gridr),
        in_specs=[
            pl.BlockSpec((tile, tile), lambda i, k: (i, k)),     # adj (bf16)
            pl.BlockSpec((tile, gh1), lambda i, k: (k, 0)),      # sup1 (bf16)
            pl.BlockSpec(wg23.shape, lambda i, k: (0, 0)),       # [W2|W3] (bf16)
        ],
        out_specs=pl.BlockSpec((tile, 2 * gh2), lambda i, k: (i, 0)),
        scratch_shapes=[pltpu.VMEM((tile, gh1), jnp.float32)],
        compiler_params=_cparams(("parallel", "arbitrary"), est2),
    )(adj_b, sup1_b, wg23)

    # ---- Phase 3: [mu|logvar] = adj @ sup23 ; z / decoder / DEC head --------
    out_w = latent + gh2 + input_dim + kc
    slab_w = _round_up(out_w, 128)        # lane-dense packed output slab
    pad = slab_w - out_w
    est3 = (2 * (tile * tile * 2 + tile * 2 * gh2 * 2 + tile * fh2 * 4
                 + tile * slab_w * 4)
            + 4 * (wd.size + clu.size) + tile * 2 * gh2 * 4 + 4096)
    head = functools.partial(gc23_head_kernel, gh2=gh2, alpha=alpha, pad=pad)
    slab = pl.pallas_call(
        head,
        out_shape=jax.ShapeDtypeStruct((n_pad, slab_w), jnp.float32),
        grid=(gridr, gridr),
        in_specs=[
            pl.BlockSpec((tile, tile), lambda i, k: (i, k)),     # adj (bf16)
            pl.BlockSpec((tile, 2 * gh2), lambda i, k: (k, 0)),  # sup23 (bf16)
            pl.BlockSpec((tile, fh2), lambda i, k: (i, 0)),      # feat_x (f32)
            pl.BlockSpec(wd.shape, lambda i, k: (0, 0)),
            pl.BlockSpec((1, input_dim), lambda i, k: (0, 0)),
            pl.BlockSpec((1, input_dim), lambda i, k: (0, 0)),
            pl.BlockSpec(clu.shape, lambda i, k: (0, 0)),
            pl.BlockSpec((1, kc), lambda i, k: (0, 0)),
        ],
        out_specs=pl.BlockSpec((tile, slab_w), lambda i, k: (i, 0)),
        scratch_shapes=[pltpu.VMEM((tile, 2 * gh2), jnp.float32)],
        compiler_params=_cparams(("parallel", "arbitrary"), est3),
    )(adj_b, sup23_b, feat_x_p, wd, scd, shd, clu, cnorm)

    # Wrapper-side unpack of the lane-dense slab.
    z = slab[:n, :latent]
    logvar = slab[:n, latent:latent + gh2]
    de_feat = slab[:n, latent + gh2:latent + gh2 + input_dim]
    q = slab[:n, latent + gh2 + input_dim:out_w]
    feat_x = feat_x_p[:n]
    mu = z[:, fh2:]
    gnn_z = mu                           # eval-mode reparameterize returns mu
    return z, mu, logvar, de_feat, q, feat_x, gnn_z


# -----------------------------------------------------------------------------
# Pure-JAX reference (f32) — faithful eval-mode forward of the torch module.
# -----------------------------------------------------------------------------
def sedr_reference(params, x, adj, *, alpha=1.0):
    e1, e2, d0 = params["enc1"], params["enc2"], params["dec"]
    feat = _elu(x @ e1["w"] * e1["scale"] + e1["shift"])
    feat_x = _elu(feat @ e2["w"] * e2["scale"] + e2["shift"])
    hidden1 = jnp.maximum(adj @ (feat_x @ params["gc1_w"]), 0.0)
    mu = adj @ (hidden1 @ params["gc2_w"])
    logvar = adj @ (hidden1 @ params["gc3_w"])
    z = jnp.concatenate([feat_x, mu], axis=1)
    de = _elu(z @ d0["w"] * d0["scale"] + d0["shift"])
    d2 = jnp.sum((z[:, None, :] - params["cluster"][None, :, :]) ** 2, axis=2)
    q = 1.0 / (1.0 + d2 / alpha)
    q = q ** ((alpha + 1.0) / 2.0)
    q = q / jnp.sum(q, axis=1, keepdims=True)
    return z, mu, logvar, de, q, feat_x, mu


# -----------------------------------------------------------------------------
# Parameter init (deterministic; shapes follow SEDR.__init__)
# -----------------------------------------------------------------------------
def init_params(key, input_dim, fh1, fh2, gh1, gh2, n_clusters):
    ks = jax.random.split(key, 7)

    def full_block_params(k, din, dout):
        kw, kb, kg, kbt = jax.random.split(k, 4)
        w = jax.random.normal(kw, (din, dout), jnp.float32) / math.sqrt(din)
        b = 0.01 * jax.random.normal(kb, (1, dout), jnp.float32)
        gamma = 1.0 + 0.05 * jax.random.normal(kg, (1, dout), jnp.float32)
        beta = 0.05 * jax.random.normal(kbt, (1, dout), jnp.float32)
        rm = jnp.zeros((1, dout), jnp.float32)     # running_mean
        rv = jnp.ones((1, dout), jnp.float32)      # running_var
        eps = 1e-4                                 # BatchNorm1d(eps=0.0001)
        scale = gamma / jnp.sqrt(rv + eps)
        shift = (b - rm) * scale + beta
        return {"w": w, "scale": scale, "shift": shift}

    def xavier_uniform(k, shape):
        fan_in, fan_out = shape
        lim = math.sqrt(6.0 / (fan_in + fan_out))
        return jax.random.uniform(k, shape, jnp.float32, -lim, lim)

    latent = gh2 + fh2
    return {
        "enc1": full_block_params(ks[0], input_dim, fh1),
        "enc2": full_block_params(ks[1], fh1, fh2),
        "gc1_w": xavier_uniform(ks[2], (fh2, gh1)),
        "gc2_w": xavier_uniform(ks[3], (gh1, gh2)),
        "gc3_w": xavier_uniform(ks[4], (gh1, gh2)),
        "dec": full_block_params(ks[5], latent, input_dim),
        # torch.nn.init.xavier_normal_ for cluster_layer
        "cluster": jax.random.normal(ks[6], (n_clusters, latent), jnp.float32)
                   * math.sqrt(2.0 / (n_clusters + latent)),
    }


def make_adj(key, n, p):
    """Symmetric random graph + ring (no isolated nodes), GCN-normalized."""
    r = jax.random.uniform(key, (n, n))
    a = (r < p).astype(jnp.float32)
    a = jnp.maximum(a, a.T)
    ring = jnp.eye(n, k=1) + jnp.eye(n, k=-1)
    ring = ring.at[0, n - 1].set(1.0).at[n - 1, 0].set(1.0)
    a = jnp.maximum(a, ring.astype(jnp.float32))
    a = a + jnp.eye(n, dtype=jnp.float32)                      # self-loops
    d_inv_sqrt = 1.0 / jnp.sqrt(jnp.sum(a, axis=1))
    return a * d_inv_sqrt[:, None] * d_inv_sqrt[None, :]       # D^-1/2 A D^-1/2


# -----------------------------------------------------------------------------
# Main
# -----------------------------------------------------------------------------
if __name__ == "__main__":
    key = jax.random.PRNGKey(0)
    N = 256                 # number of graph nodes (spots)
    input_dim = 64
    fh1, fh2 = 64, 32       # feat_hidden1, feat_hidden2
    gh1, gh2 = 64, 32       # gcn_hidden1, gcn_hidden2
    dec_cluster_n = 8
    latent = fh2 + gh2

    k_par, k_x, k_adj = jax.random.split(key, 3)
    params = init_params(k_par, input_dim, fh1, fh2, gh1, gh2, dec_cluster_n)
    x = jax.random.normal(k_x, (N, input_dim), jnp.float32)
    adj = make_adj(k_adj, N, 0.05)

    # tile=128 so the adj@support phases run on a 2x2 grid (exercises the
    # VMEM accumulator / pl.when init-finalize path).
    fwd = jax.jit(functools.partial(sedr_forward, tile=128))
    out = fwd(params, x, adj)
    jax.block_until_ready(out)
    z, mu, logvar, de_feat, q, feat_x, gnn_z = out

    assert z.shape == (N, latent)
    assert mu.shape == (N, gh2) and logvar.shape == (N, gh2)
    assert de_feat.shape == (N, input_dim)
    assert q.shape == (N, dec_cluster_n)
    assert feat_x.shape == (N, fh2) and gnn_z.shape == (N, gh2)

    # Numerics vs. a high-precision pure-JAX reference (kernel streams adj in
    # bf16, so graph-dependent outputs get a looser tolerance).
    with jax.default_matmul_precision("highest"):
        ref = sedr_reference(params, x, adj)
    names = ("z", "mu", "logvar", "de_feat", "q", "feat_x", "gnn_z")
    tol = {"z": 0.10, "mu": 0.10, "logvar": 0.10, "de_feat": 0.15,
           "q": 0.01, "feat_x": 0.05, "gnn_z": 0.10}
    for name, got, want in zip(names, out, ref):
        err = float(jnp.max(jnp.abs(got.astype(jnp.float32) - want)))
        assert err < tol[name], f"{name}: max abs err {err}"
    assert bool(jnp.allclose(jnp.sum(q, axis=1), 1.0, atol=1e-4))
    assert bool(jnp.all(jnp.isfinite(z)))
    assert bool(jnp.all(jnp.isfinite(de_feat)))
    assert bool(jnp.all(jnp.isfinite(q)))
    print("KERNEL_OK")
</pallas_src>

<mosaic_0001>
module attributes {stable_mosaic.version = 11 : i64} {
  func.func @gc1_kernel(%arg0: i32, %arg1: i32, %arg2: memref<128x128xbf16, #tpu.memory_space<vmem>>, %arg3: memref<128x64xbf16, #tpu.memory_space<vmem>>, %arg4: memref<64x64xbf16, #tpu.memory_space<vmem>>, %arg5: memref<128x64xbf16, #tpu.memory_space<vmem>>, %arg6: memref<128x64xf32, #tpu.memory_space<vmem>>) attributes {dimension_semantics = [#tpu.dimension_semantics<parallel>, #tpu.dimension_semantics<arbitrary>], iteration_bounds = array<i64: 2, 2>, scalar_prefetch = 0 : i64, scratch_operands = 1 : i64, tpu.core_type = #tpu.core_type<tc>, window_params = [{transform_indices = @transform_0, window_bounds = array<i64: 128, 128>}, {transform_indices = @transform_1, window_bounds = array<i64: 128, 64>}, {pipeline_mode = #tpu.pipeline_mode<synchronous>, transform_indices = @transform_2, window_bounds = array<i64: 64, 64>}, {transform_indices = @transform_3, window_bounds = array<i64: 128, 64>}]} {
    %c0_i32 = arith.constant 0 : i32
    %0 = arith.cmpi eq, %arg1, %c0_i32 : i32
    %1 = arith.extui %0 : i1 to i32
    %c0_i32_0 = arith.constant 0 : i32
    %2 = arith.cmpi ne, %1, %c0_i32_0 : i32
    scf.if %2 {
      %cst_9 = arith.constant 0.000000e+00 : f32
      %12 = vector.broadcast %cst_9 : f32 to vector<128x64xf32>
      %c0_10 = arith.constant 0 : index
      %c0_11 = arith.constant 0 : index
      %13 = vector.load %arg6[%c0_10, %c0_11] : memref<128x64xf32, #tpu.memory_space<vmem>>, vector<128x64xf32>
      tpu.vector_store %arg6[%c0_10, %c0_11], %12 {strides = array<i32>} : memref<128x64xf32, #tpu.memory_space<vmem>>, vector<128x64xf32>,
    } else {
    }
    %c0 = arith.constant 0 : index
    %c0_1 = arith.constant 0 : index
    %3 = vector.load %arg6[%c0, %c0_1] : memref<128x64xf32, #tpu.memory_space<vmem>>, vector<128x64xf32>
    %c0_2 = arith.constant 0 : index
    %c0_3 = arith.constant 0 : index
    %4 = vector.load %arg2[%c0_2, %c0_3] : memref<128x128xbf16, #tpu.memory_space<vmem>>, vector<128x128xbf16>
    %c0_4 = arith.constant 0 : index
    %c0_5 = arith.constant 0 : index
    %5 = vector.load %arg3[%c0_4, %c0_5] : memref<128x64xbf16, #tpu.memory_space<vmem>>, vector<128x64xbf16>
    %cst = arith.constant dense<0.000000e+00> : vector<128x64xf32>
    %6 = tpu.matmul %4, %5, %cst {dimension_numbers = #tpu.dot_dimension_numbers<[1], [0], [0], [1], [0, 0, 1, 1], [], []>} : vector<128x128xbf16>, vector<128x64xbf16>, vector<128x64xf32> -> vector<128x64xf32>
    %7 = arith.addf %3, %6 : vector<128x64xf32>
    %c0_6 = arith.constant 0 : index
    %c0_7 = arith.constant 0 : index
    %8 = vector.load %arg6[%c0_6, %c0_7] : memref<128x64xf32, #tpu.memory_space<vmem>>, vector<128x64xf32>
    tpu.vector_store %arg6[%c0_6, %c0_7], %7 {strides = array<i32>} : memref<128x64xf32, #tpu.memory_space<vmem>>, vector<128x64xf32>,
    %c1_i32 = arith.constant 1 : i32
    %9 = arith.cmpi eq, %arg1, %c1_i32 : i32
    %10 = arith.extui %9 : i1 to i32
    %c0_i32_8 = arith.constant 0 : i32
    %11 = arith.cmpi ne, %10, %c0_i32_8 : i32
    scf.if %11 {
      %c0_9 = arith.constant 0 : index
      %c0_10 = arith.constant 0 : index
      %12 = vector.load %arg6[%c0_9, %c0_10] : memref<128x64xf32, #tpu.memory_space<vmem>>, vector<128x64xf32>
      %cst_11 = arith.constant 0.000000e+00 : f32
      %13 = vector.broadcast %cst_11 : f32 to vector<128x64xf32>
      %14 = arith.maximumf %12, %13 : vector<128x64xf32>
      %15 = arith.truncf %14 : vector<128x64xf32> to vector<128x64xbf16>
      %c0_12 = arith.constant 0 : index
      %c0_13 = arith.constant 0 : index
      %16 = vector.load %arg4[%c0_12, %c0_13] : memref<64x64xbf16, #tpu.memory_space<vmem>>, vector<64x64xbf16>
      %cst_14 = arith.constant dense<0.000000e+00> : vector<128x64xf32>
      %17 = tpu.matmul %15, %16, %cst_14 {dimension_numbers = #tpu.dot_dimension_numbers<[1], [0], [0], [1], [0, 0, 1, 1], [], []>} : vector<128x64xbf16>, vector<64x64xbf16>, vector<128x64xf32> -> vector<128x64xf32>
      %18 = arith.truncf %17 : vector<128x64xf32> to vector<128x64xbf16>
      %c0_15 = arith.constant 0 : index
      %c0_16 = arith.constant 0 : index
      %19 = vector.load %arg5[%c0_15, %c0_16] : memref<128x64xbf16, #tpu.memory_space<vmem>>, vector<128x64xbf16>
      tpu.vector_store %arg5[%c0_15, %c0_16], %18 {strides = array<i32>} : memref<128x64xbf16, #tpu.memory_space<vmem>>, vector<128x64xbf16>,
    } else {
    }
    return
  }
  func.func @transform_0(%arg0: i32, %arg1: i32) -> (i32, i32) {
    %c0_i32 = arith.constant 0 : i32
    return %arg0, %arg1 : i32, i32
  }
  func.func @transform_1(%arg0: i32, %arg1: i32) -> (i32, i32) {
    %c0_i32 = arith.constant 0 : i32
    %c0_i32_0 = arith.constant 0 : i32
    return %arg1, %c0_i32 : i32, i32
  }
  func.func @transform_2(%arg0: i32, %arg1: i32) -> (i32, i32) {
    %c0_i32 = arith.constant 0 : i32
    %c0_i32_0 = arith.constant 0 : i32
    %c0_i32_1 = arith.constant 0 : i32
    return %c0_i32, %c0_i32_0 : i32, i32
  }
  func.func @transform_3(%arg0: i32, %arg1: i32) -> (i32, i32) {
    %c0_i32 = arith.constant 0 : i32
    %c0_i32_0 = arith.constant 0 : i32
    return %arg0, %c0_i32 : i32, i32
  }
}

module attributes {stable_mosaic.version = 11 : i64} {
  func.func @encoder_kernel(%arg0: i32, %arg1: memref<128x64xf32, #tpu.memory_space<vmem>>, %arg2: memref<64x64xf32, #tpu.memory_space<vmem>>, %arg3: memref<1x64xf32, #tpu.memory_space<vmem>>, %arg4: memref<1x64xf32, #tpu.memory_space<vmem>>, %arg5: memref<64x32xf32, #tpu.memory_space<vmem>>, %arg6: memref<1x32xf32, #tpu.memory_space<vmem>>, %arg7: memref<1x32xf32, #tpu.memory_space<vmem>>, %arg8: memref<32x64xf32, #tpu.memory_space<vmem>>, %arg9: memref<128x32xf32, #tpu.memory_space<vmem>>, %arg10: memref<128x64xbf16, #tpu.memory_space<vmem>>) attributes {dimension_semantics = [#tpu.dimension_semantics<parallel>], iteration_bounds = array<i64: 2>, scalar_prefetch = 0 : i64, scratch_operands = 0 : i64, tpu.core_type = #tpu.core_type<tc>, window_params = [{transform_indices = @transform_0, window_bounds = array<i64: 128, 64>}, {pipeline_mode = #tpu.pipeline_mode<synchronous>, transform_indices = @transform_1, window_bounds = array<i64: 64, 64>}, {pipeline_mode = #tpu.pipeline_mode<synchronous>, transform_indices = @transform_2, window_bounds = array<i64: 1, 64>}, {pipeline_mode = #tpu.pipeline_mode<synchronous>, transform_indices = @transform_3, window_bounds = array<i64: 1, 64>}, {pipeline_mode = #tpu.pipeline_mode<synchronous>, transform_indices = @transform_4, window_bounds = array<i64: 64, 32>}, {pipeline_mode = #tpu.pipeline_mode<synchronous>, transform_indices = @transform_5, window_bounds = array<i64: 1, 32>}, {pipeline_mode = #tpu.pipeline_mode<synchronous>, transform_indices = @transform_6, window_bounds = array<i64: 1, 32>}, {pipeline_mode = #tpu.pipeline_mode<synchronous>, transform_indices = @transform_7, window_bounds = array<i64: 32, 64>}, {transform_indices = @transform_8, window_bounds = array<i64: 128, 32>}, {transform_indices = @transform_9, window_bounds = array<i64: 128, 64>}]} {
    %c0 = arith.constant 0 : index
    %c0_0 = arith.constant 0 : index
    %0 = vector.load %arg1[%c0, %c0_0] : memref<128x64xf32, #tpu.memory_space<vmem>>, vector<128x64xf32>
    %c0_1 = arith.constant 0 : index
    %c0_2 = arith.constant 0 : index
    %1 = vector.load %arg2[%c0_1, %c0_2] : memref<64x64xf32, #tpu.memory_space<vmem>>, vector<64x64xf32>
    %cst = arith.constant dense<0.000000e+00> : vector<128x64xf32>
    %2 = tpu.matmul %0, %1, %cst {dimension_numbers = #tpu.dot_dimension_numbers<[1], [0], [0], [1], [0, 0, 1, 1], [], []>} : vector<128x64xf32>, vector<64x64xf32>, vector<128x64xf32> -> vector<128x64xf32>
    %c0_3 = arith.constant 0 : index
    %c0_4 = arith.constant 0 : index
    %3 = vector.load %arg3[%c0_3, %c0_4] : memref<1x64xf32, #tpu.memory_space<vmem>>, vector<1x64xf32>
    %4 = vector.broadcast %3 : vector<1x64xf32> to vector<128x64xf32>
    %5 = arith.mulf %2, %4 : vector<128x64xf32>
    %c0_5 = arith.constant 0 : index
    %c0_6 = arith.constant 0 : index
    %6 = vector.load %arg4[%c0_5, %c0_6] : memref<1x64xf32, #tpu.memory_space<vmem>>, vector<1x64xf32>
    %7 = vector.broadcast %6 : vector<1x64xf32> to vector<128x64xf32>
    %8 = arith.addf %5, %7 : vector<128x64xf32>
    %cst_7 = arith.constant 0.000000e+00 : f32
    %9 = vector.broadcast %cst_7 : f32 to vector<128x64xf32>
    %10 = arith.cmpf ogt, %8, %9 : vector<128x64xf32>
    %cst_8 = arith.constant 0.000000e+00 : f32
    %11 = vector.broadcast %cst_8 : f32 to vector<128x64xf32>
    %12 = arith.minimumf %8, %11 : vector<128x64xf32>
    %13 = math.exp %12 : vector<128x64xf32>
    %cst_9 = arith.constant 1.000000e+00 : f32
    %14 = vector.broadcast %cst_9 : f32 to vector<128x64xf32>
    %15 = arith.subf %13, %14 : vector<128x64xf32>
    %16 = arith.select %10, %8, %15 : vector<128x64xi1>, vector<128x64xf32>
    %c0_10 = arith.constant 0 : index
    %c0_11 = arith.constant 0 : index
    %17 = vector.load %arg5[%c0_10, %c0_11] : memref<64x32xf32, #tpu.memory_space<vmem>>, vector<64x32xf32>
    %cst_12 = arith.constant dense<0.000000e+00> : vector<128x32xf32>
    %18 = tpu.matmul %16, %17, %cst_12 {dimension_numbers = #tpu.dot_dimension_numbers<[1], [0], [0], [1], [0, 0, 1, 1], [], []>} : vector<128x64xf32>, vector<64x32xf32>, vector<128x32xf32> -> vector<128x32xf32>
    %c0_13 = arith.constant 0 : index
    %c0_14 = arith.constant 0 : index
    %19 = vector.load %arg6[%c0_13, %c0_14] : memref<1x32xf32, #tpu.memory_space<vmem>>, vector<1x32xf32>
    %20 = vector.broadcast %19 : vector<1x32xf32> to vector<128x32xf32>
    %21 = arith.mulf %18, %20 : vector<128x32xf32>
    %c0_15 = arith.constant 0 : index
    %c0_16 = arith.constant 0 : index
    %22 = vector.load %arg7[%c0_15, %c0_16] : memref<1x32xf32, #tpu.memory_space<vmem>>, vector<1x32xf32>
    %23 = vector.broadcast %22 : vector<1x32xf32> to vector<128x32xf32>
    %24 = arith.addf %21, %23 : vector<128x32xf32>
    %cst_17 = arith.constant 0.000000e+00 : f32
    %25 = vector.broadcast %cst_17 : f32 to vector<128x32xf32>
    %26 = arith.cmpf ogt, %24, %25 : vector<128x32xf32>
    %cst_18 = arith.constant 0.000000e+00 : f32
    %27 = vector.broadcast %cst_18 : f32 to vector<128x32xf32>
    %28 = arith.minimumf %24, %27 : vector<128x32xf32>
    %29 = math.exp %28 : vector<128x32xf32>
    %cst_19 = arith.constant 1.000000e+00 : f32
    %30 = vector.broadcast %cst_19 : f32 to vector<128x32xf32>
    %31 = arith.subf %29, %30 : vector<128x32xf32>
    %32 = arith.select %26, %24, %31 : vector<128x32xi1>, vector<128x32xf32>
    %c0_20 = arith.constant 0 : index
    %c0_21 = arith.constant 0 : index
    %33 = vector.load %arg9[%c0_20, %c0_21] : memref<128x32xf32, #tpu.memory_space<vmem>>, vector<128x32xf32>
    tpu.vector_store %arg9[%c0_20, %c0_21], %32 {strides = array<i32>} : memref<128x32xf32, #tpu.memory_space<vmem>>, vector<128x32xf32>,
    %c0_22 = arith.constant 0 : index
    %c0_23 = arith.constant 0 : index
    %34 = vector.load %arg8[%c0_22, %c0_23] : memref<32x64xf32, #tpu.memory_space<vmem>>, vector<32x64xf32>
    %cst_24 = arith.constant dense<0.000000e+00> : vector<128x64xf32>
    %35 = tpu.matmul %32, %34, %cst_24 {dimension_numbers = #tpu.dot_dimension_numbers<[1], [0], [0], [1], [0, 0, 1, 1], [], []>} : vector<128x32xf32>, vector<32x64xf32>, vector<128x64xf32> -> vector<128x64xf32>
    %36 = arith.truncf %35 : vector<128x64xf32> to vector<128x64xbf16>
    %c0_25 = arith.constant 0 : index
    %c0_26 = arith.constant 0 : index
    %37 = vector.load %arg10[%c0_25, %c0_26] : memref<128x64xbf16, #tpu.memory_space<vmem>>, vector<128x64xbf16>
    tpu.vector_store %arg10[%c0_25, %c0_26], %36 {strides = array<i32>} : memref<128x64xbf16, #tpu.memory_space<vmem>>, vector<128x64xbf16>,
    return
  }
  func.func @transform_0(%arg0: i32) -> (i32, i32) {
    %c0_i32 = arith.constant 0 : i32
    %c0_i32_0 = arith.constant 0 : i32
    return %arg0, %c0_i32 : i32, i32
  }
  func.func @transform_1(%arg0: i32) -> (i32, i32) {
    %c0_i32 = arith.constant 0 : i32
    %c0_i32_0 = arith.constant 0 : i32
    %c0_i32_1 = arith.constant 0 : i32
    return %c0_i32, %c0_i32_0 : i32, i32
  }
  func.func @transform_2(%arg0: i32) -> (i32, i32) {
    %c0_i32 = arith.constant 0 : i32
    %c0_i32_0 = arith.constant 0 : i32
    %c0_i32_1 = arith.constant 0 : i32
    return %c0_i32, %c0_i32_0 : i32, i32
  }
  func.func @transform_3(%arg0: i32) -> (i32, i32) {
    %c0_i32 = arith.constant 0 : i32
    %c0_i32_0 = arith.constant 0 : i32
    %c0_i32_1 = arith.constant 0 : i32
    return %c0_i32, %c0_i32_0 : i32, i32
  }
  func.func @transform_4(%arg0: i32) -> (i32, i32) {
    %c0_i32 = arith.constant 0 : i32
    %c0_i32_0 = arith.constant 0 : i32
    %c0_i32_1 = arith.constant 0 : i32
    return %c0_i32, %c0_i32_0 : i32, i32
  }
  func.func @transform_5(%arg0: i32) -> (i32, i32) {
    %c0_i32 = arith.constant 0 : i32
    %c0_i32_0 = arith.constant 0 : i32
    %c0_i32_1 = arith.constant 0 : i32
    return %c0_i32, %c0_i32_0 : i32, i32
  }
  func.func @transform_6(%arg0: i32) -> (i32, i32) {
    %c0_i32 = arith.constant 0 : i32
    %c0_i32_0 = arith.constant 0 : i32
    %c0_i32_1 = arith.constant 0 : i32
    return %c0_i32, %c0_i32_0 : i32, i32
  }
  func.func @transform_7(%arg0: i32) -> (i32, i32) {
    %c0_i32 = arith.constant 0 : i32
    %c0_i32_0 = arith.constant 0 : i32
    %c0_i32_1 = arith.constant 0 : i32
    return %c0_i32, %c0_i32_0 : i32, i32
  }
  func.func @transform_8(%arg0: i32) -> (i32, i32) {
    %c0_i32 = arith.constant 0 : i32
    %c0_i32_0 = arith.constant 0 : i32
    return %arg0, %c0_i32 : i32, i32
  }
  func.func @transform_9(%arg0: i32) -> (i32, i32) {
    %c0_i32 = arith.constant 0 : i32
    %c0_i32_0 = arith.constant 0 : i32
    return %arg0, %c0_i32 : i32, i32
  }
}

module attributes {stable_mosaic.version = 11 : i64} {
  func.func @gc23_head_kernel(%arg0: i32, %arg1: i32, %arg2: memref<128x128xbf16, #tpu.memory_space<vmem>>, %arg3: memref<128x64xbf16, #tpu.memory_space<vmem>>, %arg4: memref<128x32xf32, #tpu.memory_space<vmem>>, %arg5: memref<64x64xf32, #tpu.memory_space<vmem>>, %arg6: memref<1x64xf32, #tpu.memory_space<vmem>>, %arg7: memref<1x64xf32, #tpu.memory_space<vmem>>, %arg8: memref<8x64xf32, #tpu.memory_space<vmem>>, %arg9: memref<1x8xf32, #tpu.memory_space<vmem>>, %arg10: memref<128x256xf32, #tpu.memory_space<vmem>>, %arg11: memref<128x64xf32, #tpu.memory_space<vmem>>) attributes {dimension_semantics = [#tpu.dimension_semantics<parallel>, #tpu.dimension_semantics<arbitrary>], iteration_bounds = array<i64: 2, 2>, scalar_prefetch = 0 : i64, scratch_operands = 1 : i64, tpu.core_type = #tpu.core_type<tc>, window_params = [{transform_indices = @transform_0, window_bounds = array<i64: 128, 128>}, {transform_indices = @transform_1, window_bounds = array<i64: 128, 64>}, {transform_indices = @transform_2, window_bounds = array<i64: 128, 32>}, {pipeline_mode = #tpu.pipeline_mode<synchronous>, transform_indices = @transform_3, window_bounds = array<i64: 64, 64>}, {pipeline_mode = #tpu.pipeline_mode<synchronous>, transform_indices = @transform_4, window_bounds = array<i64: 1, 64>}, {pipeline_mode = #tpu.pipeline_mode<synchronous>, transform_indices = @transform_5, window_bounds = array<i64: 1, 64>}, {pipeline_mode = #tpu.pipeline_mode<synchronous>, transform_indices = @transform_6, window_bounds = array<i64: 8, 64>}, {pipeline_mode = #tpu.pipeline_mode<synchronous>, transform_indices = @transform_7, window_bounds = array<i64: 1, 8>}, {transform_indices = @transform_8, window_bounds = array<i64: 128, 256>}]} {
    %c0_i32 = arith.constant 0 : i32
    %0 = arith.cmpi eq, %arg1, %c0_i32 : i32
    %1 = arith.extui %0 : i1 to i32
    %c0_i32_0 = arith.constant 0 : i32
    %2 = arith.cmpi ne, %1, %c0_i32_0 : i32
    scf.if %2 {
      %cst_9 = arith.constant 0.000000e+00 : f32
      %12 = vector.broadcast %cst_9 : f32 to vector<128x64xf32>
      %c0_10 = arith.constant 0 : index
      %c0_11 = arith.constant 0 : index
      %13 = vector.load %arg11[%c0_10, %c0_11] : memref<128x64xf32, #tpu.memory_space<vmem>>, vector<128x64xf32>
      tpu.vector_store %arg11[%c0_10, %c0_11], %12 {strides = array<i32>} : memref<128x64xf32, #tpu.memory_space<vmem>>, vector<128x64xf32>,
    } else {
    }
    %c0 = arith.constant 0 : index
    %c0_1 = arith.constant 0 : index
    %3 = vector.load %arg11[%c0, %c0_1] : memref<128x64xf32, #tpu.memory_space<vmem>>, vector<128x64xf32>
    %c0_2 = arith.constant 0 : index
    %c0_3 = arith.constant 0 : index
    %4 = vector.load %arg2[%c0_2, %c0_3] : memref<128x128xbf16, #tpu.memory_space<vmem>>, vector<128x128xbf16>
    %c0_4 = arith.constant 0 : index
    %c0_5 = arith.constant 0 : index
    %5 = vector.load %arg3[%c0_4, %c0_5] : memref<128x64xbf16, #tpu.memory_space<vmem>>, vector<128x64xbf16>
    %cst = arith.constant dense<0.000000e+00> : vector<128x64xf32>
    %6 = tpu.matmul %4, %5, %cst {dimension_numbers = #tpu.dot_dimension_numbers<[1], [0], [0], [1], [0, 0, 1, 1], [], []>} : vector<128x128xbf16>, vector<128x64xbf16>, vector<128x64xf32> -> vector<128x64xf32>
    %7 = arith.addf %3, %6 : vector<128x64xf32>
    %c0_6 = arith.constant 0 : index
    %c0_7 = arith.constant 0 : index
    %8 = vector.load %arg11[%c0_6, %c0_7] : memref<128x64xf32, #tpu.memory_space<vmem>>, vector<128x64xf32>
    tpu.vector_store %arg11[%c0_6, %c0_7], %7 {strides = array<i32>} : memref<128x64xf32, #tpu.memory_space<vmem>>, vector<128x64xf32>,
    %c1_i32 = arith.constant 1 : i32
    %9 = arith.cmpi eq, %arg1, %c1_i32 : i32
    %10 = arith.extui %9 : i1 to i32
    %c0_i32_8 = arith.constant 0 : i32
    %11 = arith.cmpi ne, %10, %c0_i32_8 : i32
    scf.if %11 {
      %c0_9 = arith.constant 0 : index
      %c0_10 = arith.constant 0 : index
      %12 = vector.load %arg11[%c0_9, %c0_10] : memref<128x64xf32, #tpu.memory_space<vmem>>, vector<128x64xf32>
      %13 = vector.extract_strided_slice %12 {offsets = [0, 0], sizes = [128, 32], strides = [1, 1]} : vector<128x64xf32> to vector<128x32xf32>
      %14 = vector.extract_strided_slice %12 {offsets = [0, 32], sizes = [128, 32], strides = [1, 1]} : vector<128x64xf32> to vector<128x32xf32>
      %c0_11 = arith.constant 0 : index
      %c0_12 = arith.constant 0 : index
      %15 = vector.load %arg4[%c0_11, %c0_12] : memref<128x32xf32, #tpu.memory_space<vmem>>, vector<128x32xf32>
      %16 = tpu.concatenate %15, %13 in 1 : vector<128x32xf32>, vector<128x32xf32> -> vector<128x64xf32>
      %c0_13 = arith.constant 0 : index
      %c0_14 = arith.constant 0 : index
      %17 = vector.load %arg5[%c0_13, %c0_14] : memref<64x64xf32, #tpu.memory_space<vmem>>, vector<64x64xf32>
      %cst_15 = arith.constant dense<0.000000e+00> : vector<128x64xf32>
      %18 = tpu.matmul %16, %17, %cst_15 {dimension_numbers = #tpu.dot_dimension_numbers<[1], [0], [0], [1], [0, 0, 1, 1], [], []>} : vector<128x64xf32>, vector<64x64xf32>, vector<128x64xf32> -> vector<128x64xf32>
      %c0_16 = arith.constant 0 : index
      %c0_17 = arith.constant 0 : index
      %19 = vector.load %arg6[%c0_16, %c0_17] : memref<1x64xf32, #tpu.memory_space<vmem>>, vector<1x64xf32>
      %20 = vector.broadcast %19 : vector<1x64xf32> to vector<128x64xf32>
      %21 = arith.mulf %18, %20 : vector<128x64xf32>
      %c0_18 = arith.constant 0 : index
      %c0_19 = arith.constant 0 : index
      %22 = vector.load %arg7[%c0_18, %c0_19] : memref<1x64xf32, #tpu.memory_space<vmem>>, vector<1x64xf32>
      %23 = vector.broadcast %22 : vector<1x64xf32> to vector<128x64xf32>
      %24 = arith.addf %21, %23 : vector<128x64xf32>
      %cst_20 = arith.constant 0.000000e+00 : f32
      %25 = vector.broadcast %cst_20 : f32 to vector<128x64xf32>
      %26 = arith.cmpf ogt, %24, %25 : vector<128x64xf32>
      %cst_21 = arith.constant 0.000000e+00 : f32
      %27 = vector.broadcast %cst_21 : f32 to vector<128x64xf32>
      %28 = arith.minimumf %24, %27 : vector<128x64xf32>
      %29 = math.exp %28 : vector<128x64xf32>
      %cst_22 = arith.constant 1.000000e+00 : f32
      %30 = vector.broadcast %cst_22 : f32 to vector<128x64xf32>
      %31 = arith.subf %29, %30 : vector<128x64xf32>
      %32 = arith.select %26, %24, %31 : vector<128x64xi1>, vector<128x64xf32>
      %c0_23 = arith.constant 0 : index
      %c0_24 = arith.constant 0 : index
      %33 = vector.load %arg8[%c0_23, %c0_24] : memref<8x64xf32, #tpu.memory_space<vmem>>, vector<8x64xf32>
      %cst_25 = arith.constant dense<0.000000e+00> : vector<128x8xf32>
      %34 = tpu.matmul %16, %33, %cst_25 {dimension_numbers = #tpu.dot_dimension_numbers<[1], [1], [0], [0], [0, 0, 1, 0], [], []>} : vector<128x64xf32>, vector<8x64xf32>, vector<128x8xf32> -> vector<128x8xf32>
      %35 = arith.mulf %16, %16 : vector<128x64xf32>
      %cst_26 = arith.constant dense<0.000000e+00> : vector<128xf32>
      %36 = vector.multi_reduction <add>, %35, %cst_26 [1] : vector<128x64xf32> to vector<128xf32>
      %37 = vector.shape_cast %36 : vector<128xf32> to vector<128x1xf32>
      %cst_27 = arith.constant 2.000000e+00 : f32
      %38 = vector.broadcast %cst_27 : f32 to vector<128x8xf32>
      %39 = arith.mulf %38, %34 : vector<128x8xf32>
      %40 = vector.broadcast %37 : vector<128x1xf32> to vector<128x8xf32>
      %41 = arith.subf %40, %39 : vector<128x8xf32>
      %c0_28 = arith.constant 0 : index
      %c0_29 = arith.constant 0 : index
      %42 = vector.load %arg9[%c0_28, %c0_29] : memref<1x8xf32, #tpu.memory_space<vmem>>, vector<1x8xf32>
      %43 = vector.broadcast %42 : vector<1x8xf32> to vector<128x8xf32>
      %44 = arith.addf %41, %43 : vector<128x8xf32>
      %cst_30 = arith.constant 0.000000e+00 : f32
      %45 = vector.broadcast %cst_30 : f32 to vector<128x8xf32>
      %46 = arith.maximumf %44, %45 : vector<128x8xf32>
      %cst_31 = arith.constant 1.000000e+00 : f32
      %47 = vector.broadcast %cst_31 : f32 to vector<128x8xf32>
      %48 = arith.mulf %46, %47 : vector<128x8xf32>
      %cst_32 = arith.constant 1.000000e+00 : f32
      %49 = vector.broadcast %cst_32 : f32 to vector<128x8xf32>
      %50 = arith.addf %49, %48 : vector<128x8xf32>
      %51 = tpu.reciprocal %50 {approx = true} : vector<128x8xf32> -> vector<128x8xf32>
      %cst_33 = arith.constant dense<0.000000e+00> : vector<128xf32>
      %52 = vector.multi_reduction <add>, %51, %cst_33 [1] : vector<128x8xf32> to vector<128xf32>
      %53 = vector.shape_cast %52 : vector<128xf32> to vector<128x1xf32>
      %54 = vector.broadcast %53 : vector<128x1xf32> to vector<128x8xf32>
      %55 = arith.divf %51, %54 : vector<128x8xf32>
      %56 = tpu.concatenate %16, %14, %32, %55 in 1 : vector<128x64xf32>, vector<128x32xf32>, vector<128x64xf32>, vector<128x8xf32> -> vector<128x168xf32>
      %cst_34 = arith.constant 0.000000e+00 : f32
      %57 = vector.broadcast %cst_34 : f32 to vector<128x88xf32>
      %58 = tpu.concatenate %56, %57 in 1 : vector<128x168xf32>, vector<128x88xf32> -> vector<128x256xf32>
      %c0_35 = arith.constant 0 : index
      %c0_36 = arith.constant 0 : index
      %59 = vector.load %arg10[%c0_35, %c0_36] : memref<128x256xf32, #tpu.memory_space<vmem>>, vector<128x256xf32>
      tpu.vector_store %arg10[%c0_35, %c0_36], %58 {strides = array<i32>} : memref<128x256xf32, #tpu.memory_space<vmem>>, vector<128x256xf32>,
    } else {
    }
    return
  }
  func.func @transform_0(%arg0: i32, %arg1: i32) -> (i32, i32) {
    %c0_i32 = arith.constant 0 : i32
    return %arg0, %arg1 : i32, i32
  }
  func.func @transform_1(%arg0: i32, %arg1: i32) -> (i32, i32) {
    %c0_i32 = arith.constant 0 : i32
    %c0_i32_0 = arith.constant 0 : i32
    return %arg1, %c0_i32 : i32, i32
  }
  func.func @transform_2(%arg0: i32, %arg1: i32) -> (i32, i32) {
    %c0_i32 = arith.constant 0 : i32
    %c0_i32_0 = arith.constant 0 : i32
    return %arg0, %c0_i32 : i32, i32
  }
  func.func @transform_3(%arg0: i32, %arg1: i32) -> (i32, i32) {
    %c0_i32 = arith.constant 0 : i32
    %c0_i32_0 = arith.constant 0 : i32
    %c0_i32_1 = arith.constant 0 : i32
    return %c0_i32, %c0_i32_0 : i32, i32
  }
  func.func @transform_4(%arg0: i32, %arg1: i32) -> (i32, i32) {
    %c0_i32 = arith.constant 0 : i32
    %c0_i32_0 = arith.constant 0 : i32
    %c0_i32_1 = arith.constant 0 : i32
    return %c0_i32, %c0_i32_0 : i32, i32
  }
  func.func @transform_5(%arg0: i32, %arg1: i32) -> (i32, i32) {
    %c0_i32 = arith.constant 0 : i32
    %c0_i32_0 = arith.constant 0 : i32
    %c0_i32_1 = arith.constant 0 : i32
    return %c0_i32, %c0_i32_0 : i32, i32
  }
  func.func @transform_6(%arg0: i32, %arg1: i32) -> (i32, i32) {
    %c0_i32 = arith.constant 0 : i32
    %c0_i32_0 = arith.constant 0 : i32
    %c0_i32_1 = arith.constant 0 : i32
    return %c0_i32, %c0_i32_0 : i32, i32
  }
  func.func @transform_7(%arg0: i32, %arg1: i32) -> (i32, i32) {
    %c0_i32 = arith.constant 0 : i32
    %c0_i32_0 = arith.constant 0 : i32
    %c0_i32_1 = arith.constant 0 : i32
    return %c0_i32, %c0_i32_0 : i32, i32
  }
  func.func @transform_8(%arg0: i32, %arg1: i32) -> (i32, i32) {
    %c0_i32 = arith.constant 0 : i32
    %c0_i32_0 = arith.constant 0 : i32
    return %arg0, %c0_i32 : i32, i32
  }
}

</mosaic_0001>

<bundles_post_ra>
// kernel: sedr_forward.4
= control target key start
LH: loop header
LB: loop body
LE: loop exit
PB: predicated region body
PF: predicated region fallthrough
CT: control target
= control target key end

     0   :  { %s1318_s12 = smov 0   ;;  %s1320_s13 = smov 0   ;;  %s1536_s0 = inlined_call_operand.vmem [shape: bf16[256,256], index: 0, kind: input, shape index: {}]   ;;  %s1537_s1 = inlined_call_operand.vmem [shape: bf16[256,64], index: 1, kind: input, shape index: {}]   ;;  %s1538_s2 = inlined_call_operand.vmem [shape: bf16[64,64], index: 2, kind: input, shape index: {}]   ;;  %s1539_s3 = inlined_call_operand.vmem [shape: bf16[256,64], index: 3, kind: output, shape index: {}]  }
   0x1   :  { %s1322_s14 = smov 0   ;;  %s1324_s15 = smov 0  }
   0x2   :  { %s1326_s16 = smov 0   ;;  %s1328_s17 = smov 0  }
   0x3   :  { %s1330_s18 = smov 0  }
   0x4 LB: > { %s22_s19 = sadd.s32 1, %s1287_s16  ;;  %s25_s20 = sadd.s32 1, %s1291_s17  ;;  %s1295_s18 = sphi %s1330_s18, %s13_s18   ;;  %s1291_s17 = sphi %s1328_s17, %s1545_s17   ;;  %s1287_s16 = sphi %s1326_s16, %s1544_s16   ;;  %s1283_s15 = sphi %s1324_s15, %s1543_s15   ;;  %s1279_s14 = sphi %s1322_s14, %s1542_s14   ;;  %s1275_s13 = sphi %s1320_s13, %s1541_s13   ;;  %s1271_s12 = sphi %s1318_s12, %s1540_s12  }
   0x5   : > { %p23_p0 = scmp.ge.s32.totalorder %s22_s19, 2  ;;  %p41_p1 = scmp.ne.s32.totalorder %s1275_s13, %s1271_s12 }
   0x6   : > { %p42_p2 = scmp.eq.s32.totalorder %s1295_s18, 0  ;;  %s34_s24 = sadd.s32 1, %s1275_s13 }
   0x7   : > { %s1547_s19 = smov (%p23_p0, %s22_s19), 0  ;;  %s1549_s20 = smov (!%p23_p0, %s25_s20), %s1291_s17 }
   0x8   : > { %p43_p3 = por %p42_p2, %p41_p1  ;;  %p27_p4 = scmp.ge.s32.totalorder %s1549_s20, 2 }
   0x9   : > { %s30_s21 = ssub.s32 %s1287_s16, %s1547_s19  ;;  %p980_p6 = scmp.ge.s32.totalorder %s1295_s18, 4 }
   0xa   : > { %s1551_s20 = smov (%p27_p4, %s1549_s20), 0 }
   0xb   : > { %s29_s22 = ssub.s32 %s1291_s17, %s1551_s20  ;;  %143 = sbr.rel (%p980_p6) target bundleno = 32 (0x20), region = 20 }
   0xc   : > { %s31_s23 = sor.u32 %s30_s21, %s29_s22 }
   0xd   : > { %p32_p5 = scmp.eq.s32.totalorder %s31_s23, 0 }
   0xf   : > { %s1369_s25 = scalar_select %p32_p5, %s1275_s13, %s34_s24  }
  0x10   : > { %146 = sbr.rel (!%p43_p3) target bundleno = 32 (0x20), region = 24  ;;  %s148_s26 = sand.u32 (%p43_p3), 1, %s1275_s13  }
  0x11   : > { %s1039_s27 = sshll.u32 (%p43_p3), %s1291_s17, 5  ;;  %s981_s28 = sshll.u32 (%p43_p3), %s148_s26, 6 }
  0x12   : > { %s153_s29 = sadd.s32 (%p43_p3), %s1287_s16, %s1039_s27  ;;  %s150_s7 = scalar_lea.vmem (%p43_p3), [#allocation3], %s981_s28 }
  0x13   : > { %s984_s30 = sshll.u32 (%p43_p3), %s153_s29, 2 }
  0x14   : > { %s1378_s6 = scalar_lea.vmem (%p43_p3), %s1536_s0, %s984_s30 }
  0x15   : > { %v172_v0 = vld [vmem:[%s1378_s6] sm:$0xf]  ;;  %v174_v1 = vld [vmem:[%s1378_s6 + $0x8] sm:$0xf]  ;;  %v176_v2 = vld [vmem:[%s1378_s6 + $0x10] sm:$0xf] }
  0x16   : > { %173 = vst [vmem:[%s150_s7] sm:$0xf] %v172_v0  ;;  %175 = vst [vmem:[%s150_s7 + $0x4] sm:$0xf] %v174_v1  ;;  %v178_v3 = vld [vmem:[%s1378_s6 + $0x18] sm:$0xf] }
  0x17   : > { %177 = vst [vmem:[%s150_s7 + $0x8] sm:$0xf] %v176_v2  ;;  %v180_v4 = vld [vmem:[%s1378_s6 + $0x20] sm:$0xf]  ;;  %v182_v5 = vld [vmem:[%s1378_s6 + $0x28] sm:$0xf] }
  0x18   : > { %179 = vst [vmem:[%s150_s7 + $0xc] sm:$0xf] %v178_v3  ;;  %181 = vst [vmem:[%s150_s7 + $0x10] sm:$0xf] %v180_v4  ;;  %v184_v6 = vld [vmem:[%s1378_s6 + $0x30] sm:$0xf] }
  0x19   : > { %183 = vst [vmem:[%s150_s7 + $0x14] sm:$0xf] %v182_v5  ;;  %v186_v7 = vld [vmem:[%s1378_s6 + $0x38] sm:$0xf]  ;;  %v188_v8 = vld [vmem:[%s1378_s6 + $0x40] sm:$0xf] }
  0x1a   : > { %185 = vst [vmem:[%s150_s7 + $0x18] sm:$0xf] %v184_v6  ;;  %187 = vst [vmem:[%s150_s7 + $0x1c] sm:$0xf] %v186_v7  ;;  %v190_v9 = vld [vmem:[%s1378_s6 + $0x48] sm:$0xf] }
  0x1b   : > { %189 = vst [vmem:[%s150_s7 + $0x20] sm:$0xf] %v188_v8  ;;  %v192_v10 = vld [vmem:[%s1378_s6 + $0x50] sm:$0xf]  ;;  %v194_v11 = vld [vmem:[%s1378_s6 + $0x58] sm:$0xf] }
  0x1c   : > { %191 = vst [vmem:[%s150_s7 + $0x24] sm:$0xf] %v190_v9  ;;  %193 = vst [vmem:[%s150_s7 + $0x28] sm:$0xf] %v192_v10  ;;  %v196_v12 = vld [vmem:[%s1378_s6 + $0x60] sm:$0xf] }
  0x1d   : > { %195 = vst [vmem:[%s150_s7 + $0x2c] sm:$0xf] %v194_v11  ;;  %v198_v13 = vld [vmem:[%s1378_s6 + $0x68] sm:$0xf]  ;;  %v200_v14 = vld [vmem:[%s1378_s6 + $0x70] sm:$0xf] }
  0x1e   : > { %197 = vst [vmem:[%s150_s7 + $0x30] sm:$0xf] %v196_v12  ;;  %199 = vst [vmem:[%s150_s7 + $0x34] sm:$0xf] %v198_v13  ;;  %v202_v15 = vld [vmem:[%s1378_s6 + $0x78] sm:$0xf] }
  0x1f   : > { %201 = vst [vmem:[%s150_s7 + $0x38] sm:$0xf] %v200_v14  ;;  %203 = vst [vmem:[%s150_s7 + $0x3c] sm:$0xf] %v202_v15 }
  0x20 PF: > { %p985_p7 = scmp.ge.s32.totalorder %s1295_s18, 1  ;;  %p267_p8 = scmp.lt.s32.totalorder %s1295_s18, 5 }
  0x22   : > { %p268_p9 = pnand %p985_p7, %p267_p8 }
  0x23   : > { %s274_s8 = sand.u32 (!%p268_p9), 1, %s1271_s12   ;;  %s987_s9 = sshll.u32 (!%p268_p9), %s1279_s14, 4 }
  0x24   : > { %271 = sbr.rel (%p268_p9) target bundleno = 528 (0x210), region = 69  ;;  %s986_s10 = sshll.u32 (!%p268_p9), %s274_s8, 6 }
  0x25   : > { %p304_p10 = scmp.lt.s32.totalorder (!%p268_p9), %s987_s9, 31  ;;  %s989_s11 = sshll.u32 (!%p268_p9), %s1283_s15, 4 }
  0x26   : > { %p310_p11 = scmp.lt.s32.totalorder (!%p268_p9), %s989_s11, 31  ;;  %s1411_s12 = scalar_lea.vmem (!%p268_p9), [#allocation3], %s986_s10 }
  0x27   : > { %p991_p12 = scmp.ne.s32.totalorder (!%p268_p9), %s1279_s14, 0 }
  0x29   : > { %s1553_s9 = smov (!%p304_p10, %s987_s9), 31  ;;  %s1555_s11 = smov (!%p310_p11, %s989_s11), 31 }
  0x2a   : > { %s988_s21 = sshll.u32 %s1553_s9, 2  ;;  %s990_s26 = sshll.u32 %s1555_s11, 2 }
  0x2b   : > { %s1404_s24 = scalar_lea.vmem %s1537_s1, %s988_s21  ;;  %s1409_s29 = scalar_lea.vmem %s1539_s3, %s990_s26 }
  0x2c   : > { %319 = sbr.rel (%p991_p12) target bundleno = 58 (0x3a), region = 77 }
  0x31   : > { %vm320_vm0 = vcmask 523264   ;;  %v1297_v16 = vmov 0.0  }
  0x32   : > { %321 = vst.msk [vmem:[#allocation2] sm:$0xff] %vm320_vm0, %v1297_v16  ;;  %322 = vst.msk [vmem:[#allocation2 + $0x8] sm:$0xff] %vm320_vm0, %v1297_v16 }
  0x33   : > { %323 = vst.msk [vmem:[#allocation2 + $0x10] sm:$0xff] %vm320_vm0, %v1297_v16  ;;  %324 = vst.msk [vmem:[#allocation2 + $0x18] sm:$0xff] %vm320_vm0, %v1297_v16 }
  0x34   : > { %325 = vst.msk [vmem:[#allocation2 + $0x20] sm:$0xff] %vm320_vm0, %v1297_v16  ;;  %326 = vst.msk [vmem:[#allocation2 + $0x28] sm:$0xff] %vm320_vm0, %v1297_v16 }
  0x35   : > { %327 = vst.msk [vmem:[#allocation2 + $0x30] sm:$0xff] %vm320_vm0, %v1297_v16  ;;  %328 = vst.msk [vmem:[#allocation2 + $0x38] sm:$0xff] %vm320_vm0, %v1297_v16 }
  0x36   : > { %329 = vst.msk [vmem:[#allocation2 + $0x40] sm:$0xff] %vm320_vm0, %v1297_v16  ;;  %330 = vst.msk [vmem:[#allocation2 + $0x48] sm:$0xff] %vm320_vm0, %v1297_v16 }
  0x37   : > { %331 = vst.msk [vmem:[#allocation2 + $0x50] sm:$0xff] %vm320_vm0, %v1297_v16  ;;  %332 = vst.msk [vmem:[#allocation2 + $0x58] sm:$0xff] %vm320_vm0, %v1297_v16 }
  0x38   : > { %333 = vst.msk [vmem:[#allocation2 + $0x60] sm:$0xff] %vm320_vm0, %v1297_v16  ;;  %334 = vst.msk [vmem:[#allocation2 + $0x68] sm:$0xff] %vm320_vm0, %v1297_v16 }
  0x39   : > { %335 = vst.msk [vmem:[#allocation2 + $0x70] sm:$0xff] %vm320_vm0, %v1297_v16  ;;  %336 = vst.msk [vmem:[#allocation2 + $0x78] sm:$0xff] %vm320_vm0, %v1297_v16 }
  0x3a PF: > { %v1221_v17 = vld [vmem:[%s1404_s24 + $0x38] sm:$0xff]   ;;  %v1222_v18 = vld [vmem:[%s1404_s24 + $0x30] sm:$0xff]   ;;  %v1223_v19 = vld [vmem:[%s1404_s24 + $0x28] sm:$0xff]   ;;  %vm594_vm1 = vcmask 523264   ;;  %p1008_p13 = scmp.ne.s32.totalorder %s1279_s14, 1 }
  0x3b   : > { %1084 = vmatprep.subr.bf16.mxu0 %v1221_v17  ;;  %1140 = vmatprep.subr.bf16.mxu1 %v1221_v17  ;;  %v1224_v20 = vld [vmem:[%s1404_s24 + $0x20] sm:$0xff]   ;;  %v1225_v23 = vld [vmem:[%s1404_s24 + $0x18] sm:$0xff]   ;;  %v1226_v24 = vld [vmem:[%s1404_s24 + $0x10] sm:$0xff]  }
  0x3c   : > { %1085 = vmatpush3.bf16.msra.mxu0 %v1221_v17  ;;  %1148 = vmatpush3.bf16.msra.mxu1 %v1221_v17  ;;  %v1229_v21 = vld [vmem:[%s1411_s12] sm:$0xff]   ;;  %v1227_v25 = vld [vmem:[%s1404_s24 + $0x8] sm:$0xff]   ;;  %v1233_v29 = vld [vmem:[%s1411_s12 + $0x10] sm:$0xff]  }
  0x3d   : > { %1086 = vmatprep.subr.bf16.mxu0 %v1222_v18  ;;  %1141 = vmatprep.subr.bf16.mxu1 %v1222_v18  ;;  %v1230_v22 = vld [vmem:[%s1411_s12 + $0x20] sm:$0xff]   ;;  %v1231_v27 = vld [vmem:[%s1411_s12 + $0x8] sm:$0xff]   ;;  %v1234_v30 = vld [vmem:[%s1411_s12 + $0x30] sm:$0xff]  }
  0x3e   : > { %1100 = vmatprep.mubr.bf16.mxu0 %v1229_v21  ;;  %1108 = vmatprep.mubr.bf16.mxu1 %v1230_v22  ;;  %v1228_v26 = vld [vmem:[%s1404_s24] sm:$0xff]   ;;  %v1232_v28 = vld [vmem:[%s1411_s12 + $0x28] sm:$0xff]   ;;  %v1235_v31 = vld [vmem:[%s1411_s12 + $0x18] sm:$0xff]  }
  0x3f   : > { %v1236_v32 = vld [vmem:[%s1411_s12 + $0x38] sm:$0xff]   ;;  %v339_v33 = vld [vmem:[#allocation2 + $0x10] sm:$0xff]  ;;  %v337_v37 = vld [vmem:[#allocation2] sm:$0xff] }
  0x40   : > { %1087 = vmatpush3.bf16.msra.mxu0 %v1222_v18  ;;  %1149 = vmatpush3.bf16.msra.mxu1 %v1222_v18  ;;  %v347_v34 = vld [vmem:[#allocation2 + $0x50] sm:$0xff]  ;;  %v345_v38 = vld [vmem:[#allocation2 + $0x40] sm:$0xff]  ;;  %v340_v43 = vld [vmem:[#allocation2 + $0x18] sm:$0xff] }
  0x41   : > { %1088 = vmatprep.subr.bf16.mxu0 %v1223_v19  ;;  %1142 = vmatprep.subr.bf16.mxu1 %v1223_v19  ;;  %v348_v44 = vld [vmem:[#allocation2 + $0x58] sm:$0xff]  ;;  %v338_v49 = vld [vmem:[#allocation2 + $0x8] sm:$0xff]  ;;  %v343_v55 = vld [vmem:[#allocation2 + $0x30] sm:$0xff] }
  0x42   : > { %v346_v50 = vld [vmem:[#allocation2 + $0x48] sm:$0xff]  ;;  %v351_v56 = vld [vmem:[#allocation2 + $0x70] sm:$0xff]  ;;  %v341_v61 = vld [vmem:[#allocation2 + $0x20] sm:$0xff] }
  0x43   : > { %v349_v62 = vld [vmem:[#allocation2 + $0x60] sm:$0xff]  ;;  %v344_v3 = vld [vmem:[#allocation2 + $0x38] sm:$0xff]  ;;  %v342_v9 = vld [vmem:[#allocation2 + $0x28] sm:$0xff] }
  0x44   : > { %1089 = vmatpush3.bf16.msra.mxu0 %v1223_v19  ;;  %1150 = vmatpush3.bf16.msra.mxu1 %v1223_v19  ;;  %v352_v4 = vld [vmem:[#allocation2 + $0x78] sm:$0xff]  ;;  %v350_v10 = vld [vmem:[#allocation2 + $0x68] sm:$0xff] }
  0x45   : > { %1090 = vmatprep.subr.bf16.mxu0 %v1224_v20  ;;  %1143 = vmatprep.subr.bf16.mxu1 %v1224_v20 }
  0x48   : > { %1091 = vmatpush3.bf16.msra.mxu0 %v1224_v20  ;;  %1151 = vmatpush3.bf16.msra.mxu1 %v1224_v20 }
  0x49   : > { %1092 = vmatprep.subr.bf16.mxu0 %v1225_v23  ;;  %1144 = vmatprep.subr.bf16.mxu1 %v1225_v23 }
  0x4c   : > { %1093 = vmatpush3.bf16.msra.mxu0 %v1225_v23  ;;  %1152 = vmatpush3.bf16.msra.mxu1 %v1225_v23 }
  0x4d   : > { %1094 = vmatprep.subr.bf16.mxu0 %v1226_v24  ;;  %1145 = vmatprep.subr.bf16.mxu1 %v1226_v24 }
  0x50   : > { %1095 = vmatpush3.bf16.msra.mxu0 %v1226_v24  ;;  %1153 = vmatpush3.bf16.msra.mxu1 %v1226_v24 }
  0x51   : > { %1096 = vmatprep.subr.bf16.mxu0 %v1227_v25  ;;  %1146 = vmatprep.subr.bf16.mxu1 %v1227_v25 }
  0x54   : > { %1097 = vmatpush3.bf16.msra.mxu0 %v1227_v25  ;;  %1154 = vmatpush3.bf16.msra.mxu1 %v1227_v25 }
  0x55   : > { %1098 = vmatprep.subr.bf16.mxu0 %v1228_v26  ;;  %1147 = vmatprep.subr.bf16.mxu1 %v1228_v26 }
  0x58   : > { %1099 = vmatpush3.bf16.msra.mxu0 %v1228_v26  ;;  %1155 = vmatpush3.bf16.msra.mxu1 %v1228_v26 }
  0x5b   : > { %1101 = vmatmul.mubr.bf16.vlgmr.msra.gmra.mxu0 %v1231_v27  ;;  %1109 = vmatmul.mubr.bf16.vlgmr.msra.gmra.mxu1 %v1232_v28 }
  0x5c   : > { %1104 = vmatprep.mubr.bf16.mxu0 %v1233_v29  ;;  %1112 = vmatprep.mubr.bf16.mxu1 %v1234_v30 }
  0x63   : > { %1105 = vmatmul.mubr.bf16.gmra.mxu0 %v1235_v31  ;;  %1113 = vmatmul.mubr.bf16.gmra.mxu1 %v1236_v32 }
 0x11b   : > { %v1102_v35 = vpop.f32.mrf.mxu0  ;;  %v1110_v36 = vpop.f32.mrf.mxu1 }
 0x11c   : > { %v580_v39 = vadd.f32 %v1102_v35, %v339_v33  ;;  %v588_v40 = vadd.f32 %v1110_v36, %v347_v34 }
 0x11d   : > { %v515_v41 = vpop.f32.mrf.mxu0  ;;  %v547_v42 = vpop.f32.mrf.mxu1 }
 0x11e   : > { %597 = vst.msk [vmem:[#allocation2 + $0x10] sm:$0xff] %vm594_vm1, %v580_v39  ;;  %605 = vst.msk [vmem:[#allocation2 + $0x50] sm:$0xff] %vm594_vm1, %v588_v40  ;;  %v578_v45 = vadd.f32 %v515_v41, %v337_v37  ;;  %v586_v46 = vadd.f32 %v547_v42, %v345_v38 }
 0x11f   : > { %v1103_v47 = vpop.f32.mrf.mxu0  ;;  %v1111_v48 = vpop.f32.mrf.mxu1 }
 0x120   : > { %595 = vst.msk [vmem:[#allocation2] sm:$0xff] %vm594_vm1, %v578_v45  ;;  %603 = vst.msk [vmem:[#allocation2 + $0x40] sm:$0xff] %vm594_vm1, %v586_v46  ;;  %v581_v51 = vadd.f32 %v1103_v47, %v340_v43  ;;  %v589_v52 = vadd.f32 %v1111_v48, %v348_v44 }
 0x121   : > { %v518_v53 = vpop.f32.mrf.mxu0  ;;  %v550_v54 = vpop.f32.mrf.mxu1 }
 0x122   : > { %598 = vst.msk [vmem:[#allocation2 + $0x18] sm:$0xff] %vm594_vm1, %v581_v51  ;;  %606 = vst.msk [vmem:[#allocation2 + $0x58] sm:$0xff] %vm594_vm1, %v589_v52  ;;  %v579_v57 = vadd.f32 %v518_v53, %v338_v49  ;;  %v587_v58 = vadd.f32 %v550_v54, %v346_v50 }
 0x123   : > { %v1106_v59 = vpop.f32.mrf.mxu0  ;;  %v1114_v60 = vpop.f32.mrf.mxu1 }
 0x124   : > { %596 = vst.msk [vmem:[#allocation2 + $0x8] sm:$0xff] %vm594_vm1, %v579_v57  ;;  %604 = vst.msk [vmem:[#allocation2 + $0x48] sm:$0xff] %vm594_vm1, %v587_v58  ;;  %v584_v63 = vadd.f32 %v1106_v59, %v343_v55  ;;  %v592_v0 = vadd.f32 %v1114_v60, %v351_v56 }
 0x125   : > { %v531_v1 = vpop.f32.mrf.mxu0  ;;  %v563_v2 = vpop.f32.mrf.mxu1 }
 0x126   : > { %601 = vst.msk [vmem:[#allocation2 + $0x30] sm:$0xff] %vm594_vm1, %v584_v63  ;;  %609 = vst.msk [vmem:[#allocation2 + $0x70] sm:$0xff] %vm594_vm1, %v592_v0  ;;  %v582_v5 = vadd.f32 %v531_v1, %v341_v61  ;;  %v590_v6 = vadd.f32 %v563_v2, %v349_v62 }
 0x127   : > { %v1107_v7 = vpop.f32.mrf.mxu0  ;;  %v1115_v8 = vpop.f32.mrf.mxu1 }
 0x128   : > { %599 = vst.msk [vmem:[#allocation2 + $0x20] sm:$0xff] %vm594_vm1, %v582_v5  ;;  %607 = vst.msk [vmem:[#allocation2 + $0x60] sm:$0xff] %vm594_vm1, %v590_v6  ;;  %v585_v11 = vadd.f32 %v1107_v7, %v344_v3  ;;  %v593_v12 = vadd.f32 %v1115_v8, %v352_v4  ;;  %614 = sbr.rel (%p1008_p13) target bundleno = 528 (0x210), region = 81 }
 0x129   : > { %v534_v13 = vpop.f32.mrf.mxu0  ;;  %v566_v14 = vpop.f32.mrf.mxu1 }
 0x12a   : > { %602 = vst.msk [vmem:[#allocation2 + $0x38] sm:$0xff] %vm594_vm1, %v585_v11  ;;  %610 = vst.msk [vmem:[#allocation2 + $0x78] sm:$0xff] %vm594_vm1, %v593_v12  ;;  %v583_v15 = vadd.f32 %v534_v13, %v342_v9  ;;  %v591_v16 = vadd.f32 %v566_v14, %v350_v10 }
 0x12c   : > { %600 = vst.msk [vmem:[#allocation2 + $0x28] sm:$0xff] %vm594_vm1, %v583_v15  ;;  %608 = vst.msk [vmem:[#allocation2 + $0x68] sm:$0xff] %vm594_vm1, %v591_v16 }
 0x12d   : > { %v1237_v17 = vld [vmem:[%s1538_s2 + $0x18] sm:$0xff]   ;;  %v1238_v18 = vld [vmem:[%s1538_s2 + $0x10] sm:$0xff]   ;;  %v1239_v19 = vld [vmem:[%s1538_s2 + $0x8] sm:$0xff]   ;;  %vm872_vm2 = vcmask 519168  }
 0x12e   : > { %1116 = vmatprep.subr.bf16.mxu0 %v1237_v17  ;;  %1156 = vmatprep.subr.bf16.mxu1 %v1237_v17  ;;  %v615_v20 = vld [vmem:[#allocation2] sm:$0xff]  ;;  %v616_v21 = vld [vmem:[#allocation2 + $0x8] sm:$0xff]  ;;  %v617_v29 = vld [vmem:[#allocation2 + $0x10] sm:$0xff] }
 0x12f   : > { %1117 = vmatpush3.bf16.msra.mxu0 %v1237_v17  ;;  %1160 = vmatpush3.bf16.msra.mxu1 %v1237_v17  ;;  %v623_v22 = vld [vmem:[#allocation2 + $0x40] sm:$0xff]  ;;  %v631_v23 = vmax.f32 %v615_v20, 0.0  ;;  %v632_v24 = vmax.f32 %v616_v21, 0.0  ;;  %v624_v25 = vld [vmem:[#allocation2 + $0x48] sm:$0xff]  ;;  %v618_v30 = vld [vmem:[#allocation2 + $0x18] sm:$0xff]  ;;  %v633_v39 = vmax.f32 %v617_v29, 0.0 }
 0x130   : > { %1118 = vmatprep.subr.bf16.mxu0 %v1238_v18  ;;  %1157 = vmatprep.subr.bf16.mxu1 %v1238_v18  ;;  %v639_v26 = vmax.f32 %v623_v22, 0.0  ;;  %v1240_v27 = vld [vmem:[%s1538_s2] sm:$0xff]   ;;  %v640_v28 = vmax.f32 %v624_v25, 0.0  ;;  %v625_v32 = vld [vmem:[#allocation2 + $0x50] sm:$0xff]  ;;  %v626_v33 = vld [vmem:[#allocation2 + $0x58] sm:$0xff]  ;;  %v634_v40 = vmax.f32 %v618_v30, 0.0 }
 0x131   : > { %v647_v31 = vpack.c.bf16 %v632_v24, %v631_v23  ;;  %v619_v34 = vld [vmem:[#allocation2 + $0x20] sm:$0xff]  ;;  %v641_v41 = vmax.f32 %v625_v32, 0.0  ;;  %v642_v42 = vmax.f32 %v626_v33, 0.0  ;;  %v621_v49 = vld [vmem:[#allocation2 + $0x30] sm:$0xff]  ;;  %v622_v52 = vld [vmem:[#allocation2 + $0x38] sm:$0xff] }
 0x132   : > { %v651_v35 = vpack.c.bf16 %v640_v28, %v639_v26  ;;  %v627_v37 = vld [vmem:[#allocation2 + $0x60] sm:$0xff]  ;;  %v635_v43 = vmax.f32 %v619_v34, 0.0  ;;  %v648_v47 = vpack.c.bf16 %v634_v40, %v633_v39  ;;  %v629_v53 = vld [vmem:[#allocation2 + $0x70] sm:$0xff]  ;;  %v630_v54 = vld [vmem:[#allocation2 + $0x78] sm:$0xff]  ;;  %v637_v55 = vmax.f32 %v621_v49, 0.0 }
 0x133   : > { %1119 = vmatpush3.bf16.msra.mxu0 %v1238_v18  ;;  %1161 = vmatpush3.bf16.msra.mxu1 %v1238_v18  ;;  %v620_v36 = vld [vmem:[#allocation2 + $0x28] sm:$0xff]  ;;  %v643_v45 = vmax.f32 %v627_v37, 0.0  ;;  %v652_v48 = vpack.c.bf16 %v642_v42, %v641_v41  ;;  %v638_v56 = vmax.f32 %v622_v52, 0.0  ;;  %v645_v57 = vmax.f32 %v629_v53, 0.0 }
 0x134   : > { %1120 = vmatprep.subr.bf16.mxu0 %v1239_v19  ;;  %1158 = vmatprep.subr.bf16.mxu1 %v1239_v19  ;;  %v628_v38 = vld [vmem:[#allocation2 + $0x68] sm:$0xff]  ;;  %v636_v44 = vmax.f32 %v620_v36, 0.0  ;;  %v646_v58 = vmax.f32 %v630_v54, 0.0 }
 0x135   : > { %1124 = vmatprep.mubr.msk.bf16.mxu0 %vm594_vm1, %v647_v31  ;;  %1132 = vmatprep.mubr.msk.bf16.mxu1 %vm594_vm1, %v651_v35  ;;  %v644_v46 = vmax.f32 %v628_v38, 0.0  ;;  %v650_v59 = vpack.c.bf16 %v638_v56, %v637_v55 }
 0x136   : > { %v649_v50 = vpack.c.bf16 %v636_v44, %v635_v43  ;;  %v654_v60 = vpack.c.bf16 %v646_v58, %v645_v57 }
 0x137   : > { %1121 = vmatpush3.bf16.msra.mxu0 %v1239_v19  ;;  %1162 = vmatpush3.bf16.msra.mxu1 %v1239_v19  ;;  %v653_v51 = vpack.c.bf16 %v644_v46, %v643_v45 }
 0x138   : > { %1122 = vmatprep.subr.bf16.mxu0 %v1240_v27  ;;  %1159 = vmatprep.subr.bf16.mxu1 %v1240_v27 }
 0x13b   : > { %1123 = vmatpush3.bf16.msra.mxu0 %v1240_v27  ;;  %1163 = vmatpush3.bf16.msra.mxu1 %v1240_v27 }
 0x13e   : > { %1125 = vmatmul.mubr.msk.bf16.vlgmr.msra.gmra.mxu0 %vm594_vm1, %v648_v47  ;;  %1133 = vmatmul.mubr.msk.bf16.vlgmr.msra.gmra.mxu1 %vm594_vm1, %v652_v48 }
 0x13f   : > { %1128 = vmatprep.mubr.msk.bf16.mxu0 %vm594_vm1, %v649_v50  ;;  %1136 = vmatprep.mubr.msk.bf16.mxu1 %vm594_vm1, %v653_v51 }
 0x146   : > { %1129 = vmatmul.mubr.msk.bf16.gmra.mxu0 %vm594_vm1, %v650_v59  ;;  %1137 = vmatmul.mubr.msk.bf16.gmra.mxu1 %vm594_vm1, %v654_v60 }
 0x1fe   : > { %v1126_v61 = vpop.f32.mrf.mxu0  ;;  %v1134_v62 = vpop.f32.mrf.mxu1 }
 0x1ff   : > { %v1042_v63 = vpack.c.bf16 %v1126_v61, %v1126_v61  ;;  %v1050_v0 = vpack.c.bf16 %v1134_v62, %v1134_v62 }
 0x200   : > { %v745_v1 = vpop.f32.mrf.mxu0  ;;  %v777_v2 = vpop.f32.mrf.mxu1 }
 0x201   : > { %875 = vst.msk [vmem:[%s1409_s29 + $0x8] sm:$0xf] %vm872_vm2, %v1042_v63  ;;  %883 = vst.msk [vmem:[%s1409_s29 + $0x28] sm:$0xf] %vm872_vm2, %v1050_v0  ;;  %v1040_v3 = vpack.c.bf16 %v745_v1, %v745_v1  ;;  %v1048_v4 = vpack.c.bf16 %v777_v2, %v777_v2 }
 0x202   : > { %v1127_v5 = vpop.f32.mrf.mxu0  ;;  %v1135_v6 = vpop.f32.mrf.mxu1 }
 0x203   : > { %873 = vst.msk [vmem:[%s1409_s29] sm:$0xf] %vm872_vm2, %v1040_v3  ;;  %881 = vst.msk [vmem:[%s1409_s29 + $0x20] sm:$0xf] %vm872_vm2, %v1048_v4  ;;  %v1043_v7 = vpack.c.bf16 %v1127_v5, %v1127_v5  ;;  %v1051_v8 = vpack.c.bf16 %v1135_v6, %v1135_v6 }
 0x204   : > { %v748_v9 = vpop.f32.mrf.mxu0  ;;  %v780_v10 = vpop.f32.mrf.mxu1 }
 0x205   : > { %876 = vst.msk [vmem:[%s1409_s29 + $0xc] sm:$0xf] %vm872_vm2, %v1043_v7  ;;  %884 = vst.msk [vmem:[%s1409_s29 + $0x2c] sm:$0xf] %vm872_vm2, %v1051_v8  ;;  %v1041_v11 = vpack.c.bf16 %v748_v9, %v748_v9  ;;  %v1049_v12 = vpack.c.bf16 %v780_v10, %v780_v10 }
 0x206   : > { %v1130_v13 = vpop.f32.mrf.mxu0  ;;  %v1138_v14 = vpop.f32.mrf.mxu1 }
 0x207   : > { %874 = vst.msk [vmem:[%s1409_s29 + $0x4] sm:$0xf] %vm872_vm2, %v1041_v11  ;;  %882 = vst.msk [vmem:[%s1409_s29 + $0x24] sm:$0xf] %vm872_vm2, %v1049_v12  ;;  %v1046_v15 = vpack.c.bf16 %v1130_v13, %v1130_v13  ;;  %v1054_v16 = vpack.c.bf16 %v1138_v14, %v1138_v14 }
 0x208   : > { %v761_v17 = vpop.f32.mrf.mxu0  ;;  %v793_v18 = vpop.f32.mrf.mxu1 }
 0x209   : > { %879 = vst.msk [vmem:[%s1409_s29 + $0x18] sm:$0xf] %vm872_vm2, %v1046_v15  ;;  %887 = vst.msk [vmem:[%s1409_s29 + $0x38] sm:$0xf] %vm872_vm2, %v1054_v16  ;;  %v1044_v19 = vpack.c.bf16 %v761_v17, %v761_v17  ;;  %v1052_v20 = vpack.c.bf16 %v793_v18, %v793_v18 }
 0x20a   : > { %v1131_v21 = vpop.f32.mrf.mxu0  ;;  %v1139_v22 = vpop.f32.mrf.mxu1 }
 0x20b   : > { %877 = vst.msk [vmem:[%s1409_s29 + $0x10] sm:$0xf] %vm872_vm2, %v1044_v19  ;;  %885 = vst.msk [vmem:[%s1409_s29 + $0x30] sm:$0xf] %vm872_vm2, %v1052_v20  ;;  %v1047_v23 = vpack.c.bf16 %v1131_v21, %v1131_v21  ;;  %v1055_v24 = vpack.c.bf16 %v1139_v22, %v1139_v22 }
 0x20c   : > { %v764_v25 = vpop.f32.mrf.mxu0  ;;  %v796_v26 = vpop.f32.mrf.mxu1 }
 0x20d   : > { %880 = vst.msk [vmem:[%s1409_s29 + $0x1c] sm:$0xf] %vm872_vm2, %v1047_v23  ;;  %888 = vst.msk [vmem:[%s1409_s29 + $0x3c] sm:$0xf] %vm872_vm2, %v1055_v24  ;;  %v1045_v27 = vpack.c.bf16 %v764_v25, %v764_v25  ;;  %v1053_v28 = vpack.c.bf16 %v796_v26, %v796_v26 }
 0x20f   : > { %878 = vst.msk [vmem:[%s1409_s29 + $0x14] sm:$0xf] %vm872_vm2, %v1045_v27  ;;  %886 = vst.msk [vmem:[%s1409_s29 + $0x34] sm:$0xf] %vm872_vm2, %v1053_v28 }
 0x210 PF: > { %s13_s18 = sadd.s32 1, %s1295_s18   ;;  %s1540_s12 = smov %s1275_s13 }
 0x211   : > { %p10_p0 = scmp.ge.s32.totalorder %s13_s18, 6   ;;  %s1541_s13 = smov %s1369_s25 }
 0x212   : > { %s1542_s14 = smov %s1287_s16  ;;  %s1543_s15 = smov %s1291_s17 }
 0x213   : > { %s1544_s16 = smov %s1547_s19  ;;  %s1545_s17 = smov %s1551_s20 }
 0x214   :  { %12 = sbr.rel (!%p10_p0) target bundleno = 4 (0x4), region = 119 }

// kernel: sedr_forward.3
= control target key start
LH: loop header
LB: loop body
LE: loop exit
PB: predicated region body
PF: predicated region fallthrough
CT: control target
= control target key end

     0   :  { %s1893_s30 = smov 0   ;;  %s2354_s0 = inlined_call_operand.vmem [shape: f32[256,64], index: 0, kind: input, shape index: {}]   ;;  %s2355_s1 = inlined_call_operand.vmem [shape: f32[64,64], index: 1, kind: input, shape index: {}]   ;;  %s2356_s2 = inlined_call_operand.vmem [shape: f32[1,64], index: 2, kind: input, shape index: {}]   ;;  %s2357_s3 = inlined_call_operand.vmem [shape: f32[1,64], index: 3, kind: input, shape index: {}]   ;;  %s2358_s4 = inlined_call_operand.vmem [shape: f32[64,32], index: 4, kind: input, shape index: {}]   ;;  %s2359_s5 = inlined_call_operand.vmem [shape: f32[1,32], index: 5, kind: input, shape index: {}]   ;;  %s2360_s6 = inlined_call_operand.vmem [shape: f32[1,32], index: 6, kind: input, shape index: {}]   ;;  %s2361_s7 = inlined_call_operand.vmem [shape: f32[32,64], index: 7, kind: input, shape index: {}]   ;;  %s2362_s8 = inlined_call_operand.vmem [shape: f32[256,32], index: 8, kind: output, shape index: {0}]   ;;  %s2363_s9 = inlined_call_operand.vmem [shape: bf16[256,64], index: 9, kind: output, shape index: {1}]  }
   0x1 LB: > { %s1438_s10 = sadd.s32 4294967295, %s1841_s30   ;;  %p1442_p0 = scmp.ge.s32.totalorder %s1841_s30, 1  ;;  %s1841_s30 = sphi %s1893_s30, %s20_s30  }
   0x2   : > { %p291_p1 = scmp.lt.s32.totalorder %s1841_s30, 3 }
   0x4   : > { %p292_p2 = pnand %p1442_p0, %p291_p1 }
   0x5   : > { %s1443_s15 = sshll.u32 (!%p292_p2), %s1438_s10, 4 }
   0x6   : > { %295 = sbr.rel (%p292_p2) target bundleno = 699 (0x2bb), region = 52  ;;  %p333_p3 = scmp.lt.s32.totalorder (!%p292_p2), %s1443_s15, 31 }
   0xb   : > { %v373_v0 = vld [vmem:[%s2355_s1 + $0x38] sm:$0xff]  ;;  %v372_v1 = vld [vmem:[%s2355_s1 + $0x30] sm:$0xff]  ;;  %v371_v2 = vld [vmem:[%s2355_s1 + $0x28] sm:$0xff]  ;;  %s2365_s15 = smov (!%p333_p3, %s1443_s15), 31  ;;  %vm374_vm0 = vcmask 523264  }
   0xc   : > { %1635 = vmatprep.subr.mxu0 %v373_v0  ;;  %1747 = vmatprep.subr.mxu1 %v373_v0  ;;  %v370_v3 = vld [vmem:[%s2355_s1 + $0x20] sm:$0xff]  ;;  %v369_v4 = vld [vmem:[%s2355_s1 + $0x18] sm:$0xff]  ;;  %v368_v5 = vld [vmem:[%s2355_s1 + $0x10] sm:$0xff]  ;;  %s1444_s24 = sshll.u32 %s2365_s15, 3 }
   0xd   : > { %1636 = vmatpush3.msra.mxu0 %v373_v0  ;;  %1755 = vmatpush3.msra.mxu1 %v373_v0  ;;  %v367_v6 = vld [vmem:[%s2355_s1 + $0x8] sm:$0xff]  ;;  %s1930_s29 = scalar_lea.vmem %s2354_s0, %s1444_s24  ;;  %v366_v7 = vld [vmem:[%s2355_s1] sm:$0xff]  ;;  %v717_v24 = vld [vmem:[%s2358_s4 + $0x38] sm:$0xff]  ;;  %s2198_s10 = scalar_lea.vmem %s2362_s8, %s1444_s24 }
   0xe   : > { %1637 = vmatprep.subr.mxu0 %v372_v1  ;;  %1748 = vmatprep.subr.mxu1 %v372_v1  ;;  %v350_v8 = vld [vmem:[%s1930_s29] sm:$0xff]  ;;  %v351_v10 = vld [vmem:[%s1930_s29 + $0x8] sm:$0xff]  ;;  %v352_v12 = vld [vmem:[%s1930_s29 + $0x10] sm:$0xff]  ;;  %s1448_s24 = sshll.u32 %s2365_s15, 2 }
   0xf   : > { %1638 = vmatpush3.msra.mxu0 %v372_v1  ;;  %1756 = vmatpush3.msra.mxu1 %v372_v1  ;;  %v358_v9 = vld [vmem:[%s1930_s29 + $0x40] sm:$0xff]  ;;  %v359_v11 = vld [vmem:[%s1930_s29 + $0x48] sm:$0xff]  ;;  %v360_v13 = vld [vmem:[%s1930_s29 + $0x50] sm:$0xff]  ;;  %s2317_s13 = scalar_lea.vmem %s2363_s9, %s1448_s24 }
  0x10   : > { %1639 = vmatprep.subr.mxu0 %v371_v2  ;;  %1749 = vmatprep.subr.mxu1 %v371_v2  ;;  %v353_v14 = vld [vmem:[%s1930_s29 + $0x18] sm:$0xff]  ;;  %v354_v16 = vld [vmem:[%s1930_s29 + $0x20] sm:$0xff]  ;;  %v355_v18 = vld [vmem:[%s1930_s29 + $0x28] sm:$0xff] }
  0x11   : > { %1640 = vmatpush3.msra.mxu0 %v371_v2  ;;  %1757 = vmatpush3.msra.mxu1 %v371_v2  ;;  %v361_v15 = vld [vmem:[%s1930_s29 + $0x58] sm:$0xff]  ;;  %v362_v17 = vld [vmem:[%s1930_s29 + $0x60] sm:$0xff]  ;;  %v363_v19 = vld [vmem:[%s1930_s29 + $0x68] sm:$0xff] }
  0x12   : > { %1641 = vmatprep.subr.mxu0 %v370_v3  ;;  %1750 = vmatprep.subr.mxu1 %v370_v3  ;;  %v356_v20 = vld [vmem:[%s1930_s29 + $0x30] sm:$0xff]  ;;  %v357_v22 = vld [vmem:[%s1930_s29 + $0x38] sm:$0xff]  ;;  %v715_v26 = vld [vmem:[%s2358_s4 + $0x28] sm:$0xff] }
  0x13   : > { %1642 = vmatpush3.msra.mxu0 %v370_v3  ;;  %1758 = vmatpush3.msra.mxu1 %v370_v3  ;;  %v364_v21 = vld [vmem:[%s1930_s29 + $0x70] sm:$0xff]  ;;  %v365_v23 = vld [vmem:[%s1930_s29 + $0x78] sm:$0xff]  ;;  %v714_v27 = vld [vmem:[%s2358_s4 + $0x20] sm:$0xff] }
  0x14   : > { %1643 = vmatprep.subr.mxu0 %v369_v4  ;;  %1751 = vmatprep.subr.mxu1 %v369_v4  ;;  %v716_v25 = vld [vmem:[%s2358_s4 + $0x30] sm:$0xff]  ;;  %v713_v28 = vld [vmem:[%s2358_s4 + $0x18] sm:$0xff]  ;;  %v711_v30 = vld [vmem:[%s2358_s4 + $0x8] sm:$0xff] }
  0x15   : > { %1644 = vmatpush3.msra.mxu0 %v369_v4  ;;  %1759 = vmatpush3.msra.mxu1 %v369_v4  ;;  %v712_v29 = vld [vmem:[%s2358_s4 + $0x10] sm:$0xff]  ;;  %v710_v31 = vld [vmem:[%s2358_s4] sm:$0xff] }
  0x16   : > { %1645 = vmatprep.subr.mxu0 %v368_v5  ;;  %1752 = vmatprep.subr.mxu1 %v368_v5  ;;  %v1994_v32 = vld [vmem:[%s2356_s2] ss:$0 sm:$0xff] }
  0x17   : > { %1646 = vmatpush3.msra.mxu0 %v368_v5  ;;  %1760 = vmatpush3.msra.mxu1 %v368_v5  ;;  %v1999_v34 = vld [vmem:[%s2357_s3] ss:$0 sm:$0xff] }
  0x18   : > { %1647 = vmatprep.subr.mxu0 %v367_v6  ;;  %1753 = vmatprep.subr.mxu1 %v367_v6 }
  0x19   : > { %1648 = vmatpush3.msra.mxu0 %v367_v6  ;;  %1761 = vmatpush3.msra.mxu1 %v367_v6 }
  0x1a   : > { %1649 = vmatprep.subr.mxu0 %v366_v7  ;;  %1754 = vmatprep.subr.mxu1 %v366_v7 }
  0x1b   : > { %1650 = vmatpush3.msra.mxu0 %v366_v7  ;;  %1762 = vmatpush3.msra.mxu1 %v366_v7 }
  0x1c   : > { %1651 = vmatprep.mubr.msk.f32.mxu0 %vm374_vm0, %v350_v8  ;;  %1663 = vmatprep.mubr.msk.f32.mxu1 %vm374_vm0, %v358_v9 }
  0x1d   : > { %1652 = vmatmul.mubr.msk.f32.vlgmr.msra.gmra.mxu0 %vm374_vm0, %v351_v10  ;;  %1664 = vmatmul.mubr.msk.f32.vlgmr.msra.gmra.mxu1 %vm374_vm0, %v359_v11 }
  0x1e   : > { %1654 = vmatprep.mubr.msk.f32.mxu0 %vm374_vm0, %v352_v12  ;;  %1666 = vmatprep.mubr.msk.f32.mxu1 %vm374_vm0, %v360_v13 }
  0x1f   : > { %1675 = vmatprep.subr.mxu1 %v717_v24 }
  0x20   : > { %1676 = vmatpush3.msra.mxu1 %v717_v24 }
  0x21   : > { %1655 = vmatmul.mubr.msk.f32.gmra.mxu0 %vm374_vm0, %v353_v14  ;;  %1667 = vmatmul.mubr.msk.f32.gmra.mxu1 %vm374_vm0, %v361_v15 }
  0x22   : > { %1657 = vmatprep.mubr.msk.f32.mxu0 %vm374_vm0, %v354_v16  ;;  %1669 = vmatprep.mubr.msk.f32.mxu1 %vm374_vm0, %v362_v17 }
  0x23   : > { %1677 = vmatprep.subr.mxu1 %v716_v25 }
  0x24   : > { %1678 = vmatpush3.msra.mxu1 %v716_v25 }
  0x25   : > { %1658 = vmatmul.mubr.msk.f32.gmra.mxu0 %vm374_vm0, %v355_v18  ;;  %1670 = vmatmul.mubr.msk.f32.gmra.mxu1 %vm374_vm0, %v363_v19 }
  0x26   : > { %1660 = vmatprep.mubr.msk.f32.mxu0 %vm374_vm0, %v356_v20  ;;  %1672 = vmatprep.mubr.msk.f32.mxu1 %vm374_vm0, %v364_v21 }
  0x27   : > { %1679 = vmatprep.subr.mxu1 %v715_v26 }
  0x28   : > { %1680 = vmatpush3.msra.mxu1 %v715_v26 }
  0x29   : > { %1661 = vmatmul.mubr.msk.f32.gmra.mxu0 %vm374_vm0, %v357_v22  ;;  %1673 = vmatmul.mubr.msk.f32.gmra.mxu1 %vm374_vm0, %v365_v23 }
  0x2a   : > { %1681 = vmatprep.subr.mxu1 %v714_v27 }
  0x2b   : > { %1682 = vmatpush3.msra.mxu1 %v714_v27 }
  0x2c   : > { %1683 = vmatprep.subr.mxu1 %v713_v28 }
  0x2d   : > { %1684 = vmatpush3.msra.mxu1 %v713_v28 }
  0x2e   : > { %1685 = vmatprep.subr.mxu1 %v712_v29 }
  0x2f   : > { %1686 = vmatpush3.msra.mxu1 %v712_v29 }
  0x30   : > { %1687 = vmatprep.subr.mxu1 %v711_v30 }
  0x31   : > { %1688 = vmatpush3.msra.mxu1 %v711_v30 }
  0x32   : > { %1689 = vmatprep.subr.mxu1 %v710_v31 }
  0x33   : > { %1690 = vmatpush3.msra.mxu1 %v710_v31 }
  0xdd   : > { %v1653_v33 = vpop.f32.mrf.mxu0  ;;  %v1665_v35 = vpop.f32.mrf.mxu1 }
  0xde   : > { %v576_v36 = vmul.f32 %v1653_v33, %v1994_v32  ;;  %v584_v52 = vmul.f32 %v1665_v35, %v1994_v32 }
  0xdf   : > { %v489_v37 = vpop.f32.mrf.mxu0  ;;  %v529_v38 = vpop.f32.mrf.mxu1 }
  0xe0   : > { %v2003_v39 = vadd.f32 %v1999_v34, %v576_v36  ;;  %v575_v40 = vmul.f32 %v1994_v32, %v489_v37  ;;  %v583_v45 = vmul.f32 %v1994_v32, %v529_v38  ;;  %v2032_v4 = vadd.f32 %v1999_v34, %v584_v52 }
  0xe1   : > { %v1656_v41 = vpop.f32.mrf.mxu0  ;;  %v1668_v42 = vpop.f32.mrf.mxu1 }
  0xe2   : > { %v631_v43 = vmin.f32 %v2003_v39, 0.0  ;;  %v2008_v44 = vadd.f32 %v1999_v34, %v575_v40  ;;  %v578_v46 = vmul.f32 %v1656_v41, %v1994_v32  ;;  %v2023_v59 = vadd.f32 %v1999_v34, %v583_v45 }
  0xe3   : > { %v499_v47 = vpop.f32.mrf.mxu0  ;;  %v539_v48 = vpop.f32.mrf.mxu1  ;;  %v586_v10 = vmul.f32 %v1668_v42, %v1994_v32  ;;  %v639_v18 = vmin.f32 %v2032_v4, 0.0  ;;  %vm615_vm1 = vcmp.gt.f32.partialorder %v2003_v39, 0.0  ;;  %vm623_vm10 = vcmp.gt.f32.partialorder %v2032_v4, 0.0 }
  0xe4   : > { %v648_v49 = vmul.f32 1.442695, %v631_v43  ;;  %v630_v50 = vmin.f32 %v2008_v44, 0.0  ;;  %v577_v51 = vmul.f32 %v1994_v32, %v499_v47  ;;  %v2016_v53 = vadd.f32 %v1999_v34, %v578_v46 }
  0xe5   : > { %v1659_v54 = vpop.f32.mrf.mxu0  ;;  %v1671_v55 = vpop.f32.mrf.mxu1  ;;  %v585_v2 = vmul.f32 %v1994_v32, %v539_v48  ;;  %v638_v9 = vmin.f32 %v2023_v59, 0.0  ;;  %v2053_v23 = vadd.f32 %v1999_v34, %v586_v10  ;;  %v664_v33 = vmul.f32 1.442695, %v639_v18 }
  0xe6   : > { %1771 = vpow2.f32 %v648_v49  ;;  %v646_v56 = vmul.f32 1.442695, %v630_v50  ;;  %v2019_v57 = vadd.f32 %v1999_v34, %v577_v51  ;;  %v580_v58 = vmul.f32 %v1659_v54, %v1994_v32 }
  0xe7   : > { %v633_v60 = vmin.f32 %v2016_v53, 0.0  ;;  %v509_v61 = vpop.f32.mrf.mxu0  ;;  %v549_v62 = vpop.f32.mrf.mxu1  ;;  %v2043_v15 = vadd.f32 %v1999_v34, %v585_v2  ;;  %v662_v22 = vmul.f32 1.442695, %v638_v9  ;;  %v588_v25 = vmul.f32 %v1671_v55, %v1994_v32 }
  0xe8   : > { %1773 = vpow2.f32 %v646_v56  ;;  %v632_v63 = vmin.f32 %v2019_v57, 0.0  ;;  %v2028_v0 = vadd.f32 %v1999_v34, %v580_v58  ;;  %v579_v7 = vmul.f32 %v1994_v32, %v509_v61 }
  0xe9   : > { %v652_v1 = vmul.f32 1.442695, %v633_v60  ;;  %v1662_v3 = vpop.f32.mrf.mxu0  ;;  %v1674_v8 = vpop.f32.mrf.mxu1  ;;  %v587_v16 = vmul.f32 %v1994_v32, %v549_v62  ;;  %v640_v28 = vmin.f32 %v2043_v15, 0.0  ;;  %v641_v37 = vmin.f32 %v2053_v23, 0.0 }
  0xea   : > { %v650_v5 = vmul.f32 1.442695, %v632_v63  ;;  %v635_v6 = vmin.f32 %v2028_v0, 0.0  ;;  %v582_v11 = vmul.f32 %v1662_v3, %v1994_v32  ;;  %v2040_v14 = vadd.f32 %v1999_v34, %v579_v7 }
  0xeb   : > { %1775 = vpow2.f32 %v652_v1  ;;  %v519_v12 = vpop.f32.mrf.mxu0  ;;  %v559_v21 = vpop.f32.mrf.mxu1  ;;  %v2062_v29 = vadd.f32 %v1999_v34, %v587_v16  ;;  %v2068_v38 = vadd.f32 %v1999_v34, %v588_v25  ;;  %v590_v40 = vmul.f32 %v1674_v8, %v1994_v32 }
  0xec   : > { %v656_v13 = vmul.f32 1.442695, %v635_v6  ;;  %1777 = vpow2.f32 %v650_v5  ;;  %v2047_v17 = vadd.f32 %v1999_v34, %v582_v11  ;;  %v634_v19 = vmin.f32 %v2040_v14, 0.0 }
  0xed   : > { %v581_v20 = vmul.f32 %v1994_v32, %v519_v12  ;;  %v589_v31 = vmul.f32 %v1994_v32, %v559_v21  ;;  %v666_v45 = vmul.f32 1.442695, %v640_v28  ;;  %v642_v46 = vmin.f32 %v2062_v29, 0.0 }
  0xee   : > { %1779 = vpow2.f32 %v656_v13  ;;  %v637_v24 = vmin.f32 %v2047_v17, 0.0  ;;  %v654_v26 = vmul.f32 1.442695, %v634_v19  ;;  %vm614_vm2 = vcmp.gt.f32.partialorder %v2008_v44, 0.0 }
  0xef   : > { %v2058_v27 = vadd.f32 %v1999_v34, %v581_v20  ;;  %v2073_v47 = vadd.f32 %v1999_v34, %v589_v31  ;;  %v668_v50 = vmul.f32 1.442695, %v641_v37  ;;  %v643_v32 = vmin.f32 %v2068_v38, 0.0  ;;  %v1072_v37 = vld [vmem:[%s2361_s7 + $0x10] sm:$0xff] }
  0xf0   : > { %v660_v30 = vmul.f32 1.442695, %v637_v24  ;;  %1781 = vpow2.f32 %v654_v26  ;;  %v2079_v51 = vadd.f32 %v1999_v34, %v590_v40  ;;  %v670_v55 = vmul.f32 1.442695, %v642_v46  ;;  %v1070_v40 = vld [vmem:[%s2361_s7] sm:$0xff] }
  0xf1   : > { %v636_v35 = vmin.f32 %v2058_v27, 0.0  ;;  %1783 = vpow2.f32 %v662_v22  ;;  %v644_v56 = vmin.f32 %v2073_v47, 0.0  ;;  %v672_v63 = vmul.f32 1.442695, %v643_v32 }
  0xf2   : > { %1785 = vpow2.f32 %v660_v30  ;;  %v645_v34 = vmin.f32 %v2079_v51, 0.0  ;;  %vm616_vm3 = vcmp.gt.f32.partialorder %v2019_v57, 0.0  ;;  %vm617_vm4 = vcmp.gt.f32.partialorder %v2016_v53, 0.0 }
  0xf3   : > { %v1772_v36 = vpop.eup %1771  ;;  %v658_v41 = vmul.f32 1.442695, %v636_v35  ;;  %1787 = vpow2.f32 %v664_v33  ;;  %vm618_vm5 = vcmp.gt.f32.partialorder %v2040_v14, 0.0  ;;  %vm619_vm6 = vcmp.gt.f32.partialorder %v2028_v0, 0.0 }
  0xf4   : > { %v1468_v43 = vadd.f32 -1.0, %v1772_v36  ;;  %v676_v6 = vmul.f32 1.442695, %v645_v34  ;;  %vm620_vm7 = vcmp.gt.f32.partialorder %v2058_v27, 0.0  ;;  %vm621_vm8 = vcmp.gt.f32.partialorder %v2047_v17, 0.0  ;;  %v1073_v36 = vld [vmem:[%s2361_s7 + $0x18] sm:$0xff] }
  0xf5   : > { %v1774_v42 = vpop.eup %1773  ;;  %1789 = vpow2.f32 %v658_v41  ;;  %vm622_vm9 = vcmp.gt.f32.partialorder %v2023_v59, 0.0  ;;  %vm624_vm11 = vcmp.gt.f32.partialorder %v2043_v15, 0.0  ;;  %vm625_vm12 = vcmp.gt.f32.partialorder %v2053_v23, 0.0  ;;  %1715 = vmatprep.subr.mxu0 %v1073_v36  ;;  %v2144_v41 = vld [vmem:[%s2359_s5] ss:$0 sm:$0xff] }
  0xf6   : > { %v1467_v48 = vadd.f32 -1.0, %v1774_v42  ;;  %v695_v54 = vsel %vm615_vm1, %v2003_v39, %v1468_v43  ;;  %1791 = vpow2.f32 %v666_v45  ;;  %v674_v39 = vmul.f32 1.442695, %v644_v56  ;;  %1716 = vmatpush3.msra.mxu0 %v1073_v36  ;;  %v2149_v43 = vld [vmem:[%s2360_s6] ss:$0 sm:$0xff] }
  0xf7   : > { %1793 = vpow2.f32 %v668_v50  ;;  %vm626_vm13 = vcmp.gt.f32.partialorder %v2062_v29, 0.0  ;;  %vm627_vm14 = vcmp.gt.f32.partialorder %v2068_v38, 0.0  ;;  %vm628_vm15 = vcmp.gt.f32.partialorder %v2073_v47, 0.0  ;;  %1717 = vmatprep.subr.mxu0 %v1072_v37 }
  0xf8   : > { %v1776_v49 = vpop.eup %1775  ;;  %v694_v52 = vsel %vm614_vm2, %v2008_v44, %v1467_v48  ;;  %1795 = vpow2.f32 %v670_v55  ;;  %vm629_vm1 = vcmp.gt.f32.partialorder %v2079_v51, 0.0  ;;  %1718 = vmatpush3.msra.mxu0 %v1072_v37  ;;  %vm1053_vm2 = vcmask 261120  }
  0xf9   : > { %1691 = vmatprep.mubr.msk.f32.mxu1 %vm374_vm0, %v694_v52  ;;  %v1778_v58 = vpop.eup %1777  ;;  %v1470_v60 = vadd.f32 -1.0, %v1776_v49  ;;  %1797 = vpow2.f32 %v672_v63 }
  0xfa   : > { %1692 = vmatmul.mubr.msk.f32.vlgmr.msra.gmra.mxu1 %vm374_vm0, %v695_v54  ;;  %v1469_v61 = vadd.f32 -1.0, %v1778_v58  ;;  %1799 = vpow2.f32 %v674_v39 }
  0xfb   : > { %v1780_v62 = vpop.eup %1779  ;;  %v697_v1 = vsel %vm617_vm4, %v2016_v53, %v1470_v60  ;;  %1801 = vpow2.f32 %v676_v6 }
  0xfc   : > { %v696_v44 = vsel %vm616_vm3, %v2019_v57, %v1469_v61  ;;  %v1472_v3 = vadd.f32 -1.0, %v1780_v62 }
  0xfd   : > { %1694 = vmatprep.mubr.msk.f32.mxu1 %vm374_vm0, %v696_v44  ;;  %v1782_v2 = vpop.eup %1781 }
  0xfe   : > { %1695 = vmatmul.mubr.msk.f32.gmra.mxu1 %vm374_vm0, %v697_v1  ;;  %v1784_v5 = vpop.eup %1783  ;;  %v1471_v7 = vadd.f32 -1.0, %v1782_v2  ;;  %v699_v53 = vsel %vm619_vm6, %v2028_v0, %v1472_v3 }
  0xff   : > { %v1786_v8 = vpop.eup %1785  ;;  %v1475_v13 = vadd.f32 -1.0, %v1784_v5 }
 0x100   : > { %v698_v57 = vsel %vm618_vm5, %v2040_v14, %v1471_v7  ;;  %v1788_v9 = vpop.eup %1787  ;;  %v1474_v11 = vadd.f32 -1.0, %v1786_v8 }
 0x101   : > { %1697 = vmatprep.mubr.msk.f32.mxu1 %vm374_vm0, %v698_v57  ;;  %v1476_v0 = vadd.f32 -1.0, %v1788_v9  ;;  %v702_v20 = vsel %vm622_vm9, %v2023_v59, %v1475_v13 }
 0x102   : > { %v1790_v10 = vpop.eup %1789  ;;  %1698 = vmatmul.mubr.msk.f32.gmra.mxu1 %vm374_vm0, %v699_v53  ;;  %v701_v14 = vsel %vm621_vm8, %v2047_v17, %v1474_v11 }
 0x103   : > { %v1473_v12 = vadd.f32 -1.0, %v1790_v10  ;;  %v1792_v16 = vpop.eup %1791  ;;  %v703_v24 = vsel %vm623_vm10, %v2032_v4, %v1476_v0 }
 0x104   : > { %v1794_v19 = vpop.eup %1793  ;;  %v1477_v21 = vadd.f32 -1.0, %v1792_v16 }
 0x105   : > { %v700_v18 = vsel %vm620_vm7, %v2058_v27, %v1473_v12  ;;  %v1796_v22 = vpop.eup %1795  ;;  %v1478_v25 = vadd.f32 -1.0, %v1794_v19 }
 0x106   : > { %1700 = vmatprep.mubr.msk.f32.mxu1 %vm374_vm0, %v700_v18  ;;  %v1798_v17 = vpop.eup %1797  ;;  %v704_v26 = vsel %vm624_vm11, %v2043_v15, %v1477_v21  ;;  %v1479_v27 = vadd.f32 -1.0, %v1796_v22 }
 0x107   : > { %1701 = vmatmul.mubr.msk.f32.gmra.mxu1 %vm374_vm0, %v701_v14  ;;  %v1800_v28 = vpop.eup %1799  ;;  %v705_v59 = vsel %vm625_vm12, %v2053_v23, %v1478_v25  ;;  %v1480_v30 = vadd.f32 -1.0, %v1798_v17 }
 0x108   : > { %1703 = vmatprep.mubr.msk.f32.mxu1 %vm374_vm0, %v702_v20  ;;  %v1802_v4 = vpop.eup %1801  ;;  %v706_v31 = vsel %vm626_vm13, %v2062_v29, %v1479_v27  ;;  %v1481_v33 = vadd.f32 -1.0, %v1800_v28 }
 0x109   : > { %v707_v15 = vsel %vm627_vm14, %v2068_v38, %v1480_v30  ;;  %v1482_v35 = vadd.f32 -1.0, %v1802_v4  ;;  %v1071_v38 = vld [vmem:[%s2361_s7 + $0x8] sm:$0xff] }
 0x10a   : > { %v708_v23 = vsel %vm628_vm15, %v2073_v47, %v1481_v33  ;;  %1719 = vmatprep.subr.mxu0 %v1071_v38 }
 0x10b   : > { %1704 = vmatmul.mubr.msk.f32.gmra.mxu1 %vm374_vm0, %v703_v24  ;;  %v709_v29 = vsel %vm629_vm1, %v2079_v51, %v1482_v35  ;;  %1720 = vmatpush3.msra.mxu0 %v1071_v38 }
 0x10c   : > { %1706 = vmatprep.mubr.msk.f32.mxu1 %vm374_vm0, %v704_v26  ;;  %1721 = vmatprep.subr.mxu0 %v1070_v40 }
 0x10d   : > { %1722 = vmatpush3.msra.mxu0 %v1070_v40 }
 0x10f   : > { %1707 = vmatmul.mubr.msk.f32.gmra.mxu1 %vm374_vm0, %v705_v59 }
 0x110   : > { %1709 = vmatprep.mubr.msk.f32.mxu1 %vm374_vm0, %v706_v31 }
 0x113   : > { %1710 = vmatmul.mubr.msk.f32.gmra.mxu1 %vm374_vm0, %v707_v15 }
 0x114   : > { %1712 = vmatprep.mubr.msk.f32.mxu1 %vm374_vm0, %v708_v23 }
 0x117   : > { %1713 = vmatmul.mubr.msk.f32.gmra.mxu1 %vm374_vm0, %v709_v29 }
 0x1ba   : > { %v1693_v42 = vpop.f32.mrf.mxu1 }
 0x1bb   : > { %v919_v45 = vmul.f32 %v1693_v42, %v2144_v41 }
 0x1bc   : > { %v832_v46 = vpop.f32.mrf.mxu1 }
 0x1bd   : > { %v942_v47 = vadd.f32 %v2149_v43, %v919_v45  ;;  %v918_v48 = vmul.f32 %v2144_v41, %v832_v46 }
 0x1be   : > { %v1696_v32 = vpop.f32.mrf.mxu1 }
 0x1bf   : > { %v974_v49 = vmin.f32 %v942_v47, 0.0  ;;  %v2155_v50 = vadd.f32 %v2149_v43, %v918_v48  ;;  %v921_v51 = vmul.f32 %v1696_v32, %v2144_v41  ;;  %vm958_vm0 = vcmp.gt.f32.partialorder %v942_v47, 0.0 }
 0x1c0   : > { %v842_v55 = vpop.f32.mrf.mxu1 }
 0x1c1   : > { %v991_v52 = vmul.f32 1.442695, %v974_v49  ;;  %v973_v54 = vmin.f32 %v2155_v50, 0.0  ;;  %v2160_v56 = vadd.f32 %v2149_v43, %v921_v51  ;;  %v920_v58 = vmul.f32 %v2144_v41, %v842_v55 }
 0x1c2   : > { %v1699_v63 = vpop.f32.mrf.mxu1  ;;  %vm957_vm3 = vcmp.gt.f32.partialorder %v2155_v50, 0.0 }
 0x1c3   : > { %1803 = vpow2.f32 %v991_v52  ;;  %v989_v60 = vmul.f32 1.442695, %v973_v54  ;;  %v976_v61 = vmin.f32 %v2160_v56, 0.0  ;;  %v2165_v62 = vadd.f32 %v2149_v43, %v920_v58 }
 0x1c4   : > { %v923_v34 = vmul.f32 %v1699_v63, %v2144_v41  ;;  %v852_v1 = vpop.f32.mrf.mxu1  ;;  %vm960_vm4 = vcmp.gt.f32.partialorder %v2160_v56, 0.0 }
 0x1c5   : > { %1805 = vpow2.f32 %v989_v60  ;;  %v995_v39 = vmul.f32 1.442695, %v976_v61  ;;  %v975_v44 = vmin.f32 %v2165_v62, 0.0  ;;  %v922_v3 = vmul.f32 %v2144_v41, %v852_v1 }
 0x1c6   : > { %v2170_v2 = vadd.f32 %v2149_v43, %v923_v34  ;;  %vm959_vm5 = vcmp.gt.f32.partialorder %v2165_v62, 0.0 }
 0x1c7   : > { %1807 = vpow2.f32 %v995_v39  ;;  %v993_v5 = vmul.f32 1.442695, %v975_v44  ;;  %v2175_v7 = vadd.f32 %v2149_v43, %v922_v3  ;;  %v1702_v8 = vpop.f32.mrf.mxu1 }
 0x1c8   : > { %v978_v6 = vmin.f32 %v2170_v2, 0.0  ;;  %v925_v57 = vmul.f32 %v1702_v8, %v2144_v41  ;;  %vm962_vm6 = vcmp.gt.f32.partialorder %v2170_v2, 0.0 }
 0x1c9   : > { %1809 = vpow2.f32 %v993_v5  ;;  %v977_v53 = vmin.f32 %v2175_v7, 0.0  ;;  %v862_v10 = vpop.f32.mrf.mxu1  ;;  %vm961_vm7 = vcmp.gt.f32.partialorder %v2175_v7, 0.0 }
 0x1ca   : > { %v999_v9 = vmul.f32 1.442695, %v978_v6  ;;  %v2180_v11 = vadd.f32 %v2149_v43, %v925_v57  ;;  %v924_v12 = vmul.f32 %v2144_v41, %v862_v10 }
 0x1cb   : > { %v997_v13 = vmul.f32 1.442695, %v977_v53  ;;  %v1705_v16 = vpop.f32.mrf.mxu1 }
 0x1cc   : > { %1811 = vpow2.f32 %v999_v9  ;;  %v980_v18 = vmin.f32 %v2180_v11, 0.0  ;;  %v2185_v14 = vadd.f32 %v2149_v43, %v924_v12  ;;  %v927_v0 = vmul.f32 %v1705_v16, %v2144_v41 }
 0x1cd   : > { %1813 = vpow2.f32 %v997_v13  ;;  %v872_v19 = vpop.f32.mrf.mxu1  ;;  %vm964_vm8 = vcmp.gt.f32.partialorder %v2180_v11, 0.0 }
 0x1ce   : > { %v1003_v21 = vmul.f32 1.442695, %v980_v18  ;;  %v979_v22 = vmin.f32 %v2185_v14, 0.0  ;;  %v2190_v24 = vadd.f32 %v2149_v43, %v927_v0  ;;  %v926_v25 = vmul.f32 %v2144_v41, %v872_v19 }
 0x1cf   : > { %v1708_v26 = vpop.f32.mrf.mxu1  ;;  %vm963_vm9 = vcmp.gt.f32.partialorder %v2185_v14, 0.0 }
 0x1d0   : > { %v1804_v20 = vpop.eup %1803  ;;  %1815 = vpow2.f32 %v1003_v21  ;;  %v1001_v28 = vmul.f32 1.442695, %v979_v22  ;;  %v982_v59 = vmin.f32 %v2190_v24, 0.0  ;;  %v2202_v30 = vadd.f32 %v2149_v43, %v926_v25 }
 0x1d1   : > { %v1502_v17 = vadd.f32 -1.0, %v1804_v20  ;;  %v929_v31 = vmul.f32 %v1708_v26, %v2144_v41  ;;  %v882_v33 = vpop.f32.mrf.mxu1  ;;  %vm966_vm10 = vcmp.gt.f32.partialorder %v2190_v24, 0.0 }
 0x1d2   : > { %v1806_v27 = vpop.eup %1805  ;;  %1817 = vpow2.f32 %v1001_v28  ;;  %v1007_v35 = vmul.f32 1.442695, %v982_v59  ;;  %v981_v23 = vmin.f32 %v2202_v30, 0.0  ;;  %v928_v29 = vmul.f32 %v2144_v41, %v882_v33 }
 0x1d3   : > { %v1038_v4 = vsel %vm958_vm0, %v942_v47, %v1502_v17  ;;  %v1501_v15 = vadd.f32 -1.0, %v1806_v27  ;;  %v2211_v37 = vadd.f32 %v2149_v43, %v929_v31  ;;  %v1711_v38 = vpop.f32.mrf.mxu1  ;;  %vm965_vm11 = vcmp.gt.f32.partialorder %v2202_v30, 0.0 }
 0x1d4   : > { %1055 = vst.msk [vmem:[%s2198_s10 + $0x8] sm:$0xff] %vm1053_vm2, %v1038_v4  ;;  %v1808_v36 = vpop.eup %1807  ;;  %1819 = vpow2.f32 %v1007_v35  ;;  %v1005_v42 = vmul.f32 1.442695, %v981_v23  ;;  %v2215_v45 = vadd.f32 %v2149_v43, %v928_v29  ;;  %v931_v46 = vmul.f32 %v1711_v38, %v2144_v41 }
 0x1d5   : > { %v1037_v40 = vsel %vm957_vm3, %v2155_v50, %v1501_v15  ;;  %v984_v48 = vmin.f32 %v2211_v37, 0.0  ;;  %v892_v49 = vpop.f32.mrf.mxu1  ;;  %v1504_v50 = vadd.f32 -1.0, %v1808_v36  ;;  %vm968_vm12 = vcmp.gt.f32.partialorder %v2211_v37, 0.0 }
 0x1d6   : > { %1054 = vst.msk [vmem:[%s2198_s10] sm:$0xff] %vm1053_vm2, %v1037_v40  ;;  %1723 = vmatprep.mubr.msk.f32.mxu0 %vm1053_vm2, %v1037_v40  ;;  %v1810_v47 = vpop.eup %1809  ;;  %1821 = vpow2.f32 %v1005_v42  ;;  %v983_v32 = vmin.f32 %v2215_v45, 0.0  ;;  %v2226_v51 = vadd.f32 %v2149_v43, %v931_v46  ;;  %v930_v52 = vmul.f32 %v2144_v41, %v892_v49 }
 0x1d7   : > { %1724 = vmatmul.mubr.msk.f32.vlgmr.msra.gmra.mxu0 %vm1053_vm2, %v1038_v4  ;;  %v1011_v54 = vmul.f32 1.442695, %v984_v48  ;;  %v1714_v55 = vpop.f32.mrf.mxu1  ;;  %v1503_v58 = vadd.f32 -1.0, %v1810_v47  ;;  %v1040_v60 = vsel %vm960_vm4, %v2160_v56, %v1504_v50  ;;  %vm967_vm13 = vcmp.gt.f32.partialorder %v2215_v45, 0.0 }
 0x1d8   : > { %v1009_v63 = vmul.f32 1.442695, %v983_v32  ;;  %v986_v34 = vmin.f32 %v2226_v51, 0.0  ;;  %v2233_v39 = vadd.f32 %v2149_v43, %v930_v52  ;;  %v933_v44 = vmul.f32 %v1714_v55, %v2144_v41  ;;  %1057 = vst.msk [vmem:[%s2198_s10 + $0x18] sm:$0xff] %vm1053_vm2, %v1040_v60 }
 0x1d9   : > { %v1812_v61 = vpop.eup %1811  ;;  %1823 = vpow2.f32 %v1011_v54  ;;  %v902_v1 = vpop.f32.mrf.mxu1  ;;  %v1039_v3 = vsel %vm959_vm5, %v2165_v62, %v1503_v58  ;;  %vm970_vm14 = vcmp.gt.f32.partialorder %v2226_v51, 0.0  ;;  %vm1331_vm3 = vcmask 519168  }
 0x1da   : > { %v1506_v5 = vadd.f32 -1.0, %v1812_v61  ;;  %v1814_v56 = vpop.eup %1813  ;;  %1825 = vpow2.f32 %v1009_v63  ;;  %v1015_v6 = vmul.f32 1.442695, %v986_v34  ;;  %v985_v8 = vmin.f32 %v2233_v39, 0.0  ;;  %1056 = vst.msk [vmem:[%s2198_s10 + $0x10] sm:$0xff] %vm1053_vm2, %v1039_v3  ;;  %1726 = vmatprep.mubr.msk.f32.mxu0 %vm1053_vm2, %v1039_v3 }
 0x1db   : > { %v2242_v57 = vadd.f32 %v2149_v43, %v933_v44  ;;  %v932_v9 = vmul.f32 %v2144_v41, %v902_v1  ;;  %1727 = vmatmul.mubr.msk.f32.gmra.mxu0 %vm1053_vm2, %v1040_v60  ;;  %v1505_v62 = vadd.f32 -1.0, %v1814_v56  ;;  %vm969_vm15 = vcmp.gt.f32.partialorder %v2233_v39, 0.0 }
 0x1dc   : > { %v1042_v53 = vsel %vm962_vm6, %v2170_v2, %v1506_v5  ;;  %1827 = vpow2.f32 %v1015_v6  ;;  %v1013_v10 = vmul.f32 1.442695, %v985_v8 }
 0x1dd   : > { %v988_v12 = vmin.f32 %v2242_v57, 0.0  ;;  %1059 = vst.msk [vmem:[%s2198_s10 + $0x28] sm:$0xff] %vm1053_vm2, %v1042_v53  ;;  %v1816_v13 = vpop.eup %1815  ;;  %v2255_v16 = vadd.f32 %v2149_v43, %v932_v9  ;;  %v1041_v18 = vsel %vm961_vm7, %v2175_v7, %v1505_v62  ;;  %vm972_vm1 = vcmp.gt.f32.partialorder %v2242_v57, 0.0 }
 0x1de   : > { %1829 = vpow2.f32 %v1013_v10  ;;  %1058 = vst.msk [vmem:[%s2198_s10 + $0x20] sm:$0xff] %vm1053_vm2, %v1041_v18  ;;  %1729 = vmatprep.mubr.msk.f32.mxu0 %vm1053_vm2, %v1041_v18  ;;  %v1508_v2 = vadd.f32 -1.0, %v1816_v13 }
 0x1df   : > { %v1019_v41 = vmul.f32 1.442695, %v988_v12  ;;  %v1818_v0 = vpop.eup %1817  ;;  %v987_v19 = vmin.f32 %v2255_v16, 0.0  ;;  %1730 = vmatmul.mubr.msk.f32.gmra.mxu0 %vm1053_vm2, %v1042_v53  ;;  %vm971_vm0 = vcmp.gt.f32.partialorder %v2255_v16, 0.0 }
 0x1e0   : > { %v1507_v43 = vadd.f32 -1.0, %v1818_v0  ;;  %v1044_v7 = vsel %vm964_vm8, %v2180_v11, %v1508_v2 }
 0x1e1   : > { %1831 = vpow2.f32 %v1019_v41  ;;  %v1820_v20 = vpop.eup %1819  ;;  %v1017_v21 = vmul.f32 1.442695, %v987_v19  ;;  %1061 = vst.msk [vmem:[%s2198_s10 + $0x38] sm:$0xff] %vm1053_vm2, %v1044_v7 }
 0x1e2   : > { %v1043_v22 = vsel %vm963_vm9, %v2185_v14, %v1507_v43  ;;  %v1510_v25 = vadd.f32 -1.0, %v1820_v20 }
 0x1e3   : > { %v1822_v17 = vpop.eup %1821  ;;  %1833 = vpow2.f32 %v1017_v21  ;;  %1060 = vst.msk [vmem:[%s2198_s10 + $0x30] sm:$0xff] %vm1053_vm2, %v1043_v22  ;;  %1732 = vmatprep.mubr.msk.f32.mxu0 %vm1053_vm2, %v1043_v22 }
 0x1e4   : > { %1733 = vmatmul.mubr.msk.f32.gmra.mxu0 %vm1053_vm2, %v1044_v7  ;;  %v1509_v11 = vadd.f32 -1.0, %v1822_v17  ;;  %v1046_v26 = vsel %vm966_vm10, %v2190_v24, %v1510_v25 }
 0x1e5   : > { %1063 = vst.msk [vmem:[%s2198_s10 + $0x48] sm:$0xff] %vm1053_vm2, %v1046_v26 }
 0x1e6   : > { %v1824_v14 = vpop.eup %1823  ;;  %v1045_v27 = vsel %vm965_vm11, %v2202_v30, %v1509_v11 }
 0x1e7   : > { %v1826_v28 = vpop.eup %1825  ;;  %1062 = vst.msk [vmem:[%s2198_s10 + $0x40] sm:$0xff] %vm1053_vm2, %v1045_v27  ;;  %1735 = vmatprep.mubr.msk.f32.mxu0 %vm1053_vm2, %v1045_v27  ;;  %v1512_v59 = vadd.f32 -1.0, %v1824_v14 }
 0x1e8   : > { %1736 = vmatmul.mubr.msk.f32.gmra.mxu0 %vm1053_vm2, %v1046_v26  ;;  %v1511_v4 = vadd.f32 -1.0, %v1826_v28 }
 0x1e9   : > { %v1828_v24 = vpop.eup %1827  ;;  %v1048_v31 = vsel %vm968_vm12, %v2211_v37, %v1512_v59 }
 0x1ea   : > { %v1047_v30 = vsel %vm967_vm13, %v2215_v45, %v1511_v4  ;;  %1065 = vst.msk [vmem:[%s2198_s10 + $0x58] sm:$0xff] %vm1053_vm2, %v1048_v31  ;;  %v1514_v33 = vadd.f32 -1.0, %v1828_v24 }
 0x1eb   : > { %v1830_v15 = vpop.eup %1829  ;;  %1064 = vst.msk [vmem:[%s2198_s10 + $0x50] sm:$0xff] %vm1053_vm2, %v1047_v30  ;;  %1738 = vmatprep.mubr.msk.f32.mxu0 %vm1053_vm2, %v1047_v30 }
 0x1ec   : > { %1739 = vmatmul.mubr.msk.f32.gmra.mxu0 %vm1053_vm2, %v1048_v31  ;;  %v1513_v35 = vadd.f32 -1.0, %v1830_v15  ;;  %v1050_v23 = vsel %vm970_vm14, %v2226_v51, %v1514_v33 }
 0x1ed   : > { %1067 = vst.msk [vmem:[%s2198_s10 + $0x68] sm:$0xff] %vm1053_vm2, %v1050_v23 }
 0x1ee   : > { %v1832_v29 = vpop.eup %1831  ;;  %v1049_v36 = vsel %vm969_vm15, %v2233_v39, %v1513_v35 }
 0x1ef   : > { %v1516_v37 = vadd.f32 -1.0, %v1832_v29  ;;  %1066 = vst.msk [vmem:[%s2198_s10 + $0x60] sm:$0xff] %vm1053_vm2, %v1049_v36  ;;  %1741 = vmatprep.mubr.msk.f32.mxu0 %vm1053_vm2, %v1049_v36 }
 0x1f0   : > { %v1834_v38 = vpop.eup %1833  ;;  %1742 = vmatmul.mubr.msk.f32.gmra.mxu0 %vm1053_vm2, %v1050_v23 }
 0x1f1   : > { %v1052_v40 = vsel %vm972_vm1, %v2242_v57, %v1516_v37  ;;  %v1515_v42 = vadd.f32 -1.0, %v1834_v38 }
 0x1f2   : > { %1069 = vst.msk [vmem:[%s2198_s10 + $0x78] sm:$0xff] %vm1053_vm2, %v1052_v40 }
 0x1f3   : > { %v1051_v45 = vsel %vm971_vm0, %v2255_v16, %v1515_v42 }
 0x1f4   : > { %1068 = vst.msk [vmem:[%s2198_s10 + $0x70] sm:$0xff] %vm1053_vm2, %v1051_v45  ;;  %1744 = vmatprep.mubr.msk.f32.mxu0 %vm1053_vm2, %v1051_v45 }
 0x1f5   : > { %1745 = vmatmul.mubr.msk.f32.gmra.mxu0 %vm1053_vm2, %v1052_v40 }
 0x297   : > { %v1725_v46 = vpop.f32.mrf.mxu0 }
 0x298   : > { %v1552_v47 = vpack.c.bf16 %v1725_v46, %v1725_v46 }
 0x299   : > { %v1188_v48 = vpop.f32.mrf.mxu0 }
 0x29a   : > { %1333 = vst.msk [vmem:[%s2317_s13 + $0x4] sm:$0xf] %vm1331_vm3, %v1552_v47  ;;  %v1551_v49 = vpack.c.bf16 %v1188_v48, %v1188_v48 }
 0x29b   : > { %v1728_v50 = vpop.f32.mrf.mxu0 }
 0x29c   : > { %1332 = vst.msk [vmem:[%s2317_s13] sm:$0xf] %vm1331_vm3, %v1551_v49  ;;  %v1554_v32 = vpack.c.bf16 %v1728_v50, %v1728_v50 }
 0x29d   : > { %v1198_v51 = vpop.f32.mrf.mxu0 }
 0x29e   : > { %1335 = vst.msk [vmem:[%s2317_s13 + $0xc] sm:$0xf] %vm1331_vm3, %v1554_v32  ;;  %v1553_v52 = vpack.c.bf16 %v1198_v51, %v1198_v51 }
 0x29f   : > { %v1731_v54 = vpop.f32.mrf.mxu0 }
 0x2a0   : > { %1334 = vst.msk [vmem:[%s2317_s13 + $0x8] sm:$0xf] %vm1331_vm3, %v1553_v52  ;;  %v1556_v55 = vpack.c.bf16 %v1731_v54, %v1731_v54 }
 0x2a1   : > { %v1208_v58 = vpop.f32.mrf.mxu0 }
 0x2a2   : > { %1337 = vst.msk [vmem:[%s2317_s13 + $0x14] sm:$0xf] %vm1331_vm3, %v1556_v55  ;;  %v1555_v60 = vpack.c.bf16 %v1208_v58, %v1208_v58 }
 0x2a4   : > { %1336 = vst.msk [vmem:[%s2317_s13 + $0x10] sm:$0xf] %vm1331_vm3, %v1555_v60  ;;  %v1734_v61 = vpop.f32.mrf.mxu0 }
 0x2a5   : > { %v1558_v63 = vpack.c.bf16 %v1734_v61, %v1734_v61 }
 0x2a6   : > { %v1218_v34 = vpop.f32.mrf.mxu0 }
 0x2a7   : > { %1339 = vst.msk [vmem:[%s2317_s13 + $0x1c] sm:$0xf] %vm1331_vm3, %v1558_v63  ;;  %v1557_v39 = vpack.c.bf16 %v1218_v34, %v1218_v34 }
 0x2a8   : > { %v1737_v44 = vpop.f32.mrf.mxu0 }
 0x2a9   : > { %1338 = vst.msk [vmem:[%s2317_s13 + $0x18] sm:$0xf] %vm1331_vm3, %v1557_v39  ;;  %v1560_v1 = vpack.c.bf16 %v1737_v44, %v1737_v44 }
 0x2aa   : > { %v1228_v3 = vpop.f32.mrf.mxu0 }
 0x2ab   : > { %1341 = vst.msk [vmem:[%s2317_s13 + $0x24] sm:$0xf] %vm1331_vm3, %v1560_v1  ;;  %v1559_v5 = vpack.c.bf16 %v1228_v3, %v1228_v3 }
 0x2ac   : > { %v1740_v56 = vpop.f32.mrf.mxu0 }
 0x2ad   : > { %1340 = vst.msk [vmem:[%s2317_s13 + $0x20] sm:$0xf] %vm1331_vm3, %v1559_v5  ;;  %v1562_v6 = vpack.c.bf16 %v1740_v56, %v1740_v56 }
 0x2ae   : > { %v1238_v8 = vpop.f32.mrf.mxu0 }
 0x2af   : > { %1343 = vst.msk [vmem:[%s2317_s13 + $0x2c] sm:$0xf] %vm1331_vm3, %v1562_v6  ;;  %v1561_v57 = vpack.c.bf16 %v1238_v8, %v1238_v8 }
 0x2b0   : > { %v1743_v9 = vpop.f32.mrf.mxu0 }
 0x2b1   : > { %1342 = vst.msk [vmem:[%s2317_s13 + $0x28] sm:$0xf] %vm1331_vm3, %v1561_v57  ;;  %v1564_v62 = vpack.c.bf16 %v1743_v9, %v1743_v9 }
 0x2b2   : > { %v1248_v53 = vpop.f32.mrf.mxu0 }
 0x2b3   : > { %1345 = vst.msk [vmem:[%s2317_s13 + $0x34] sm:$0xf] %vm1331_vm3, %v1564_v62  ;;  %v1563_v10 = vpack.c.bf16 %v1248_v53, %v1248_v53 }
 0x2b5   : > { %1344 = vst.msk [vmem:[%s2317_s13 + $0x30] sm:$0xf] %vm1331_vm3, %v1563_v10  ;;  %v1746_v12 = vpop.f32.mrf.mxu0 }
 0x2b6   : > { %v1566_v13 = vpack.c.bf16 %v1746_v12, %v1746_v12 }
 0x2b7   : > { %v1258_v16 = vpop.f32.mrf.mxu0 }
 0x2b8   : > { %1347 = vst.msk [vmem:[%s2317_s13 + $0x3c] sm:$0xf] %vm1331_vm3, %v1566_v13  ;;  %v1565_v18 = vpack.c.bf16 %v1258_v16, %v1258_v16 }
 0x2ba   : > { %1346 = vst.msk [vmem:[%s2317_s13 + $0x38] sm:$0xf] %vm1331_vm3, %v1565_v18 }
 0x2bb PF: > { %s20_s30 = sadd.s32 1, %s1841_s30  }
 0x2bc   : > { %p17_p4 = scmp.ge.s32.totalorder %s20_s30, 4  }
 0x2be   :  { %19 = sbr.rel (!%p17_p4) target bundleno = 1 (0x1), region = 94 }

// kernel: sedr_forward.5
= control target key start
LH: loop header
LB: loop body
LE: loop exit
PB: predicated region body
PF: predicated region fallthrough
CT: control target
= control target key end

     0   :  { %s3275_s0 = inlined_call_operand.vmem [shape: bf16[256,256], index: 0, kind: input, shape index: {}]   ;;  %s3276_s1 = inlined_call_operand.vmem [shape: bf16[256,64], index: 1, kind: input, shape index: {}]   ;;  %s3277_s2 = inlined_call_operand.vmem [shape: f32[256,32], index: 2, kind: input, shape index: {}]   ;;  %s3278_s3 = inlined_call_operand.vmem [shape: f32[64,64], index: 3, kind: input, shape index: {}]   ;;  %s3279_s4 = inlined_call_operand.vmem [shape: f32[1,64], index: 4, kind: input, shape index: {}]   ;;  %s3280_s5 = inlined_call_operand.vmem [shape: f32[1,64], index: 5, kind: input, shape index: {}]   ;;  %s3281_s6 = inlined_call_operand.vmem [shape: f32[8,64], index: 6, kind: input, shape index: {}]   ;;  %s3282_s7 = inlined_call_operand.vmem [shape: f32[1,8], index: 7, kind: input, shape index: {}]   ;;  %s3283_s8 = inlined_call_operand.vmem [shape: f32[256,256], index: 8, kind: output, shape index: {}]  }
   0x1   :  { %3287 = sst [smem:[#allocation7_spill]] %s3275_s0 }
   0x2   :  { %s2492_s27 = smov 0   ;;  %s2494_s28 = smov 0  }
   0x3   :  { %s2496_s29 = smov 0   ;;  %s2498_s30 = smov 0  }
   0x4   :  { %s2500_s9 = smov 0   ;;  %s2502_s10 = smov 0  }
   0x5   :  { %s2504_s11 = smov 0  }
   0x6 LB: > { %s27_s12 = sadd.s32 1, %s2434_s9  ;;  %s30_s13 = sadd.s32 1, %s2438_s10  ;;  %s2442_s11 = sphi %s2504_s11, %s18_s11   ;;  %s2438_s10 = sphi %s2502_s10, %s3300_s10   ;;  %s2434_s9 = sphi %s2500_s9, %s3299_s9   ;;  %s2430_s30 = sphi %s2498_s30, %s3298_s30   ;;  %s2426_s29 = sphi %s2496_s29, %s3297_s29   ;;  %s2422_s28 = sphi %s2494_s28, %s3296_s28   ;;  %s2418_s27 = sphi %s2492_s27, %s3295_s27  }
   0x7   : > { %p28_p0 = scmp.ge.s32.totalorder %s27_s12, 2  ;;  %p46_p1 = scmp.ne.s32.totalorder %s2422_s28, %s2418_s27 }
   0x8   : > { %p47_p2 = scmp.eq.s32.totalorder %s2442_s11, 0  ;;  %s39_s17 = sadd.s32 1, %s2422_s28 }
   0x9   : > { %s3302_s12 = smov (%p28_p0, %s27_s12), 0  ;;  %s3304_s13 = smov (!%p28_p0, %s30_s13), %s2438_s10 }
   0xa   : > { %p48_p3 = por %p47_p2, %p46_p1  ;;  %p32_p4 = scmp.ge.s32.totalorder %s3304_s13, 2 }
   0xb   : > { %s35_s14 = ssub.s32 %s2434_s9, %s3302_s12  ;;  %p1958_p6 = scmp.ge.s32.totalorder %s2442_s11, 4 }
   0xc   : > { %s3306_s13 = smov (%p32_p4, %s3304_s13), 0 }
   0xd   : > { %3288 = sst [smem:[#allocation4_spill]] %s3306_s13  ;;  %s34_s15 = ssub.s32 %s2438_s10, %s3306_s13 }
   0xe   : > { %s36_s16 = sor.u32 %s35_s14, %s34_s15  ;;  %270 = sbr.rel (%p1958_p6) target bundleno = 39 (0x27), region = 36 }
   0xf   : > { %p37_p5 = scmp.eq.s32.totalorder %s36_s16, 0 }
  0x11   : > { %s2543_s18 = scalar_select %p37_p5, %s2422_s28, %s39_s17  }
  0x13   : > { %273 = sbr.rel (!%p48_p3) target bundleno = 39 (0x27), region = 40  ;;  %s275_s19 = sand.u32 (%p48_p3), 1, %s2422_s28  }
  0x14   : > { %s2044_s20 = sshll.u32 (%p48_p3), %s2438_s10, 5  ;;  %s1959_s21 = sshll.u32 (%p48_p3), %s275_s19, 6 }
  0x15   : > { %s280_s22 = sadd.s32 (%p48_p3), %s2434_s9, %s2044_s20  ;;  %s3289_s0 = sld [smem:[#allocation7_spill]] (%p48_p3) }
  0x16   : > { %s1962_s23 = sshll.u32 (%p48_p3), %s280_s22, 2  ;;  %s277_s14 = scalar_lea.vmem (%p48_p3), [#allocation3], %s1959_s21 }
  0x1b   : > { %s2552_s26 = scalar_lea.vmem %s3289_s0, %s1962_s23 }
  0x1c   : > { %v299_v0 = vld [vmem:[%s2552_s26] sm:$0xf]  ;;  %v301_v1 = vld [vmem:[%s2552_s26 + $0x8] sm:$0xf]  ;;  %v303_v2 = vld [vmem:[%s2552_s26 + $0x10] sm:$0xf] }
  0x1d   : > { %300 = vst [vmem:[%s277_s14] sm:$0xf] %v299_v0  ;;  %302 = vst [vmem:[%s277_s14 + $0x4] sm:$0xf] %v301_v1  ;;  %v305_v3 = vld [vmem:[%s2552_s26 + $0x18] sm:$0xf] }
  0x1e   : > { %304 = vst [vmem:[%s277_s14 + $0x8] sm:$0xf] %v303_v2  ;;  %v307_v4 = vld [vmem:[%s2552_s26 + $0x20] sm:$0xf]  ;;  %v309_v5 = vld [vmem:[%s2552_s26 + $0x28] sm:$0xf] }
  0x1f   : > { %306 = vst [vmem:[%s277_s14 + $0xc] sm:$0xf] %v305_v3  ;;  %308 = vst [vmem:[%s277_s14 + $0x10] sm:$0xf] %v307_v4  ;;  %v311_v6 = vld [vmem:[%s2552_s26 + $0x30] sm:$0xf] }
  0x20   : > { %310 = vst [vmem:[%s277_s14 + $0x14] sm:$0xf] %v309_v5  ;;  %v313_v7 = vld [vmem:[%s2552_s26 + $0x38] sm:$0xf]  ;;  %v315_v8 = vld [vmem:[%s2552_s26 + $0x40] sm:$0xf] }
  0x21   : > { %312 = vst [vmem:[%s277_s14 + $0x18] sm:$0xf] %v311_v6  ;;  %314 = vst [vmem:[%s277_s14 + $0x1c] sm:$0xf] %v313_v7  ;;  %v317_v9 = vld [vmem:[%s2552_s26 + $0x48] sm:$0xf] }
  0x22   : > { %316 = vst [vmem:[%s277_s14 + $0x20] sm:$0xf] %v315_v8  ;;  %v319_v10 = vld [vmem:[%s2552_s26 + $0x50] sm:$0xf]  ;;  %v321_v11 = vld [vmem:[%s2552_s26 + $0x58] sm:$0xf] }
  0x23   : > { %318 = vst [vmem:[%s277_s14 + $0x24] sm:$0xf] %v317_v9  ;;  %320 = vst [vmem:[%s277_s14 + $0x28] sm:$0xf] %v319_v10  ;;  %v323_v12 = vld [vmem:[%s2552_s26 + $0x60] sm:$0xf] }
  0x24   : > { %322 = vst [vmem:[%s277_s14 + $0x2c] sm:$0xf] %v321_v11  ;;  %v325_v13 = vld [vmem:[%s2552_s26 + $0x68] sm:$0xf]  ;;  %v327_v14 = vld [vmem:[%s2552_s26 + $0x70] sm:$0xf] }
  0x25   : > { %324 = vst [vmem:[%s277_s14 + $0x30] sm:$0xf] %v323_v12  ;;  %326 = vst [vmem:[%s277_s14 + $0x34] sm:$0xf] %v325_v13  ;;  %v329_v15 = vld [vmem:[%s2552_s26 + $0x78] sm:$0xf] }
  0x26   : > { %328 = vst [vmem:[%s277_s14 + $0x38] sm:$0xf] %v327_v14  ;;  %330 = vst [vmem:[%s277_s14 + $0x3c] sm:$0xf] %v329_v15 }
  0x27 PF: > { %p1963_p7 = scmp.ge.s32.totalorder %s2442_s11, 1  ;;  %p403_p8 = scmp.lt.s32.totalorder %s2442_s11, 5 }
  0x29   : > { %p404_p9 = pnand %p1963_p7, %p403_p8 }
  0x2a   : > { %s410_s15 = sand.u32 (!%p404_p9), 1, %s2418_s27   ;;  %s1965_s16 = sshll.u32 (!%p404_p9), %s2426_s29, 4 }
  0x2b   : > { %407 = sbr.rel (%p404_p9) target bundleno = 1052 (0x41c), region = 89  ;;  %s1964_s17 = sshll.u32 (!%p404_p9), %s410_s15, 6 }
  0x2c   : > { %p456_p10 = scmp.lt.s32.totalorder (!%p404_p9), %s1965_s16, 31  ;;  %s1967_s19 = sshll.u32 (!%p404_p9), %s2430_s30, 4 }
  0x2d   : > { %p462_p11 = scmp.lt.s32.totalorder (!%p404_p9), %s1967_s19, 31  ;;  %s2590_s13 = scalar_lea.vmem (!%p404_p9), [#allocation3], %s1964_s17 }
  0x2e   : > { %p1972_p12 = scmp.ne.s32.totalorder (!%p404_p9), %s2426_s29, 0 }
  0x30   : > { %s3308_s16 = smov (!%p456_p10, %s1965_s16), 31  ;;  %s3310_s19 = smov (!%p462_p11, %s1967_s19), 31 }
  0x31   : > { %s1966_s20 = sshll.u32 %s3308_s16, 2  ;;  %s1968_s24 = sshll.u32 %s3310_s19, 3 }
  0x32   : > { %s2578_s23 = scalar_lea.vmem %s3276_s1, %s1966_s20  ;;  %s2045_s25 = sshll.u32 %s3310_s19, 4 }
  0x33   : > { %s2583_s0 = scalar_lea.vmem %s3277_s2, %s1968_s24  ;;  %s2588_s30 = scalar_lea.vmem %s3283_s8, %s2045_s25 }
  0x34   : > { %478 = sbr.rel (%p1972_p12) target bundleno = 66 (0x42), region = 97 }
  0x39   : > { %vm479_vm0 = vcmask 523264   ;;  %v2444_v16 = vmov 0.0  }
  0x3a   : > { %480 = vst.msk [vmem:[#allocation2] sm:$0xff] %vm479_vm0, %v2444_v16  ;;  %481 = vst.msk [vmem:[#allocation2 + $0x8] sm:$0xff] %vm479_vm0, %v2444_v16 }
  0x3b   : > { %482 = vst.msk [vmem:[#allocation2 + $0x10] sm:$0xff] %vm479_vm0, %v2444_v16  ;;  %483 = vst.msk [vmem:[#allocation2 + $0x18] sm:$0xff] %vm479_vm0, %v2444_v16 }
  0x3c   : > { %484 = vst.msk [vmem:[#allocation2 + $0x20] sm:$0xff] %vm479_vm0, %v2444_v16  ;;  %485 = vst.msk [vmem:[#allocation2 + $0x28] sm:$0xff] %vm479_vm0, %v2444_v16 }
  0x3d   : > { %486 = vst.msk [vmem:[#allocation2 + $0x30] sm:$0xff] %vm479_vm0, %v2444_v16  ;;  %487 = vst.msk [vmem:[#allocation2 + $0x38] sm:$0xff] %vm479_vm0, %v2444_v16 }
  0x3e   : > { %488 = vst.msk [vmem:[#allocation2 + $0x40] sm:$0xff] %vm479_vm0, %v2444_v16  ;;  %489 = vst.msk [vmem:[#allocation2 + $0x48] sm:$0xff] %vm479_vm0, %v2444_v16 }
  0x3f   : > { %490 = vst.msk [vmem:[#allocation2 + $0x50] sm:$0xff] %vm479_vm0, %v2444_v16  ;;  %491 = vst.msk [vmem:[#allocation2 + $0x58] sm:$0xff] %vm479_vm0, %v2444_v16 }
  0x40   : > { %492 = vst.msk [vmem:[#allocation2 + $0x60] sm:$0xff] %vm479_vm0, %v2444_v16  ;;  %493 = vst.msk [vmem:[#allocation2 + $0x68] sm:$0xff] %vm479_vm0, %v2444_v16 }
  0x41   : > { %494 = vst.msk [vmem:[#allocation2 + $0x70] sm:$0xff] %vm479_vm0, %v2444_v16  ;;  %495 = vst.msk [vmem:[#allocation2 + $0x78] sm:$0xff] %vm479_vm0, %v2444_v16 }
  0x42 PF: > { %v2276_v17 = vld [vmem:[%s2578_s23 + $0x38] sm:$0xff]   ;;  %v2277_v18 = vld [vmem:[%s2578_s23 + $0x30] sm:$0xff]   ;;  %v2278_v19 = vld [vmem:[%s2578_s23 + $0x28] sm:$0xff]   ;;  %vm753_vm1 = vcmask 523264   ;;  %p1989_p13 = scmp.ne.s32.totalorder %s2426_s29, 1 }
  0x43   : > { %2103 = vmatprep.subr.bf16.mxu0 %v2276_v17  ;;  %2201 = vmatprep.subr.bf16.mxu1 %v2276_v17  ;;  %v2279_v20 = vld [vmem:[%s2578_s23 + $0x20] sm:$0xff]   ;;  %v2280_v23 = vld [vmem:[%s2578_s23 + $0x18] sm:$0xff]   ;;  %v2281_v24 = vld [vmem:[%s2578_s23 + $0x10] sm:$0xff]  }
  0x44   : > { %2104 = vmatpush3.bf16.msra.mxu0 %v2276_v17  ;;  %2209 = vmatpush3.bf16.msra.mxu1 %v2276_v17  ;;  %v2284_v21 = vld [vmem:[%s2590_s13] sm:$0xff]   ;;  %v2282_v25 = vld [vmem:[%s2578_s23 + $0x8] sm:$0xff]   ;;  %v2288_v29 = vld [vmem:[%s2590_s13 + $0x10] sm:$0xff]  }
  0x45   : > { %2105 = vmatprep.subr.bf16.mxu0 %v2277_v18  ;;  %2202 = vmatprep.subr.bf16.mxu1 %v2277_v18  ;;  %v2285_v22 = vld [vmem:[%s2590_s13 + $0x20] sm:$0xff]   ;;  %v2286_v27 = vld [vmem:[%s2590_s13 + $0x8] sm:$0xff]   ;;  %v2289_v30 = vld [vmem:[%s2590_s13 + $0x30] sm:$0xff]  }
  0x46   : > { %2119 = vmatprep.mubr.bf16.mxu0 %v2284_v21  ;;  %2127 = vmatprep.mubr.bf16.mxu1 %v2285_v22  ;;  %v2283_v26 = vld [vmem:[%s2578_s23] sm:$0xff]   ;;  %v2287_v28 = vld [vmem:[%s2590_s13 + $0x28] sm:$0xff]   ;;  %v2290_v31 = vld [vmem:[%s2590_s13 + $0x18] sm:$0xff]  }
  0x47   : > { %v2291_v32 = vld [vmem:[%s2590_s13 + $0x38] sm:$0xff]   ;;  %v498_v33 = vld [vmem:[#allocation2 + $0x10] sm:$0xff]  ;;  %v496_v37 = vld [vmem:[#allocation2] sm:$0xff] }
  0x48   : > { %2106 = vmatpush3.bf16.msra.mxu0 %v2277_v18  ;;  %2210 = vmatpush3.bf16.msra.mxu1 %v2277_v18  ;;  %v506_v34 = vld [vmem:[#allocation2 + $0x50] sm:$0xff]  ;;  %v504_v38 = vld [vmem:[#allocation2 + $0x40] sm:$0xff]  ;;  %v499_v43 = vld [vmem:[#allocation2 + $0x18] sm:$0xff] }
  0x49   : > { %2107 = vmatprep.subr.bf16.mxu0 %v2278_v19  ;;  %2203 = vmatprep.subr.bf16.mxu1 %v2278_v19  ;;  %v507_v44 = vld [vmem:[#allocation2 + $0x58] sm:$0xff]  ;;  %v497_v49 = vld [vmem:[#allocation2 + $0x8] sm:$0xff]  ;;  %v502_v55 = vld [vmem:[#allocation2 + $0x30] sm:$0xff] }
  0x4a   : > { %v505_v50 = vld [vmem:[#allocation2 + $0x48] sm:$0xff]  ;;  %v510_v56 = vld [vmem:[#allocation2 + $0x70] sm:$0xff]  ;;  %v500_v61 = vld [vmem:[#allocation2 + $0x20] sm:$0xff] }
  0x4b   : > { %v508_v62 = vld [vmem:[#allocation2 + $0x60] sm:$0xff]  ;;  %v503_v3 = vld [vmem:[#allocation2 + $0x38] sm:$0xff]  ;;  %v501_v9 = vld [vmem:[#allocation2 + $0x28] sm:$0xff] }
  0x4c   : > { %2108 = vmatpush3.bf16.msra.mxu0 %v2278_v19  ;;  %2211 = vmatpush3.bf16.msra.mxu1 %v2278_v19  ;;  %v511_v4 = vld [vmem:[#allocation2 + $0x78] sm:$0xff]  ;;  %v509_v10 = vld [vmem:[#allocation2 + $0x68] sm:$0xff] }
  0x4d   : > { %2109 = vmatprep.subr.bf16.mxu0 %v2279_v20  ;;  %2204 = vmatprep.subr.bf16.mxu1 %v2279_v20 }
  0x50   : > { %2110 = vmatpush3.bf16.msra.mxu0 %v2279_v20  ;;  %2212 = vmatpush3.bf16.msra.mxu1 %v2279_v20 }
  0x51   : > { %2111 = vmatprep.subr.bf16.mxu0 %v2280_v23  ;;  %2205 = vmatprep.subr.bf16.mxu1 %v2280_v23 }
  0x54   : > { %2112 = vmatpush3.bf16.msra.mxu0 %v2280_v23  ;;  %2213 = vmatpush3.bf16.msra.mxu1 %v2280_v23 }
  0x55   : > { %2113 = vmatprep.subr.bf16.mxu0 %v2281_v24  ;;  %2206 = vmatprep.subr.bf16.mxu1 %v2281_v24 }
  0x58   : > { %2114 = vmatpush3.bf16.msra.mxu0 %v2281_v24  ;;  %2214 = vmatpush3.bf16.msra.mxu1 %v2281_v24 }
  0x59   : > { %2115 = vmatprep.subr.bf16.mxu0 %v2282_v25  ;;  %2207 = vmatprep.subr.bf16.mxu1 %v2282_v25 }
  0x5c   : > { %2116 = vmatpush3.bf16.msra.mxu0 %v2282_v25  ;;  %2215 = vmatpush3.bf16.msra.mxu1 %v2282_v25 }
  0x5d   : > { %2117 = vmatprep.subr.bf16.mxu0 %v2283_v26  ;;  %2208 = vmatprep.subr.bf16.mxu1 %v2283_v26 }
  0x60   : > { %2118 = vmatpush3.bf16.msra.mxu0 %v2283_v26  ;;  %2216 = vmatpush3.bf16.msra.mxu1 %v2283_v26 }
  0x63   : > { %2120 = vmatmul.mubr.bf16.vlgmr.msra.gmra.mxu0 %v2286_v27  ;;  %2128 = vmatmul.mubr.bf16.vlgmr.msra.gmra.mxu1 %v2287_v28 }
  0x64   : > { %2123 = vmatprep.mubr.bf16.mxu0 %v2288_v29  ;;  %2131 = vmatprep.mubr.bf16.mxu1 %v2289_v30 }
  0x6b   : > { %2124 = vmatmul.mubr.bf16.gmra.mxu0 %v2290_v31  ;;  %2132 = vmatmul.mubr.bf16.gmra.mxu1 %v2291_v32 }
 0x123   : > { %v2121_v35 = vpop.f32.mrf.mxu0  ;;  %v2129_v36 = vpop.f32.mrf.mxu1 }
 0x124   : > { %v739_v39 = vadd.f32 %v2121_v35, %v498_v33  ;;  %v747_v40 = vadd.f32 %v2129_v36, %v506_v34 }
 0x125   : > { %v674_v41 = vpop.f32.mrf.mxu0  ;;  %v706_v42 = vpop.f32.mrf.mxu1 }
 0x126   : > { %756 = vst.msk [vmem:[#allocation2 + $0x10] sm:$0xff] %vm753_vm1, %v739_v39  ;;  %764 = vst.msk [vmem:[#allocation2 + $0x50] sm:$0xff] %vm753_vm1, %v747_v40  ;;  %v737_v45 = vadd.f32 %v674_v41, %v496_v37  ;;  %v745_v46 = vadd.f32 %v706_v42, %v504_v38 }
 0x127   : > { %v2122_v47 = vpop.f32.mrf.mxu0  ;;  %v2130_v48 = vpop.f32.mrf.mxu1 }
 0x128   : > { %754 = vst.msk [vmem:[#allocation2] sm:$0xff] %vm753_vm1, %v737_v45  ;;  %762 = vst.msk [vmem:[#allocation2 + $0x40] sm:$0xff] %vm753_vm1, %v745_v46  ;;  %v740_v51 = vadd.f32 %v2122_v47, %v499_v43  ;;  %v748_v52 = vadd.f32 %v2130_v48, %v507_v44 }
 0x129   : > { %v677_v53 = vpop.f32.mrf.mxu0  ;;  %v709_v54 = vpop.f32.mrf.mxu1 }
 0x12a   : > { %757 = vst.msk [vmem:[#allocation2 + $0x18] sm:$0xff] %vm753_vm1, %v740_v51  ;;  %765 = vst.msk [vmem:[#allocation2 + $0x58] sm:$0xff] %vm753_vm1, %v748_v52  ;;  %v738_v57 = vadd.f32 %v677_v53, %v497_v49  ;;  %v746_v58 = vadd.f32 %v709_v54, %v505_v50 }
 0x12b   : > { %v2125_v59 = vpop.f32.mrf.mxu0  ;;  %v2133_v60 = vpop.f32.mrf.mxu1 }
 0x12c   : > { %755 = vst.msk [vmem:[#allocation2 + $0x8] sm:$0xff] %vm753_vm1, %v738_v57  ;;  %763 = vst.msk [vmem:[#allocation2 + $0x48] sm:$0xff] %vm753_vm1, %v746_v58  ;;  %v743_v63 = vadd.f32 %v2125_v59, %v502_v55  ;;  %v751_v0 = vadd.f32 %v2133_v60, %v510_v56 }
 0x12d   : > { %v690_v1 = vpop.f32.mrf.mxu0  ;;  %v722_v2 = vpop.f32.mrf.mxu1 }
 0x12e   : > { %760 = vst.msk [vmem:[#allocation2 + $0x30] sm:$0xff] %vm753_vm1, %v743_v63  ;;  %768 = vst.msk [vmem:[#allocation2 + $0x70] sm:$0xff] %vm753_vm1, %v751_v0  ;;  %v741_v5 = vadd.f32 %v690_v1, %v500_v61  ;;  %v749_v6 = vadd.f32 %v722_v2, %v508_v62 }
 0x12f   : > { %v2126_v7 = vpop.f32.mrf.mxu0  ;;  %v2134_v8 = vpop.f32.mrf.mxu1 }
 0x130   : > { %758 = vst.msk [vmem:[#allocation2 + $0x20] sm:$0xff] %vm753_vm1, %v741_v5  ;;  %766 = vst.msk [vmem:[#allocation2 + $0x60] sm:$0xff] %vm753_vm1, %v749_v6  ;;  %v744_v11 = vadd.f32 %v2126_v7, %v503_v3  ;;  %v752_v12 = vadd.f32 %v2134_v8, %v511_v4  ;;  %773 = sbr.rel (%p1989_p13) target bundleno = 1052 (0x41c), region = 101 }
 0x131   : > { %v693_v13 = vpop.f32.mrf.mxu0  ;;  %v725_v14 = vpop.f32.mrf.mxu1 }
 0x132   : > { %761 = vst.msk [vmem:[#allocation2 + $0x38] sm:$0xff] %vm753_vm1, %v744_v11  ;;  %769 = vst.msk [vmem:[#allocation2 + $0x78] sm:$0xff] %vm753_vm1, %v752_v12  ;;  %v742_v15 = vadd.f32 %v693_v13, %v501_v9  ;;  %v750_v16 = vadd.f32 %v725_v14, %v509_v10 }
 0x134   : > { %759 = vst.msk [vmem:[#allocation2 + $0x28] sm:$0xff] %vm753_vm1, %v742_v15  ;;  %767 = vst.msk [vmem:[#allocation2 + $0x68] sm:$0xff] %vm753_vm1, %v750_v16 }
 0x135   : > { %v774_v17 = vld [vmem:[#allocation2] sm:$0xff]  ;;  %v776_v18 = vld [vmem:[#allocation2 + $0x10] sm:$0xff]  ;;  %s2445_s13 = smov 32   ;;  %v775_v19 = vld [vmem:[#allocation2 + $0x8] sm:$0xff]  ;;  %vm870_vm2 = vcmask 261120   ;;  %vm1546_vm3 = vcmask 64512  }
 0x136   : > { %822 = vrot.lane.b32.xlu0 %v774_v17, %s2445_s13  ;;  %826 = vrot.lane.b32.xlu1 %v776_v18, %s2445_s13  ;;  %v777_v20 = vld [vmem:[#allocation2 + $0x18] sm:$0xff]  ;;  %v893_v22 = vld [vmem:[%s3278_s3 + $0x30] sm:$0xff]  ;;  %v892_v25 = vld [vmem:[%s3278_s3 + $0x28] sm:$0xff]  ;;  %s2446_s25 = smov 96   ;;  %vm1771_vm14 = vcmask 785408  }
 0x137   : > { %v894_v21 = vld [vmem:[%s3278_s3 + $0x38] sm:$0xff]  ;;  %v778_v23 = vld [vmem:[#allocation2 + $0x20] sm:$0xff]  ;;  %v780_v27 = vld [vmem:[#allocation2 + $0x30] sm:$0xff] }
 0x138   : > { %2135 = vmatprep.subr.mxu0 %v894_v21  ;;  %v1230_v26 = vld [vmem:[%s3281_s6] sm:$0xff]  ;;  %v890_v30 = vld [vmem:[%s3278_s3 + $0x18] sm:$0xff]  ;;  %v783_v32 = vld [vmem:[#allocation2 + $0x48] sm:$0xff] }
 0x139   : > { %2136 = vmatpush3.msra.mxu0 %v894_v21  ;;  %v781_v28 = vld [vmem:[#allocation2 + $0x38] sm:$0xff]  ;;  %2175 = vmatprep.subr.msk.mxu1 %vm753_vm1, %v1230_v26  ;;  %v891_v29 = vld [vmem:[%s3278_s3 + $0x20] sm:$0xff]  ;;  %v889_v33 = vld [vmem:[%s3278_s3 + $0x10] sm:$0xff] }
 0x13a   : > { %824 = vrot.lane.b32.xlu0 %v775_v19, %s2445_s13  ;;  %828 = vrot.lane.b32.xlu1 %v777_v20, %s2445_s13  ;;  %v782_v31 = vld [vmem:[#allocation2 + $0x40] sm:$0xff]  ;;  %v784_v34 = vld [vmem:[#allocation2 + $0x50] sm:$0xff]  ;;  %v785_v35 = vld [vmem:[#allocation2 + $0x58] sm:$0xff] }
 0x13b   : > { %v779_v24 = vld [vmem:[#allocation2 + $0x28] sm:$0xff]  ;;  %2137 = vmatprep.subr.mxu0 %v893_v22  ;;  %2176 = vmatpush3.xpose.msk.msra.mxu1 %vm753_vm1, %v1230_v26  ;;  %v887_v37 = vld [vmem:[%s3278_s3] sm:$0xff]  ;;  %v788_v40 = vld [vmem:[#allocation2 + $0x70] sm:$0xff] }
 0x13c   : > { %2138 = vmatpush3.msra.mxu0 %v893_v22  ;;  %v888_v36 = vld [vmem:[%s3278_s3 + $0x8] sm:$0xff]  ;;  %v786_v38 = vld [vmem:[#allocation2 + $0x60] sm:$0xff]  ;;  %v789_v41 = vld [vmem:[#allocation2 + $0x78] sm:$0xff] }
 0x13d   : > { %2139 = vmatprep.subr.mxu0 %v892_v25  ;;  %v787_v39 = vld [vmem:[#allocation2 + $0x68] sm:$0xff]  ;;  %v790_v42 = vld [vmem:[%s2583_s0] sm:$0xff]  ;;  %v792_v43 = vld [vmem:[%s2583_s0 + $0x10] sm:$0xff] }
 0x13e   : > { %830 = vrot.lane.b32.xlu0 %v778_v23, %s2445_s13  ;;  %832 = vrot.lane.b32.xlu1 %v779_v24, %s2445_s13  ;;  %v791_v50 = vld [vmem:[%s2583_s0 + $0x8] sm:$0xff]  ;;  %v793_v52 = vld [vmem:[%s2583_s0 + $0x18] sm:$0xff] }
 0x13f   : > { %2140 = vmatpush3.msra.mxu0 %v892_v25  ;;  %v794_v62 = vld [vmem:[%s2583_s0 + $0x20] sm:$0xff]  ;;  %v795_v63 = vld [vmem:[%s2583_s0 + $0x28] sm:$0xff]  ;;  %v796_v9 = vld [vmem:[%s2583_s0 + $0x30] sm:$0xff] }
 0x140   : > { %2141 = vmatprep.subr.mxu0 %v891_v29  ;;  %v797_v10 = vld [vmem:[%s2583_s0 + $0x38] sm:$0xff]  ;;  %v798_v21 = vld [vmem:[%s2583_s0 + $0x40] sm:$0xff]  ;;  %v799_v22 = vld [vmem:[%s2583_s0 + $0x48] sm:$0xff] }
 0x141   : > { %2142 = vmatpush3.msra.mxu0 %v891_v29 }
 0x142   : > { %834 = vrot.lane.b32.xlu0 %v780_v27, %s2445_s13  ;;  %836 = vrot.lane.b32.xlu1 %v781_v28, %s2445_s13 }
 0x143   : > { %2143 = vmatprep.subr.mxu0 %v890_v30 }
 0x144   : > { %2144 = vmatpush3.msra.mxu0 %v890_v30 }
 0x145   : > { %2145 = vmatprep.subr.mxu0 %v889_v33 }
 0x146   : > { %838 = vrot.lane.b32.xlu0 %v782_v31, %s2445_s13  ;;  %840 = vrot.lane.b32.xlu1 %v783_v32, %s2445_s13 }
 0x147   : > { %2146 = vmatpush3.msra.mxu0 %v889_v33  ;;  %v800_v33 = vld [vmem:[%s2583_s0 + $0x50] sm:$0xff] }
 0x148   : > { %2147 = vmatprep.subr.mxu0 %v888_v36 }
 0x149   : > { %2148 = vmatpush3.msra.mxu0 %v888_v36 }
 0x14a   : > { %842 = vrot.lane.b32.xlu0 %v784_v34, %s2445_s13  ;;  %844 = vrot.lane.b32.xlu1 %v785_v35, %s2445_s13  ;;  %v801_v34 = vld [vmem:[%s2583_s0 + $0x58] sm:$0xff] }
 0x14b   : > { %2149 = vmatprep.subr.mxu0 %v887_v37 }
 0x14c   : > { %2150 = vmatpush3.msra.mxu0 %v887_v37 }
 0x14e   : > { %846 = vrot.lane.b32.xlu0 %v786_v38, %s2445_s13  ;;  %848 = vrot.lane.b32.xlu1 %v787_v39, %s2445_s13 }
 0x152   : > { %850 = vrot.lane.b32.xlu0 %v788_v40, %s2445_s13  ;;  %852 = vrot.lane.b32.xlu1 %v789_v41, %s2445_s13 }
 0x1a8   : > { %v823_v44 = vpop.permute.xlu0 %822  ;;  %v827_v45 = vpop.permute.xlu1 %826 }
 0x1a9   : > { %v871_v46 = vsel %vm870_vm2, %v790_v42, %v823_v44  ;;  %v873_v47 = vsel %vm870_vm2, %v792_v43, %v827_v45 }
 0x1aa   : > { %v2692_v48 = vsel %vm753_vm1, %v871_v46, %v823_v44  ;;  %2151 = vmatprep.mubr.msk.f32.mxu0 %vm753_vm1, %v871_v46  ;;  %2177 = vmatprep.mubr.msk.f32.mxu1 %vm753_vm1, %v871_v46  ;;  %v2697_v49 = vsel %vm753_vm1, %v873_v47, %v827_v45  ;;  %v1379_v51 = vmul.f32 %v871_v46, %v871_v46  ;;  %v802_v45 = vld [vmem:[%s2583_s0 + $0x60] sm:$0xff]  ;;  %v803_v46 = vld [vmem:[%s2583_s0 + $0x68] sm:$0xff] }
 0x1ab   : > { %v1381_v53 = vmul.f32 %v873_v47, %v873_v47 }
 0x1ac   : > { %v825_v54 = vpop.permute.xlu0 %824  ;;  %v1395_v55 = vsel %vm753_vm1, %v1379_v51, 0.0  ;;  %v829_v56 = vpop.permute.xlu1 %828 }
 0x1ad   : > { %v872_v57 = vsel %vm870_vm2, %v791_v50, %v825_v54  ;;  %1396 = vadd.xlane.f32.xlu0 %v1395_v55  ;;  %v874_v58 = vsel %vm870_vm2, %v793_v52, %v829_v56  ;;  %v1401_v0 = vsel %vm753_vm1, %v1381_v53, 0.0 }
 0x1ae   : > { %v2705_v59 = vsel %vm753_vm1, %v872_v57, %v825_v54  ;;  %2152 = vmatmul.mubr.msk.f32.vlgmr.msra.gmra.mxu0 %vm753_vm1, %v872_v57  ;;  %2178 = vmatmul.mubr.msk.f32.vlgmr.msra.gmra.mxu1 %vm753_vm1, %v872_v57  ;;  %v2710_v60 = vsel %vm753_vm1, %v874_v58, %v829_v56  ;;  %v1380_v61 = vmul.f32 %v872_v57, %v872_v57 }
 0x1af   : > { %2180 = vmatprep.mubr.msk.f32.mxu1 %vm753_vm1, %v873_v47  ;;  %2154 = vmatprep.mubr.msk.f32.mxu0 %vm753_vm1, %v873_v47  ;;  %v1382_v1 = vmul.f32 %v874_v58, %v874_v58 }
 0x1b0   : > { %v1398_v2 = vsel %vm753_vm1, %v1380_v61, 0.0  ;;  %v831_v3 = vpop.permute.xlu0 %830  ;;  %v833_v4 = vpop.permute.xlu1 %832  ;;  %v804_v61 = vld [vmem:[%s2583_s0 + $0x70] sm:$0xff] }
 0x1b1   : > { %1399 = vadd.xlane.f32.xlu1 %v1398_v2  ;;  %v875_v5 = vsel %vm870_vm2, %v794_v62, %v831_v3  ;;  %v876_v6 = vsel %vm870_vm2, %v795_v63, %v833_v4  ;;  %1402 = vadd.xlane.f32.xlu0 %v1401_v0  ;;  %v1404_v11 = vsel %vm753_vm1, %v1382_v1, 0.0  ;;  %v805_v62 = vld [vmem:[%s2583_s0 + $0x78] sm:$0xff] }
 0x1b2   : > { %2181 = vmatmul.mubr.msk.f32.gmra.mxu1 %vm753_vm1, %v874_v58  ;;  %v2722_v7 = vsel %vm753_vm1, %v875_v5, %v831_v3  ;;  %v2725_v8 = vsel %vm753_vm1, %v876_v6, %v833_v4  ;;  %2155 = vmatmul.mubr.msk.f32.gmra.mxu0 %vm753_vm1, %v874_v58  ;;  %v1383_v12 = vmul.f32 %v875_v5, %v875_v5 }
 0x1b3   : > { %2183 = vmatprep.mubr.msk.f32.mxu1 %vm753_vm1, %v875_v5  ;;  %2157 = vmatprep.mubr.msk.f32.mxu0 %vm753_vm1, %v875_v5  ;;  %v1384_v13 = vmul.f32 %v876_v6, %v876_v6 }
 0x1b4   : > { %v835_v14 = vpop.permute.xlu0 %834  ;;  %v837_v15 = vpop.permute.xlu1 %836  ;;  %v1407_v16 = vsel %vm753_vm1, %v1383_v12, 0.0 }
 0x1b5   : > { %v877_v17 = vsel %vm870_vm2, %v796_v9, %v835_v14  ;;  %v878_v18 = vsel %vm870_vm2, %v797_v10, %v837_v15  ;;  %1405 = vadd.xlane.f32.xlu0 %v1404_v11  ;;  %1408 = vadd.xlane.f32.xlu1 %v1407_v16  ;;  %v1410_v23 = vsel %vm753_vm1, %v1384_v13, 0.0 }
 0x1b6   : > { %2184 = vmatmul.mubr.msk.f32.gmra.mxu1 %vm753_vm1, %v876_v6  ;;  %v2738_v19 = vsel %vm753_vm1, %v877_v17, %v835_v14  ;;  %v2741_v20 = vsel %vm753_vm1, %v878_v18, %v837_v15  ;;  %2158 = vmatmul.mubr.msk.f32.gmra.mxu0 %vm753_vm1, %v876_v6  ;;  %v1385_v24 = vmul.f32 %v877_v17, %v877_v17 }
 0x1b7   : > { %2186 = vmatprep.mubr.msk.f32.mxu1 %vm753_vm1, %v877_v17  ;;  %2160 = vmatprep.mubr.msk.f32.mxu0 %vm753_vm1, %v877_v17  ;;  %v1386_v25 = vmul.f32 %v878_v18, %v878_v18 }
 0x1b8   : > { %v839_v26 = vpop.permute.xlu0 %838  ;;  %v841_v27 = vpop.permute.xlu1 %840  ;;  %v1413_v28 = vsel %vm753_vm1, %v1385_v24, 0.0  ;;  %v2834_v24 = vld [vmem:[%s3282_s7] ss:$0 sm:$0xff] }
 0x1b9   : > { %v879_v29 = vsel %vm870_vm2, %v798_v21, %v839_v26  ;;  %v880_v30 = vsel %vm870_vm2, %v799_v22, %v841_v27  ;;  %1411 = vadd.xlane.f32.xlu0 %v1410_v23  ;;  %1414 = vadd.xlane.f32.xlu1 %v1413_v28  ;;  %v1416_v35 = vsel %vm753_vm1, %v1386_v25, 0.0 }
 0x1ba   : > { %2187 = vmatmul.mubr.msk.f32.gmra.mxu1 %vm753_vm1, %v878_v18  ;;  %v2754_v31 = vsel %vm753_vm1, %v879_v29, %v839_v26  ;;  %v2757_v32 = vsel %vm753_vm1, %v880_v30, %v841_v27  ;;  %2161 = vmatmul.mubr.msk.f32.gmra.mxu0 %vm753_vm1, %v878_v18  ;;  %v1387_v36 = vmul.f32 %v879_v29, %v879_v29 }
 0x1bb   : > { %2189 = vmatprep.mubr.msk.f32.mxu1 %vm753_vm1, %v879_v29  ;;  %2163 = vmatprep.mubr.msk.f32.mxu0 %vm753_vm1, %v879_v29  ;;  %v1388_v37 = vmul.f32 %v880_v30, %v880_v30 }
 0x1bc   : > { %v843_v38 = vpop.permute.xlu0 %842  ;;  %v845_v39 = vpop.permute.xlu1 %844  ;;  %v1419_v40 = vsel %vm753_vm1, %v1387_v36, 0.0 }
 0x1bd   : > { %v881_v41 = vsel %vm870_vm2, %v800_v33, %v843_v38  ;;  %v882_v42 = vsel %vm870_vm2, %v801_v34, %v845_v39  ;;  %1417 = vadd.xlane.f32.xlu0 %v1416_v35  ;;  %1420 = vadd.xlane.f32.xlu1 %v1419_v40  ;;  %v1422_v47 = vsel %vm753_vm1, %v1388_v37, 0.0  ;;  %v2839_v33 = vld [vmem:[%s3279_s4] ss:$0 sm:$0xff] }
 0x1be   : > { %2190 = vmatmul.mubr.msk.f32.gmra.mxu1 %vm753_vm1, %v880_v30  ;;  %v2770_v43 = vsel %vm753_vm1, %v881_v41, %v843_v38  ;;  %v2773_v44 = vsel %vm753_vm1, %v882_v42, %v845_v39  ;;  %2164 = vmatmul.mubr.msk.f32.gmra.mxu0 %vm753_vm1, %v880_v30  ;;  %v1389_v50 = vmul.f32 %v881_v41, %v881_v41 }
 0x1bf   : > { %2192 = vmatprep.mubr.msk.f32.mxu1 %vm753_vm1, %v881_v41  ;;  %2166 = vmatprep.mubr.msk.f32.mxu0 %vm753_vm1, %v881_v41  ;;  %v1390_v51 = vmul.f32 %v882_v42, %v882_v42  ;;  %v2848_v41 = vld [vmem:[%s3280_s5] ss:$0 sm:$0xff] }
 0x1c0   : > { %v847_v52 = vpop.permute.xlu0 %846  ;;  %v849_v53 = vpop.permute.xlu1 %848  ;;  %v1425_v54 = vsel %vm753_vm1, %v1389_v50, 0.0 }
 0x1c1   : > { %v883_v55 = vsel %vm870_vm2, %v802_v45, %v847_v52  ;;  %v884_v56 = vsel %vm870_vm2, %v803_v46, %v849_v53  ;;  %1423 = vadd.xlane.f32.xlu0 %v1422_v47  ;;  %1426 = vadd.xlane.f32.xlu1 %v1425_v54  ;;  %v1428_v63 = vsel %vm753_vm1, %v1390_v51, 0.0 }
 0x1c2   : > { %2193 = vmatmul.mubr.msk.f32.gmra.mxu1 %vm753_vm1, %v882_v42  ;;  %v2786_v57 = vsel %vm753_vm1, %v883_v55, %v847_v52  ;;  %v2789_v58 = vsel %vm753_vm1, %v884_v56, %v849_v53  ;;  %2167 = vmatmul.mubr.msk.f32.gmra.mxu0 %vm753_vm1, %v882_v42  ;;  %v1391_v0 = vmul.f32 %v883_v55, %v883_v55 }
 0x1c3   : > { %2195 = vmatprep.mubr.msk.f32.mxu1 %vm753_vm1, %v883_v55  ;;  %2169 = vmatprep.mubr.msk.f32.mxu0 %vm753_vm1, %v883_v55  ;;  %v1392_v1 = vmul.f32 %v884_v56, %v884_v56 }
 0x1c4   : > { %v2797_v2 = vpop.permute.xlu0 %850  ;;  %v2799_v3 = vpop.permute.xlu1 %852  ;;  %v1431_v4 = vsel %vm753_vm1, %v1391_v0, 0.0 }
 0x1c5   : > { %3290 = vst [vmem:[#allocation5_spill] sm:$0xff] %v2799_v3  ;;  %v2804_v5 = vsel %vm870_vm2, %v804_v61, %v2797_v2  ;;  %v2808_v6 = vsel %vm870_vm2, %v805_v62, %v2799_v3  ;;  %1429 = vadd.xlane.f32.xlu0 %v1428_v63  ;;  %1432 = vadd.xlane.f32.xlu1 %v1431_v4  ;;  %v1434_v9 = vsel %vm753_vm1, %v1392_v1, 0.0 }
 0x1c6   : > { %3291 = vst [vmem:[#allocation6_spill] sm:$0xff] %v2808_v6  ;;  %2196 = vmatmul.mubr.msk.f32.gmra.mxu1 %vm753_vm1, %v884_v56  ;;  %2170 = vmatmul.mubr.msk.f32.gmra.mxu0 %vm753_vm1, %v884_v56  ;;  %v1394_v10 = vmul.f32 %v2808_v6, %v2808_v6  ;;  %v1393_v11 = vmul.f32 %v2804_v5, %v2804_v5 }
 0x1c7   : > { %2198 = vmatprep.mubr.msk.f32.mxu1 %vm753_vm1, %v2804_v5  ;;  %2172 = vmatprep.mubr.msk.f32.mxu0 %vm753_vm1, %v2804_v5 }
 0x1c8   : > { %v1437_v12 = vsel %vm753_vm1, %v1393_v11, 0.0  ;;  %v1440_v13 = vsel %vm753_vm1, %v1394_v10, 0.0 }
 0x1c9   : > { %1435 = vadd.xlane.f32.xlu0 %v1434_v9  ;;  %1438 = vadd.xlane.f32.xlu1 %v1437_v12 }
 0x1ca   : > { %2199 = vmatmul.mubr.msk.f32.gmra.mxu1 %vm753_vm1, %v2808_v6  ;;  %2173 = vmatmul.mubr.msk.f32.gmra.mxu0 %vm753_vm1, %v2808_v6 }
 0x1cd   : > { %1441 = vadd.xlane.f32.xlu0 %v1440_v13 }
 0x236   : > { %v1397_v14 = vpop.xlane.xlu0 %1396 }
 0x23a   : > { %v2827_v15 = vpop.xlane.xlu0 %1402  ;;  %v1400_v22 = vpop.xlane.xlu1 %1399 }
 0x23e   : > { %v1406_v16 = vpop.xlane.xlu0 %1405 }
 0x242   : > { %v1412_v17 = vpop.xlane.xlu0 %1411 }
 0x246   : > { %v1418_v36 = vpop.xlane.xlu0 %1417 }
 0x24a   : > { %v1424_v1 = vpop.xlane.xlu0 %1423 }
 0x26e   : > { %v2829_v18 = vpop.f32.mrf.mxu0  ;;  %v2179_v21 = vpop.f32.mrf.mxu1 }
 0x26f   : > { %v1444_v23 = vmul.f32 2.0, %v2179_v21 }
 0x270   : > { %v1009_v25 = vpop.f32.mrf.mxu0  ;;  %v1300_v26 = vpop.f32.mrf.mxu1 }
 0x271   : > { %v1460_v27 = vsub.f32 %v1400_v22, %v1444_v23  ;;  %v1443_v28 = vmul.f32 2.0, %v1300_v26  ;;  %v1095_v54 = vmul.f32 %v2839_v33, %v1009_v25 }
 0x272   : > { %v2182_v29 = vpop.f32.mrf.mxu1  ;;  %v2156_v30 = vpop.f32.mrf.mxu0 }
 0x273   : > { %v1483_v34 = vadd.f32 %v2834_v24, %v1460_v27  ;;  %v1459_v35 = vsub.f32 %v1397_v14, %v1443_v28  ;;  %v1446_v37 = vmul.f32 2.0, %v2182_v29  ;;  %v1098_v39 = vmul.f32 %v2156_v30, %v2839_v33  ;;  %v1430_v30 = vpop.xlane.xlu0 %1429 }
 0x274   : > { %v2842_v38 = vpop.f32.mrf.mxu1  ;;  %v1019_v40 = vpop.f32.mrf.mxu0  ;;  %v2865_v13 = vadd.f32 %v2848_v41, %v1095_v54 }
 0x275   : > { %v1499_v42 = vmax.f32 %v1483_v34, 0.0  ;;  %v1482_v45 = vadd.f32 %v2834_v24, %v1459_v35  ;;  %v1462_v46 = vsub.f32 %v1406_v16, %v1446_v37  ;;  %v2852_v50 = vadd.f32 %v2848_v41, %v1098_v39 }
 0x276   : > { %v2185_v47 = vpop.f32.mrf.mxu1  ;;  %v1097_v51 = vmul.f32 %v2839_v33, %v1019_v40  ;;  %v2159_v52 = vpop.f32.mrf.mxu0  ;;  %vm1134_vm4 = vcmp.gt.f32.partialorder %v2865_v13, 0.0 }
 0x277   : > { %v1515_v53 = vadd.f32 1.0, %v1499_v42  ;;  %v1498_v55 = vmax.f32 %v1482_v45, 0.0  ;;  %v1485_v56 = vadd.f32 %v2834_v24, %v1462_v46  ;;  %v1448_v61 = vmul.f32 2.0, %v2185_v47 }
 0x278   : > { %v2857_v62 = vpop.f32.mrf.mxu1  ;;  %v2859_v63 = vpop.f32.mrf.mxu0  ;;  %v2862_v4 = vadd.f32 %v2848_v41, %v1097_v51  ;;  %v1100_v37 = vmul.f32 %v2159_v52, %v2839_v33  ;;  %vm1137_vm13 = vcmp.gt.f32.partialorder %v2852_v50, 0.0 }
 0x279   : > { %2292 = vrcp.f32 %v1515_v53  ;;  %v1514_v0 = vadd.f32 1.0, %v1498_v55  ;;  %v1501_v9 = vmax.f32 %v1485_v56, 0.0  ;;  %v1464_v10 = vsub.f32 %v1412_v17, %v1448_v61  ;;  %v1436_v56 = vpop.xlane.xlu0 %1435 }
 0x27a   : > { %v2188_v11 = vpop.f32.mrf.mxu1  ;;  %v2162_v12 = vpop.f32.mrf.mxu0  ;;  %v1150_v17 = vmin.f32 %v2865_v13, 0.0  ;;  %v2878_v42 = vadd.f32 %v2848_v41, %v1100_v37  ;;  %vm1136_vm12 = vcmp.gt.f32.partialorder %v2862_v4, 0.0 }
 0x27b   : > { %2294 = vrcp.f32 %v1514_v0  ;;  %v1450_v14 = vmul.f32 2.0, %v2188_v11  ;;  %v1517_v16 = vadd.f32 1.0, %v1501_v9  ;;  %v1487_v21 = vadd.f32 %v2834_v24, %v1464_v10 }
 0x27c   : > { %v2868_v22 = vpop.f32.mrf.mxu1  ;;  %v2870_v27 = vpop.f32.mrf.mxu0  ;;  %v1166_v46 = vmul.f32 1.442695, %v1150_v17  ;;  %vm1139_vm15 = vcmp.gt.f32.partialorder %v2878_v42, 0.0 }
 0x27d   : > { %v1466_v23 = vsub.f32 %v1418_v36, %v1450_v14  ;;  %2296 = vrcp.f32 %v1517_v16  ;;  %v1503_v25 = vmax.f32 %v1487_v21, 0.0 }
 0x27e   : > { %v2191_v26 = vpop.f32.mrf.mxu1  ;;  %v2165_v45 = vpop.f32.mrf.mxu0 }
 0x27f   : > { %v1489_v28 = vadd.f32 %v2834_v24, %v1466_v23  ;;  %v1452_v29 = vmul.f32 2.0, %v2191_v26  ;;  %v1519_v34 = vadd.f32 1.0, %v1503_v25  ;;  %v1442_v25 = vpop.xlane.xlu0 %1441 }
 0x280   : > { %v2874_v35 = vpop.f32.mrf.mxu1 }
 0x281   : > { %v1505_v39 = vmax.f32 %v1489_v28, 0.0  ;;  %v1468_v40 = vsub.f32 %v1424_v1, %v1452_v29  ;;  %2298 = vrcp.f32 %v1519_v34  ;;  %v2885_v1 = vpop.f32.mrf.mxu0 }
 0x282   : > { %v2194_v36 = vpop.f32.mrf.mxu1 }
 0x283   : > { %v1521_v47 = vadd.f32 1.0, %v1505_v39  ;;  %v1491_v51 = vadd.f32 %v2834_v24, %v1468_v40  ;;  %v1454_v53 = vmul.f32 2.0, %v2194_v36  ;;  %v2168_v29 = vpop.f32.mrf.mxu0  ;;  %v1102_v36 = vmul.f32 %v2162_v12, %v2839_v33 }
 0x284   : > { %v2881_v54 = vpop.f32.mrf.mxu1 }
 0x285   : > { %2300 = vrcp.f32 %v1521_v47  ;;  %v1507_v55 = vmax.f32 %v1491_v51, 0.0  ;;  %v1470_v61 = vsub.f32 %v1430_v30, %v1454_v53  ;;  %v2903_v51 = vadd.f32 %v2848_v41, %v1102_v36 }
 0x286   : > { %v2883_v52 = vpop.eup %2292  ;;  %v2197_v0 = vpop.f32.mrf.mxu1  ;;  %2302 = vpow2.f32 %v1166_v46  ;;  %v1104_v53 = vmul.f32 %v2165_v45, %v2839_v33 }
 0x287   : > { %v1523_v9 = vadd.f32 1.0, %v1507_v55  ;;  %v1456_v10 = vmul.f32 2.0, %v2197_v0  ;;  %v1493_v14 = vadd.f32 %v2834_v24, %v1470_v61  ;;  %v1550_v16 = vsel %vm1546_vm3, %v2883_v52, 0.0  ;;  %v2906_v55 = vpop.f32.mrf.mxu0 }
 0x288   : > { %v2887_v11 = vpop.eup %2294  ;;  %v2892_v21 = vpop.f32.mrf.mxu1  ;;  %1551 = vadd.xlane.f32.xlu0 %v1550_v16  ;;  %vm1141_vm0 = vcmp.gt.f32.partialorder %v2903_v51, 0.0 }
 0x289   : > { %2304 = vrcp.f32 %v1523_v9  ;;  %v1472_v23 = vsub.f32 %v1436_v56, %v1456_v10  ;;  %v1509_v26 = vmax.f32 %v1493_v14, 0.0  ;;  %v1547_v28 = vsel %vm1546_vm3, %v2887_v11, 0.0  ;;  %v2171_v16 = vpop.f32.mrf.mxu0 }
 0x28a   : > { %v2200_v17 = vpop.f32.mrf.mxu1  ;;  %v2896_v30 = vpop.eup %2296  ;;  %1548 = vadd.xlane.f32.xlu1 %v1547_v28  ;;  %v2914_v10 = vadd.f32 %v2848_v41, %v1104_v53  ;;  %v1096_v28 = vmul.f32 %v2829_v18, %v2839_v33  ;;  %v1099_v53 = vmul.f32 %v2839_v33, %v2859_v63 }
 0x28b   : > { %v1495_v34 = vadd.f32 %v2834_v24, %v1472_v23  ;;  %v1458_v37 = vmul.f32 2.0, %v2200_v17  ;;  %v1525_v39 = vadd.f32 1.0, %v1509_v26  ;;  %v1556_v40 = vsel %vm1546_vm3, %v2896_v30, 0.0 }
 0x28c   : > { %1557 = vadd.xlane.f32.xlu0 %v1556_v40  ;;  %v1106_v26 = vmul.f32 %v2168_v29, %v2839_v33  ;;  %v1445_v29 = vmul.f32 2.0, %v2842_v38 }
 0x28d   : > { %v1511_v46 = vmax.f32 %v1495_v34, 0.0  ;;  %v1474_v47 = vsub.f32 %v1442_v25, %v1458_v37  ;;  %2306 = vrcp.f32 %v1525_v39  ;;  %v1108_v34 = vmul.f32 %v2171_v16, %v2839_v33  ;;  %v1069_v37 = vpop.f32.mrf.mxu0 }
 0x28e   : > { %v2908_v56 = vpop.eup %2298  ;;  %v2929_v36 = vadd.f32 %v2848_v41, %v1106_v26  ;;  %v1461_v63 = vsub.f32 %v2827_v15, %v1445_v29  ;;  %v1101_v26 = vmul.f32 %v2839_v33, %v2870_v27  ;;  %v1449_v27 = vmul.f32 2.0, %v2868_v22 }
 0x28f   : > { %v1527_v61 = vadd.f32 1.0, %v1511_v46  ;;  %v1497_v0 = vadd.f32 %v2834_v24, %v1474_v47  ;;  %v1562_v9 = vsel %vm1546_vm3, %v2908_v56, 0.0  ;;  %v2932_v46 = vadd.f32 %v2848_v41, %v1108_v34  ;;  %v2174_v47 = vpop.f32.mrf.mxu0 }
 0x290   : > { %1563 = vadd.xlane.f32.xlu0 %v1562_v9  ;;  %v1110_v18 = vmul.f32 %v2174_v47, %v2839_v33  ;;  %v2968_v29 = vadd.f32 %v2848_v41, %v1101_v26  ;;  %v1451_v22 = vmul.f32 2.0, %v2874_v35 }
 0x291   : > { %2308 = vrcp.f32 %v1527_v61  ;;  %v1513_v12 = vmax.f32 %v1497_v0, 0.0  ;;  %v2939_v61 = vadd.f32 %v2848_v41, %v1096_v28  ;;  %v1409_v0 = vpop.xlane.xlu1 %1408 }
 0x292   : > { %v2916_v14 = vpop.eup %2300  ;;  %v2946_v16 = vadd.f32 %v2848_v41, %v1110_v18  ;;  %vm1140_vm7 = vcmp.gt.f32.partialorder %v2968_v29, 0.0 }
 0x293   : > { %v1529_v45 = vadd.f32 1.0, %v1513_v12  ;;  %v1568_v23 = vsel %vm1546_vm3, %v2916_v14, 0.0  ;;  %v2303_v25 = vpop.eup %2302  ;;  %vm1135_vm5 = vcmp.gt.f32.partialorder %v2939_v61, 0.0 }
 0x294   : > { %1569 = vadd.xlane.f32.xlu0 %v1568_v23  ;;  %v2008_v40 = vadd.f32 -1.0, %v2303_v25  ;;  %v2954_v23 = vadd.f32 %v2848_v41, %v1099_v53  ;;  %v1103_v53 = vmul.f32 %v2839_v33, %v2885_v1  ;;  %v1105_v1 = vmul.f32 %v2839_v33, %v2906_v55 }
 0x295   : > { %2310 = vrcp.f32 %v1529_v45  ;;  %v1447_v45 = vmul.f32 2.0, %v2857_v62  ;;  %v1415_v34 = vpop.xlane.xlu1 %1414  ;;  %v1453_v55 = vmul.f32 2.0, %v2881_v54 }
 0x296   : > { %v2921_v17 = vpop.eup %2304  ;;  %v1214_v12 = vsel %vm1134_vm4, %v2865_v13, %v2008_v40  ;;  %v1151_v13 = vmin.f32 %v2939_v61, 0.0  ;;  %v1154_v62 = vmin.f32 %v2954_v23, 0.0  ;;  %v1465_v26 = vsub.f32 %v1415_v34, %v1449_v27 }
 0x297   : > { %v1574_v39 = vsel %vm1546_vm3, %v2921_v17, 0.0  ;;  %v1463_v15 = vsub.f32 %v1409_v0, %v1447_v45  ;;  %v1156_v45 = vmin.f32 %v2968_v29, 0.0  ;;  %vm1138_vm6 = vcmp.gt.f32.partialorder %v2954_v23, 0.0 }
 0x298   : > { %1575 = vadd.xlane.f32.xlu0 %v1574_v39  ;;  %v1484_v39 = vadd.f32 %v2834_v24, %v1461_v63  ;;  %v1168_v47 = vmul.f32 1.442695, %v1151_v13  ;;  %v2978_v13 = vadd.f32 %v2848_v41, %v1103_v53  ;;  %v1488_v53 = vadd.f32 %v2834_v24, %v1465_v26 }
 0x299   : > { %v1486_v0 = vadd.f32 %v2834_v24, %v1463_v15  ;;  %v1421_v63 = vpop.xlane.xlu1 %1420  ;;  %v1178_v15 = vmul.f32 1.442695, %v1156_v45  ;;  %vm1145_vm4 = vcmp.gt.f32.partialorder %v2929_v36, 0.0 }
 0x29a   : > { %v2942_v9 = vpop.eup %2306  ;;  %2312 = vpow2.f32 %v1168_v47  ;;  %v2985_v47 = vadd.f32 %v2848_v41, %v1105_v1  ;;  %v1467_v3 = vsub.f32 %v1421_v63, %v1451_v22  ;;  %v1504_v45 = vmax.f32 %v1488_v53, 0.0 }
 0x29b   : > { %1643 = vrot.lane.b32.xlu1 %v1214_v12, %s2446_s25  ;;  %v1580_v38 = vsel %vm1546_vm3, %v2942_v9, 0.0  ;;  %v1500_v12 = vmax.f32 %v1484_v39, 0.0  ;;  %v1502_v6 = vmax.f32 %v1486_v0, 0.0  ;;  %v1079_v39 = vpop.f32.mrf.mxu0  ;;  %v1455_v63 = vmul.f32 2.0, %v2892_v21 }
 0x29c   : > { %1581 = vadd.xlane.f32.xlu0 %v1580_v38  ;;  %v1174_v38 = vmul.f32 1.442695, %v1154_v62  ;;  %v1158_v62 = vmin.f32 %v2978_v13, 0.0  ;;  %v1109_v35 = vmul.f32 %v2839_v33, %v1079_v39  ;;  %v1160_v0 = vmin.f32 %v2985_v47, 0.0 }
 0x29d   : > { %v1427_v34 = vpop.xlane.xlu1 %1426  ;;  %v1518_v27 = vadd.f32 1.0, %v1502_v6  ;;  %vm1142_vm8 = vcmp.gt.f32.partialorder %v2978_v13, 0.0  ;;  %vm1144_vm9 = vcmp.gt.f32.partialorder %v2985_v47, 0.0 }
 0x29e   : > { %v2956_v25 = vpop.eup %2308  ;;  %2314 = vpow2.f32 %v1174_v38  ;;  %v1469_v1 = vsub.f32 %v1427_v34, %v1453_v55  ;;  %v2998_v54 = vadd.f32 %v2848_v41, %v1109_v35  ;;  %v1186_v6 = vmul.f32 1.442695, %v1160_v0 }
 0x29f   : > { %v1586_v28 = vsel %vm1546_vm3, %v2956_v25, 0.0 }
 0x2a0   : > { %1587 = vadd.xlane.f32.xlu0 %v1586_v28  ;;  %v1516_v28 = vadd.f32 1.0, %v1500_v12  ;;  %v1182_v12 = vmul.f32 1.442695, %v1158_v62  ;;  %vm1148_vm11 = vcmp.gt.f32.partialorder %v2998_v54, 0.0 }
 0x2a2   : > { %v2965_v40 = vpop.eup %2310  ;;  %2316 = vrcp.f32 %v1516_v28  ;;  %v1520_v28 = vadd.f32 1.0, %v1504_v45 }
 0x2a3   : > { %v1592_v18 = vsel %vm1546_vm3, %v2965_v40, 0.0  ;;  %2318 = vpow2.f32 %v1178_v15  ;;  %v1492_v15 = vadd.f32 %v2834_v24, %v1469_v1 }
 0x2a4   : > { %1593 = vadd.xlane.f32.xlu0 %v1592_v18  ;;  %v1107_v18 = vmul.f32 %v2839_v33, %v1069_v37  ;;  %v1490_v37 = vadd.f32 %v2834_v24, %v1467_v3  ;;  %2320 = vrcp.f32 %v1518_v27  ;;  %v1433_v33 = vpop.xlane.xlu1 %1432  ;;  %v1164_v3 = vmin.f32 %v2998_v54, 0.0 }
 0x2a5   : > { %2322 = vpow2.f32 %v1182_v12  ;;  %v1471_v62 = vsub.f32 %v1433_v33, %v1455_v63  ;;  %v1508_v55 = vmax.f32 %v1492_v15, 0.0 }
 0x2a6   : > { %v2993_v38 = vadd.f32 %v2848_v41, %v1107_v18  ;;  %v1506_v39 = vmax.f32 %v1490_v37, 0.0  ;;  %2324 = vpow2.f32 %v1186_v6  ;;  %v1194_v35 = vmul.f32 1.442695, %v1164_v3 }
 0x2a7   : > { %v2313_v22 = vpop.eup %2312  ;;  %2326 = vrcp.f32 %v1520_v28  ;;  %v1494_v34 = vadd.f32 %v2834_v24, %v1471_v62  ;;  %v1524_v37 = vadd.f32 1.0, %v1508_v55 }
 0x2a8   : > { %v1162_v26 = vmin.f32 %v2993_v38, 0.0  ;;  %v2009_v53 = vadd.f32 -1.0, %v2313_v22  ;;  %v1522_v41 = vadd.f32 1.0, %v1506_v39  ;;  %vm1146_vm10 = vcmp.gt.f32.partialorder %v2993_v38, 0.0 }
 0x2a9   : > { %v1510_v1 = vmax.f32 %v1494_v34, 0.0 }
 0x2aa   : > { %v1190_v21 = vmul.f32 1.442695, %v1162_v26  ;;  %v1215_v12 = vsel %vm1135_vm5, %v2939_v61, %v2009_v53  ;;  %vm1147_vm5 = vcmp.gt.f32.partialorder %v2932_v46, 0.0 }
 0x2ab   : > { %v2315_v18 = vpop.eup %2314  ;;  %v1526_v22 = vadd.f32 1.0, %v1510_v1 }
 0x2ac   : > { %2328 = vpow2.f32 %v1190_v21  ;;  %v2012_v0 = vadd.f32 -1.0, %v2315_v18 }
 0x2ad   : > { %2330 = vrcp.f32 %v1522_v41  ;;  %v1152_v41 = vmin.f32 %v2862_v4, 0.0 }
 0x2ae   : > { %2332 = vpow2.f32 %v1194_v35  ;;  %v1218_v33 = vsel %vm1138_vm6, %v2954_v23, %v2012_v0  ;;  %v1153_v0 = vmin.f32 %v2852_v50, 0.0  ;;  %vm1149_vm6 = vcmp.gt.f32.partialorder %v2946_v16, 0.0 }
 0x2af   : > { %v3005_v27 = vpop.eup %2316  ;;  %2334 = vrcp.f32 %v1524_v37 }
 0x2b0   : > { %v2319_v45 = vpop.eup %2318  ;;  %v1553_v61 = vsel %vm1546_vm3, %v3005_v27, 0.0  ;;  %2336 = vrcp.f32 %v1526_v22 }
 0x2b1   : > { %v3010_v63 = vpop.eup %2320  ;;  %v2014_v6 = vadd.f32 -1.0, %v2319_v45  ;;  %v1170_v45 = vmul.f32 1.442695, %v1152_v41 }
 0x2b2   : > { %v2323_v26 = vpop.eup %2322  ;;  %v1559_v23 = vsel %vm1546_vm3, %v3010_v63, 0.0 }
 0x2b3   : > { %v1220_v28 = vsel %vm1140_vm7, %v2968_v29, %v2014_v6  ;;  %v2016_v39 = vadd.f32 -1.0, %v2323_v26  ;;  %v2325_v15 = vpop.eup %2324  ;;  %v1172_v6 = vmul.f32 1.442695, %v1153_v0  ;;  %2338 = vpow2.f32 %v1170_v45 }
 0x2b4   : > { %v3022_v62 = vpop.eup %2326  ;;  %v2018_v18 = vadd.f32 -1.0, %v2325_v15  ;;  %v1161_v45 = vmin.f32 %v2929_v36, 0.0  ;;  %vm1804_vm7 = vcmask 326656  }
 0x2b5   : > { %v1222_v3 = vsel %vm1142_vm8, %v2978_v13, %v2016_v39  ;;  %v1565_v29 = vsel %vm1546_vm3, %v3022_v62, 0.0  ;;  %2340 = vpow2.f32 %v1172_v6 }
 0x2b6   : > { %v1224_v34 = vsel %vm1144_vm9, %v2985_v47, %v2018_v18  ;;  %v1439_v18 = vpop.xlane.xlu1 %1438 }
 0x2b9   : > { %v2329_v21 = vpop.eup %2328 }
 0x2ba   : > { %1645 = vrot.lane.b32.xlu0 %v1215_v12, %s2446_s25  ;;  %v3029_v53 = vpop.eup %2330  ;;  %v2020_v35 = vadd.f32 -1.0, %v2329_v21 }
 0x2bb   : > { %v2333_v55 = vpop.eup %2332  ;;  %v1571_v13 = vsel %vm1546_vm3, %v3029_v53, 0.0 }
 0x2bc   : > { %v3037_v12 = vpop.eup %2334  ;;  %v2022_v37 = vadd.f32 -1.0, %v2333_v55  ;;  %v1226_v1 = vsel %vm1146_vm10, %v2993_v38, %v2020_v35  ;;  %v1157_v35 = vmin.f32 %v2903_v51, 0.0 }
 0x2bd   : > { %v1577_v47 = vsel %vm1546_vm3, %v3037_v12, 0.0 }
 0x2be   : > { %1651 = vrot.lane.b32.xlu0 %v1218_v33, %s2446_s25  ;;  %v3045_v33 = vpop.eup %2336  ;;  %v1228_v26 = vsel %vm1148_vm11, %v2998_v54, %v2022_v37  ;;  %v1180_v0 = vmul.f32 1.442695, %v1157_v35 }
 0x2bf   : > { %1554 = vadd.xlane.f32.xlu1 %v1553_v61  ;;  %v1583_v22 = vsel %vm1546_vm3, %v3045_v33, 0.0 }
 0x2c0   : > { %v2339_v38 = vpop.eup %2338 }
 0x2c1   : > { %v2010_v61 = vadd.f32 -1.0, %v2339_v38  ;;  %v1165_v38 = vmin.f32 %v2946_v16, 0.0 }
 0x2c2   : > { %1655 = vrot.lane.b32.xlu0 %v1220_v28, %s2446_s25  ;;  %v2341_v28 = vpop.eup %2340 }
 0x2c3   : > { %1560 = vadd.xlane.f32.xlu1 %v1559_v23  ;;  %v1216_v39 = vsel %vm1136_vm12, %v2862_v4, %v2010_v61  ;;  %v2011_v15 = vadd.f32 -1.0, %v2341_v28  ;;  %v1370_v23 = vpop.f32.mrf.mxu1  ;;  %v1155_v4 = vmin.f32 %v2878_v42, 0.0 }
 0x2c4   : > { %v1457_v54 = vmul.f32 2.0, %v1370_v23 }
 0x2c6   : > { %1659 = vrot.lane.b32.xlu0 %v1222_v3, %s2446_s25  ;;  %v1217_v3 = vsel %vm1137_vm13, %v2852_v50, %v2011_v15  ;;  %v1473_v21 = vsub.f32 %v1439_v18, %v1457_v54  ;;  %v1159_v50 = vmin.f32 %v2914_v10, 0.0  ;;  %v1196_v15 = vmul.f32 1.442695, %v1165_v38 }
 0x2c7   : > { %1566 = vadd.xlane.f32.xlu1 %v1565_v29 }
 0x2c8   : > { %v1496_v29 = vadd.f32 %v2834_v24, %v1473_v21  ;;  %v1184_v24 = vmul.f32 1.442695, %v1159_v50 }
 0x2ca   : > { %1663 = vrot.lane.b32.xlu0 %v1224_v34, %s2446_s25  ;;  %v1512_v41 = vmax.f32 %v1496_v29, 0.0  ;;  %v1176_v34 = vmul.f32 1.442695, %v1155_v4 }
 0x2cb   : > { %1572 = vadd.xlane.f32.xlu1 %v1571_v13 }
 0x2cc   : > { %v1528_v55 = vadd.f32 1.0, %v1512_v41 }
 0x2ce   : > { %1667 = vrot.lane.b32.xlu0 %v1226_v1, %s2446_s25  ;;  %2342 = vrcp.f32 %v1528_v55  ;;  %v1188_v1 = vmul.f32 1.442695, %v1161_v45 }
 0x2cf   : > { %1578 = vadd.xlane.f32.xlu1 %v1577_v47  ;;  %2344 = vpow2.f32 %v1176_v34  ;;  %v1163_v47 = vmin.f32 %v2932_v46, 0.0 }
 0x2d0   : > { %2346 = vpow2.f32 %v1180_v0 }
 0x2d1   : > { %2348 = vpow2.f32 %v1184_v24 }
 0x2d2   : > { %1671 = vrot.lane.b32.xlu0 %v1228_v26, %s2446_s25  ;;  %2350 = vpow2.f32 %v1188_v1 }
 0x2d3   : > { %1584 = vadd.xlane.f32.xlu1 %v1583_v22  ;;  %v1192_v22 = vmul.f32 1.442695, %v1163_v47 }
 0x2db   : > { %v3060_v13 = vpop.eup %2342 }
 0x2dc   : > { %v1589_v37 = vsel %vm1546_vm3, %v3060_v13, 0.0  ;;  %v2345_v61 = vpop.eup %2344  ;;  %vm1143_vm3 = vcmp.gt.f32.partialorder %v2914_v10, 0.0 }
 0x2dd   : > { %v2013_v54 = vadd.f32 -1.0, %v2345_v61 }
 0x2df   : > { %v1219_v21 = vsel %vm1139_vm15, %v2878_v42, %v2013_v54 }
 0x2e4   : > { %1647 = vrot.lane.b32.xlu1 %v1216_v39, %s2446_s25 }
 0x2e8   : > { %1649 = vrot.lane.b32.xlu1 %v1217_v3, %s2446_s25  ;;  %v2347_v3 = vpop.eup %2346 }
 0x2e9   : > { %v2015_v29 = vadd.f32 -1.0, %v2347_v3  ;;  %v2349_v41 = vpop.eup %2348 }
 0x2ea   : > { %v2351_v4 = vpop.eup %2350 }
 0x2eb   : > { %v1221_v34 = vsel %vm1141_vm0, %v2903_v51, %v2015_v29  ;;  %v2019_v45 = vadd.f32 -1.0, %v2351_v4 }
 0x2ed   : > { %v1225_v51 = vsel %vm1145_vm4, %v2929_v36, %v2019_v45 }
 0x30c   : > { %1590 = vadd.xlane.f32.xlu1 %v1589_v37 }
 0x311   : > { %v1552_v6 = vpop.xlane.xlu0 %1551 }
 0x313   : > { %v1549_v26 = vpop.xlane.xlu1 %1548 }
 0x314   : > { %2352 = vrcp.f32 %v1549_v26 }
 0x315   : > { %v1558_v28 = vpop.xlane.xlu0 %1557  ;;  %2354 = vpow2.f32 %v1192_v22 }
 0x316   : > { %2356 = vpow2.f32 %v1196_v15 }
 0x317   : > { %v3068_v39 = vpop.permute.xlu1 %1643  ;;  %2358 = vrcp.f32 %v1552_v6 }
 0x318   : > { %v1772_v23 = vsel %vm1771_vm14, %v2692_v48, %v3068_v39  ;;  %v2017_v48 = vadd.f32 -1.0, %v2349_v41  ;;  %2360 = vrcp.f32 %v1558_v28 }
 0x319   : > { %1821 = vst [vmem:[%s2588_s30] sm:$0xff] %v1772_v23  ;;  %v1564_v18 = vpop.xlane.xlu0 %1563 }
 0x31a   : > { %v1223_v42 = vsel %vm1143_vm3, %v2914_v10, %v2017_v48  ;;  %2362 = vrcp.f32 %v1564_v18 }
 0x31d   : > { %1653 = vrot.lane.b32.xlu1 %v1219_v21, %s2446_s25  ;;  %v1570_v55 = vpop.xlane.xlu0 %1569 }
 0x31e   : > { %2364 = vrcp.f32 %v1570_v55 }
 0x321   : > { %v2353_v35 = vpop.eup %2352  ;;  %1657 = vrot.lane.b32.xlu1 %v1221_v34, %s2446_s25  ;;  %v1576_v0 = vpop.xlane.xlu0 %1575 }
 0x322   : > { %v1596_v50 = vmul.f32 %v2353_v35, %v2887_v11  ;;  %v2355_v37 = vpop.eup %2354  ;;  %2366 = vrcp.f32 %v1576_v0 }
 0x323   : > { %v2021_v1 = vadd.f32 -1.0, %v2355_v37  ;;  %v2357_v47 = vpop.eup %2356 }
 0x324   : > { %1707 = vrot.lane.b32.xlu0 %v1596_v50, %s2445_s13  ;;  %v2023_v6 = vadd.f32 -1.0, %v2357_v47  ;;  %v2359_v36 = vpop.eup %2358 }
 0x325   : > { %1661 = vrot.lane.b32.xlu1 %v1223_v42, %s2446_s25  ;;  %v1582_v24 = vpop.xlane.xlu0 %1581  ;;  %v1227_v10 = vsel %vm1147_vm5, %v2932_v46, %v2021_v1  ;;  %v1598_v46 = vmul.f32 %v2359_v36, %v2883_v52  ;;  %v2361_v28 = vpop.eup %2360 }
 0x326   : > { %v1229_v22 = vsel %vm1149_vm6, %v2946_v16, %v2023_v6  ;;  %2368 = vrcp.f32 %v1582_v24  ;;  %v1602_v23 = vmul.f32 %v2361_v28, %v2896_v30 }
 0x329   : > { %1665 = vrot.lane.b32.xlu1 %v1225_v51, %s2446_s25  ;;  %v1588_v11 = vpop.xlane.xlu0 %1587 }
 0x32a   : > { %2370 = vrcp.f32 %v1588_v11 }
 0x32d   : > { %1669 = vrot.lane.b32.xlu1 %v1227_v10, %s2446_s25  ;;  %v1594_v26 = vpop.xlane.xlu0 %1593 }
 0x32e   : > { %2372 = vrcp.f32 %v1594_v26 }
 0x331   : > { %1673 = vrot.lane.b32.xlu1 %v1229_v22, %s2446_s25  ;;  %v3094_v38 = vpop.permute.xlu0 %1645 }
 0x332   : > { %v1773_v61 = vsel %vm1771_vm14, %v2705_v59, %v3094_v38  ;;  %v2363_v59 = vpop.eup %2362 }
 0x333   : > { %1823 = vst [vmem:[%s2588_s30 + $0x10] sm:$0xff] %v1773_v61  ;;  %v1606_v3 = vmul.f32 %v2363_v59, %v2908_v56 }
 0x335   : > { %1709 = vrot.lane.b32.xlu1 %v1598_v46, %s2445_s13  ;;  %v3102_v15 = vpop.permute.xlu0 %1651 }
 0x336   : > { %v1776_v16 = vsel %vm1771_vm14, %v2722_v7, %v3102_v15  ;;  %v2365_v7 = vpop.eup %2364 }
 0x337   : > { %1829 = vst [vmem:[%s2588_s30 + $0x40] sm:$0xff] %v1776_v16  ;;  %v1610_v21 = vmul.f32 %v2365_v7, %v2916_v14  ;;  %v2367_v29 = vpop.eup %2366  ;;  %v3292_v7 = vld [vmem:[#allocation5_spill] sm:$0xff] }
 0x338   : > { %v1614_v41 = vmul.f32 %v2367_v29, %v2921_v17  ;;  %v2369_v55 = vpop.eup %2368 }
 0x339   : > { %1713 = vrot.lane.b32.xlu1 %v1602_v23, %s2445_s13  ;;  %v3110_v54 = vpop.permute.xlu0 %1655  ;;  %v1618_v4 = vmul.f32 %v2369_v55, %v2942_v9  ;;  %v2371_v34 = vpop.eup %2370 }
 0x33a   : > { %v1778_v52 = vsel %vm1771_vm14, %v2738_v19, %v3110_v54 }
 0x33b   : > { %1833 = vst [vmem:[%s2588_s30 + $0x60] sm:$0xff] %v1778_v52  ;;  %v2373_v0 = vpop.eup %2372 }
 0x33c   : > { %v1626_v9 = vmul.f32 %v2373_v0, %v2965_v40 }
 0x33d   : > { %1717 = vrot.lane.b32.xlu1 %v1606_v3, %s2445_s13  ;;  %v3118_v18 = vpop.permute.xlu0 %1659 }
 0x33e   : > { %v1780_v30 = vsel %vm1771_vm14, %v2754_v31, %v3118_v18 }
 0x33f   : > { %1837 = vst [vmem:[%s2588_s30 + $0x80] sm:$0xff] %v1780_v30 }
 0x341   : > { %1721 = vrot.lane.b32.xlu1 %v1610_v21, %s2445_s13  ;;  %v3126_v19 = vpop.permute.xlu0 %1663 }
 0x342   : > { %v1782_v56 = vsel %vm1771_vm14, %v2770_v43, %v3126_v19  ;;  %v1769_v43 = vsel %vm753_vm1, %v2804_v5, %v2797_v2 }
 0x343   : > { %1841 = vst [vmem:[%s2588_s30 + $0xa0] sm:$0xff] %v1782_v56 }
 0x345   : > { %1725 = vrot.lane.b32.xlu1 %v1614_v41, %s2445_s13  ;;  %v3134_v31 = vpop.permute.xlu0 %1667 }
 0x346   : > { %v1784_v14 = vsel %vm1771_vm14, %v2786_v57, %v3134_v31  ;;  %v1622_v57 = vmul.f32 %v2371_v34, %v2956_v25 }
 0x347   : > { %1845 = vst [vmem:[%s2588_s30 + $0xc0] sm:$0xff] %v1784_v14 }
 0x348   : > { %v1555_v48 = vpop.xlane.xlu1 %1554 }
 0x349   : > { %2374 = vrcp.f32 %v1555_v48  ;;  %1729 = vrot.lane.b32.xlu1 %v1618_v4, %s2445_s13  ;;  %v3145_v17 = vpop.permute.xlu0 %1671 }
 0x34a   : > { %v1786_v35 = vsel %vm1771_vm14, %v1769_v43, %v3145_v17 }
 0x34b   : > { %1849 = vst [vmem:[%s2588_s30 + $0xe0] sm:$0xff] %v1786_v35 }
 0x34c   : > { %v1561_v50 = vpop.xlane.xlu1 %1560 }
 0x34d   : > { %2376 = vrcp.f32 %v1561_v50  ;;  %1733 = vrot.lane.b32.xlu1 %v1622_v57, %s2445_s13 }
 0x350   : > { %v1567_v42 = vpop.xlane.xlu1 %1566 }
 0x351   : > { %2378 = vrcp.f32 %v1567_v42  ;;  %1737 = vrot.lane.b32.xlu1 %v1626_v9, %s2445_s13 }
 0x354   : > { %v1573_v2 = vpop.xlane.xlu1 %1572 }
 0x355   : > { %2380 = vrcp.f32 %v1573_v2 }
 0x356   : > { %v2375_v5 = vpop.eup %2374 }
 0x357   : > { %v1600_v45 = vmul.f32 %v2375_v5, %v3005_v27 }
 0x358   : > { %v1579_v37 = vpop.xlane.xlu1 %1578 }
 0x359   : > { %2382 = vrcp.f32 %v1579_v37  ;;  %1711 = vrot.lane.b32.xlu0 %v1600_v45, %s2445_s13 }
 0x35a   : > { %v2377_v25 = vpop.eup %2376 }
 0x35b   : > { %v1604_v24 = vmul.f32 %v2377_v25, %v3010_v63 }
 0x35c   : > { %v1585_v51 = vpop.xlane.xlu1 %1584 }
 0x35d   : > { %2384 = vrcp.f32 %v1585_v51  ;;  %1715 = vrot.lane.b32.xlu0 %v1604_v24, %s2445_s13 }
 0x35e   : > { %v2379_v40 = vpop.eup %2378 }
 0x35f   : > { %v1608_v1 = vmul.f32 %v2379_v40, %v3022_v62 }
 0x360   : > { %v3159_v47 = vpop.permute.xlu1 %1647 }
 0x361   : > { %v1774_v27 = vsel %vm1771_vm14, %v2697_v49, %v3159_v47  ;;  %1719 = vrot.lane.b32.xlu0 %v1608_v1, %s2445_s13 }
 0x362   : > { %v2381_v11 = vpop.eup %2380  ;;  %1825 = vst [vmem:[%s2588_s30 + $0x20] sm:$0xff] %v1774_v27 }
 0x363   : > { %v1612_v63 = vmul.f32 %v2381_v11, %v3029_v53 }
 0x364   : > { %v1650_v10 = vpop.permute.xlu1 %1649 }
 0x365   : > { %v1775_v6 = vsel %vm1771_vm14, %v2710_v60, %v1650_v10  ;;  %1723 = vrot.lane.b32.xlu0 %v1612_v63, %s2445_s13 }
 0x366   : > { %v2383_v62 = vpop.eup %2382  ;;  %1827 = vst [vmem:[%s2588_s30 + $0x30] sm:$0xff] %v1775_v6 }
 0x367   : > { %v1616_v26 = vmul.f32 %v2383_v62, %v3037_v12 }
 0x369   : > { %1727 = vrot.lane.b32.xlu0 %v1616_v26, %s2445_s13 }
 0x36a   : > { %v2385_v49 = vpop.eup %2384 }
 0x36b   : > { %v1620_v36 = vmul.f32 %v2385_v49, %v3045_v33 }
 0x36d   : > { %1731 = vrot.lane.b32.xlu0 %v1620_v36, %s2445_s13 }
 0x395   : > { %v1591_v53 = vpop.xlane.xlu1 %1590 }
 0x396   : > { %2386 = vrcp.f32 %v1591_v53  ;;  %v1708_v60 = vpop.permute.xlu0 %1707 }
 0x397   : > { %v1788_v22 = vsel %vm870_vm2, %v3068_v39, %v1708_v60 }
 0x398   : > { %v1805_v61 = vsel %vm1804_vm7, %v1788_v22, 0.0 }
 0x399   : > { %1822 = vst [vmem:[%s2588_s30 + $0x8] sm:$0xff] %v1805_v61  ;;  %v1654_v12 = vpop.permute.xlu1 %1653 }
 0x39a   : > { %v1777_v46 = vsel %vm1771_vm14, %v2725_v8, %v1654_v12 }
 0x39b   : > { %1831 = vst [vmem:[%s2588_s30 + $0x50] sm:$0xff] %v1777_v46 }
 0x39d   : > { %v1658_v33 = vpop.permute.xlu1 %1657 }
 0x39e   : > { %v1779_v28 = vsel %vm1771_vm14, %v2741_v20, %v1658_v33 }
 0x39f   : > { %1835 = vst [vmem:[%s2588_s30 + $0x70] sm:$0xff] %v1779_v28 }
 0x3a1   : > { %v1662_v16 = vpop.permute.xlu1 %1661 }
 0x3a2   : > { %v1781_v39 = vsel %vm1771_vm14, %v2757_v32, %v1662_v16  ;;  %v3293_v32 = vld [vmem:[#allocation6_spill] sm:$0xff] }
 0x3a3   : > { %v2387_v23 = vpop.eup %2386  ;;  %1839 = vst [vmem:[%s2588_s30 + $0x90] sm:$0xff] %v1781_v39  ;;  %v1770_v30 = vsel %vm753_vm1, %v3293_v32, %v3292_v7 }
 0x3a4   : > { %v1624_v59 = vmul.f32 %v2387_v23, %v3060_v13 }
 0x3a5   : > { %v1666_v52 = vpop.permute.xlu1 %1665 }
 0x3a6   : > { %v1783_v8 = vsel %vm1771_vm14, %v2773_v44, %v1666_v52  ;;  %1735 = vrot.lane.b32.xlu0 %v1624_v59, %s2445_s13 }
 0x3a7   : > { %1843 = vst [vmem:[%s2588_s30 + $0xb0] sm:$0xff] %v1783_v8 }
 0x3a9   : > { %v1670_v20 = vpop.permute.xlu1 %1669 }
 0x3aa   : > { %v1785_v3 = vsel %vm1771_vm14, %v2789_v58, %v1670_v20 }
 0x3ab   : > { %1847 = vst [vmem:[%s2588_s30 + $0xd0] sm:$0xff] %v1785_v3 }
 0x3ad   : > { %v1674_v21 = vpop.permute.xlu1 %1673 }
 0x3ae   : > { %v1787_v13 = vsel %vm1771_vm14, %v1770_v30, %v1674_v21 }
 0x3af   : > { %1851 = vst [vmem:[%s2588_s30 + $0xf0] sm:$0xff] %v1787_v13 }
 0x3b1   : > { %v1710_v44 = vpop.permute.xlu1 %1709 }
 0x3b2   : > { %v1789_v29 = vsel %vm870_vm2, %v3094_v38, %v1710_v44 }
 0x3b3   : > { %v1806_v56 = vsel %vm1804_vm7, %v1789_v29, 0.0 }
 0x3b4   : > { %1824 = vst [vmem:[%s2588_s30 + $0x18] sm:$0xff] %v1806_v56 }
 0x3b5   : > { %v1714_v58 = vpop.permute.xlu1 %1713 }
 0x3b6   : > { %v1791_v41 = vsel %vm870_vm2, %v1650_v10, %v1714_v58 }
 0x3b7   : > { %v1808_v55 = vsel %vm1804_vm7, %v1791_v41, 0.0 }
 0x3b8   : > { %1828 = vst [vmem:[%s2588_s30 + $0x38] sm:$0xff] %v1808_v55 }
 0x3b9   : > { %v1718_v14 = vpop.permute.xlu1 %1717 }
 0x3ba   : > { %v1793_v4 = vsel %vm870_vm2, %v1654_v12, %v1718_v14 }
 0x3bb   : > { %v1810_v34 = vsel %vm1804_vm7, %v1793_v4, 0.0 }
 0x3bc   : > { %1832 = vst [vmem:[%s2588_s30 + $0x58] sm:$0xff] %v1810_v34 }
 0x3bd   : > { %v1722_v48 = vpop.permute.xlu1 %1721 }
 0x3be   : > { %v1795_v38 = vsel %vm870_vm2, %v1658_v33, %v1722_v48 }
 0x3bf   : > { %v1812_v43 = vsel %vm1804_vm7, %v1795_v38, 0.0 }
 0x3c0   : > { %1836 = vst [vmem:[%s2588_s30 + $0x78] sm:$0xff] %v1812_v43 }
 0x3c1   : > { %v1726_v35 = vpop.permute.xlu1 %1725 }
 0x3c2   : > { %v1797_v57 = vsel %vm870_vm2, %v1662_v16, %v1726_v35 }
 0x3c3   : > { %v1814_v0 = vsel %vm1804_vm7, %v1797_v57, 0.0 }
 0x3c4   : > { %1840 = vst [vmem:[%s2588_s30 + $0x98] sm:$0xff] %v1814_v0 }
 0x3c5   : > { %v1730_v50 = vpop.permute.xlu1 %1729 }
 0x3c6   : > { %v1799_v9 = vsel %vm870_vm2, %v1666_v52, %v1730_v50 }
 0x3c7   : > { %v1816_v42 = vsel %vm1804_vm7, %v1799_v9, 0.0 }
 0x3c8   : > { %1844 = vst [vmem:[%s2588_s30 + $0xb8] sm:$0xff] %v1816_v42 }
 0x3c9   : > { %v1734_v2 = vpop.permute.xlu1 %1733 }
 0x3ca   : > { %v1801_v5 = vsel %vm870_vm2, %v1670_v20, %v1734_v2 }
 0x3cb   : > { %v1818_v45 = vsel %vm1804_vm7, %v1801_v5, 0.0  ;;  %v1712_v37 = vpop.permute.xlu0 %1711 }
 0x3cc   : > { %1848 = vst [vmem:[%s2588_s30 + $0xd8] sm:$0xff] %v1818_v45  ;;  %v1790_v25 = vsel %vm870_vm2, %v3159_v47, %v1712_v37 }
 0x3cd   : > { %v1807_v24 = vsel %vm1804_vm7, %v1790_v25, 0.0  ;;  %v1738_v51 = vpop.permute.xlu1 %1737 }
 0x3ce   : > { %1826 = vst [vmem:[%s2588_s30 + $0x28] sm:$0xff] %v1807_v24  ;;  %v1803_v40 = vsel %vm870_vm2, %v1674_v21, %v1738_v51 }
 0x3cf   : > { %v1820_v1 = vsel %vm1804_vm7, %v1803_v40, 0.0  ;;  %v1716_v27 = vpop.permute.xlu0 %1715 }
 0x3d0   : > { %1852 = vst [vmem:[%s2588_s30 + $0xf8] sm:$0xff] %v1820_v1  ;;  %v1792_v11 = vsel %vm870_vm2, %v3102_v15, %v1716_v27 }
 0x3d1   : > { %v1809_v63 = vsel %vm1804_vm7, %v1792_v11, 0.0 }
 0x3d2   : > { %1830 = vst [vmem:[%s2588_s30 + $0x48] sm:$0xff] %v1809_v63 }
 0x3d3   : > { %v1720_v47 = vpop.permute.xlu0 %1719 }
 0x3d4   : > { %v1794_v10 = vsel %vm870_vm2, %v3110_v54, %v1720_v47 }
 0x3d5   : > { %v1811_v6 = vsel %vm1804_vm7, %v1794_v10, 0.0 }
 0x3d6   : > { %1834 = vst [vmem:[%s2588_s30 + $0x68] sm:$0xff] %v1811_v6 }
 0x3d7   : > { %v1724_v62 = vpop.permute.xlu0 %1723 }
 0x3d8   : > { %v1796_v26 = vsel %vm870_vm2, %v3118_v18, %v1724_v62 }
 0x3d9   : > { %v1813_v49 = vsel %vm1804_vm7, %v1796_v26, 0.0 }
 0x3da   : > { %1838 = vst [vmem:[%s2588_s30 + $0x88] sm:$0xff] %v1813_v49 }
 0x3db   : > { %v1728_v15 = vpop.permute.xlu0 %1727 }
 0x3dc   : > { %v1798_v36 = vsel %vm870_vm2, %v3126_v19, %v1728_v15 }
 0x3dd   : > { %v1815_v53 = vsel %vm1804_vm7, %v1798_v36, 0.0 }
 0x3de   : > { %1842 = vst [vmem:[%s2588_s30 + $0xa8] sm:$0xff] %v1815_v53 }
 0x3df   : > { %v1732_v60 = vpop.permute.xlu0 %1731 }
 0x3e0   : > { %v1800_v54 = vsel %vm870_vm2, %v3134_v31, %v1732_v60 }
 0x3e1   : > { %v1817_v22 = vsel %vm1804_vm7, %v1800_v54, 0.0 }
 0x3e2   : > { %1846 = vst [vmem:[%s2588_s30 + $0xc8] sm:$0xff] %v1817_v22 }
 0x418   : > { %v1736_v61 = vpop.permute.xlu0 %1735 }
 0x419   : > { %v1802_v18 = vsel %vm870_vm2, %v3145_v17, %v1736_v61 }
 0x41a   : > { %v1819_v12 = vsel %vm1804_vm7, %v1802_v18, 0.0 }
 0x41b   : > { %1850 = vst [vmem:[%s2588_s30 + $0xe8] sm:$0xff] %v1819_v12 }
 0x41c PF: > { %s18_s11 = sadd.s32 1, %s2442_s11   ;;  %s3294_s13 = sld [smem:[#allocation4_spill]] }
 0x41d   : > { %p15_p0 = scmp.ge.s32.totalorder %s18_s11, 6   ;;  %s3295_s27 = smov %s2422_s28 }
 0x41e   : > { %s3296_s28 = smov %s2543_s18  ;;  %s3297_s29 = smov %s2434_s9 }
 0x41f   : > { %s3298_s30 = smov %s2438_s10  ;;  %s3299_s9 = smov %s3302_s12 }
 0x420   :  { %17 = sbr.rel (!%p15_p0) target bundleno = 6 (0x6), region = 142 }
 0x422   : > { %s3300_s10 = smov %s3294_s13 }

</bundles_post_ra>
